<compile_context>
chip_gen: v7x
topology: tpu7x:2x2x1
jax: 0.10.0
libtpu: 0.0.40
codegen_flags: <defaults>
</compile_context>

<pallas_src>
import math

import jax
import jax.numpy as jnp
from jax.experimental import pallas as pl
from jax.experimental.pallas import tpu as pltpu

# ---- Config (mirrors the PyTorch module defaults) ----
EMBED_DIM = 32           # config['embed_dim'] default
NHEAD = 4
HEAD_DIM = EMBED_DIM // NHEAD
DENSE_UNITS = 64         # config['hidden_dim'] default
FFN_DIM = 2048           # nn.TransformerEncoderLayer default dim_feedforward
FFN_CHUNK = 512          # FFN_DIM tiling (keeps the 2048-wide intermediate small)
NUM_LAYERS = 2
LN_EPS = 1e-5


# ------------------------- shared math helpers -------------------------

def _layernorm(x, w, b):
    """LayerNorm over last dim, biased variance, eps=1e-5 (PyTorch semantics). f32."""
    mu = jnp.mean(x, axis=-1, keepdims=True)
    xc = x - mu
    var = jnp.mean(xc * xc, axis=-1, keepdims=True)
    inv = jax.lax.rsqrt(var + LN_EPS)
    return xc * inv * w + b


# ------------------------- fused Pallas kernel -------------------------

def fused_forward_kernel(x_ref, feat_ref,
                         wqkv_ref, bqkv_ref, wo_ref, bo_ref,
                         ln1w_ref, ln1b_ref, w1_ref, b1_ref,
                         w2_ref, b2_ref, ln2w_ref, ln2b_ref,
                         fp_w_ref, fp_b_ref, r1_w_ref, r1_b_ref,
                         r2_w_ref, r2_b_ref, r3_w_ref, r3_b_ref,
                         o_ref):
    """Entire forward pass: 2 post-norm encoder layers + mean-pool + regressor MLP."""
    B, S, D = x_ref.shape
    N = B * S
    x = x_ref[...].reshape(N, D)                             # (N, D) f32
    scale = 1.0 / math.sqrt(HEAD_DIM)

    for l in range(NUM_LAYERS):                              # static unroll over layers
        # ---- self attention ----
        qkv = jnp.dot(x.astype(jnp.bfloat16), wqkv_ref[l],
                      preferred_element_type=jnp.float32) + bqkv_ref[l]   # (N, 3D) f32

        attn = jnp.zeros((N, D), jnp.float32)
        for h in range(NHEAD):                               # static unroll over heads
            lo = h * HEAD_DIM
            q = qkv[:, lo:lo + HEAD_DIM].reshape(B, S, HEAD_DIM)
            k = qkv[:, D + lo:D + lo + HEAD_DIM].reshape(B, S, HEAD_DIM)
            v = qkv[:, 2 * D + lo:2 * D + lo + HEAD_DIM].reshape(B, S, HEAD_DIM)

            s = jnp.einsum('bqd,bkd->bqk',
                           q.astype(jnp.bfloat16), k.astype(jnp.bfloat16),
                           preferred_element_type=jnp.float32) * scale
            s = s - jnp.max(s, axis=-1, keepdims=True)       # softmax in f32
            p = jnp.exp(s)
            p = p * pl.reciprocal(jnp.sum(p, axis=-1, keepdims=True), approx=True)
            ctx = jnp.einsum('bqk,bkd->bqd',
                             p.astype(jnp.bfloat16), v.astype(jnp.bfloat16),
                             preferred_element_type=jnp.float32)          # (B, S, Hd)

            # concat_h(ctx_h) @ Wo  ==  sum_h ctx_h @ Wo[h*Hd:(h+1)*Hd, :]
            attn = attn + jnp.dot(
                ctx.reshape(N, HEAD_DIM).astype(jnp.bfloat16),
                wo_ref[l, lo:lo + HEAD_DIM, :],
                preferred_element_type=jnp.float32)
        attn = attn + bo_ref[l]

        # residual + norm1 (f32)
        x = _layernorm(x + attn, ln1w_ref[l], ln1b_ref[l])

        # ---- feed-forward (chunked over FFN_DIM) ----
        xb = x.astype(jnp.bfloat16)
        h2 = jnp.zeros((N, D), jnp.float32)
        for c in range(FFN_DIM // FFN_CHUNK):                # static unroll
            c0 = c * FFN_CHUNK
            h1 = jnp.dot(xb, w1_ref[l, :, c0:c0 + FFN_CHUNK],
                         preferred_element_type=jnp.float32) + b1_ref[l, :, c0:c0 + FFN_CHUNK]
            h1 = jnp.maximum(h1, 0.0)
            h2 = h2 + jnp.dot(h1.astype(jnp.bfloat16),
                              w2_ref[l, c0:c0 + FFN_CHUNK, :],
                              preferred_element_type=jnp.float32)
        h2 = h2 + b2_ref[l]

        # residual + norm2 (f32)
        x = _layernorm(x + h2, ln2w_ref[l], ln2b_ref[l])

    # ---- head: mean-pool over seq, feature_proj, concat, regressor MLP (f32) ----
    text_vec = jnp.mean(x.reshape(B, S, D), axis=1)                       # (B, D)
    struct = jnp.dot(feat_ref[...], fp_w_ref[...],
                     preferred_element_type=jnp.float32) + fp_b_ref[...]  # (B, DENSE)

    t_act = jnp.maximum(text_vec, 0.0)
    s_act = jnp.maximum(struct, 0.0)
    # concat([t, s], -1) @ r1_w  ==  t @ r1_w[:D] + s @ r1_w[D:]   (static ref slices)
    h = (jnp.dot(t_act, r1_w_ref[:D, :], preferred_element_type=jnp.float32)
         + jnp.dot(s_act, r1_w_ref[D:, :], preferred_element_type=jnp.float32)
         + r1_b_ref[...])
    h = jnp.maximum(h, 0.0)
    h = jnp.maximum(jnp.dot(h, r2_w_ref[...], preferred_element_type=jnp.float32)
                    + r2_b_ref[...], 0.0)
    out = jnp.dot(h, r3_w_ref[...], preferred_element_type=jnp.float32) + r3_b_ref[...]
    o_ref[...] = out                                                      # (B, 1)


# ------------------------- pallas_call wrapper -------------------------

def forward_pallas(x, features, p):
    args = (x, features,
            p['wqkv'], p['bqkv'], p['wo'], p['bo'],
            p['ln1_w'], p['ln1_b'], p['w1'], p['b1'],
            p['w2'], p['b2'], p['ln2_w'], p['ln2_b'],
            p['fp_w'], p['fp_b'], p['r1_w'], p['r1_b'],
            p['r2_w'], p['r2_b'], p['r3_w'], p['r3_b'])
    B = x.shape[0]
    return pl.pallas_call(
        fused_forward_kernel,
        out_shape=jax.ShapeDtypeStruct((B, 1), jnp.float32),
        in_specs=[pl.BlockSpec(memory_space=pltpu.MemorySpace.VMEM)] * len(args),
        out_specs=pl.BlockSpec(memory_space=pltpu.MemorySpace.VMEM),
    )(*args)


@jax.jit
def predict(params, features, tokens):
    # Embedding gather (glue; padding_idx=0 row is zeros in the table).
    x = params['embedding'][tokens].astype(jnp.float32)      # (B, S, D)
    return forward_pallas(x, features, params)


# ------------------------- parameter init (deterministic) -------------------------
# All weights are stored pre-transposed to (Din, Dout); transformer matmul weights
# are stored in bfloat16, everything else in float32.

def init_params(key, vocab_size, feature_dim):
    keys = iter(jax.random.split(key, 64))

    def nrm(shape, scale=0.02, dtype=jnp.float32):
        w = scale * jax.random.normal(next(keys), shape, dtype=jnp.float32)
        return w.astype(dtype)

    emb = nrm((vocab_size + 1, EMBED_DIM), 1.0)
    emb = emb.at[0].set(0.0)                                 # padding_idx=0

    layers = []
    for _ in range(NUM_LAYERS):
        layers.append(dict(
            wqkv=nrm((EMBED_DIM, 3 * EMBED_DIM), dtype=jnp.bfloat16),   # (Din, 3D)
            bqkv=nrm((1, 3 * EMBED_DIM)),
            wo=nrm((EMBED_DIM, EMBED_DIM), dtype=jnp.bfloat16),
            bo=nrm((1, EMBED_DIM)),
            ln1_w=jnp.ones((1, EMBED_DIM), jnp.float32),
            ln1_b=jnp.zeros((1, EMBED_DIM), jnp.float32),
            w1=nrm((EMBED_DIM, FFN_DIM), dtype=jnp.bfloat16),           # (D, FFN)
            b1=nrm((1, FFN_DIM)),
            w2=nrm((FFN_DIM, EMBED_DIM), dtype=jnp.bfloat16),           # (FFN, D)
            b2=nrm((1, EMBED_DIM)),
            ln2_w=jnp.ones((1, EMBED_DIM), jnp.float32),
            ln2_b=jnp.zeros((1, EMBED_DIM), jnp.float32),
        ))
    stacked = {k: jnp.stack([lp[k] for lp in layers]) for k in layers[0]}

    params = dict(
        embedding=emb,
        **stacked,
        fp_w=nrm((feature_dim, DENSE_UNITS)),                # (Din, Dout)
        fp_b=nrm((1, DENSE_UNITS)),
        r1_w=nrm((EMBED_DIM + DENSE_UNITS, DENSE_UNITS)),
        r1_b=nrm((1, DENSE_UNITS)),
        r2_w=nrm((DENSE_UNITS, DENSE_UNITS)),
        r2_b=nrm((1, DENSE_UNITS)),
        r3_w=nrm((DENSE_UNITS, 1)),
        r3_b=nrm((1, 1)),
    )
    return params


# ------------------------- pure-JAX f32 reference (sanity check) -------------------------

def reference(params, features, tokens):
    x = params['embedding'][tokens].astype(jnp.float32)
    B, S, D = x.shape
    for l in range(NUM_LAYERS):
        wqkv = params['wqkv'][l].astype(jnp.float32)
        qkv = x @ wqkv + params['bqkv'][l][0]
        q, k, v = qkv[..., :D], qkv[..., D:2 * D], qkv[..., 2 * D:]
        q = q.reshape(B, S, NHEAD, HEAD_DIM)
        k = k.reshape(B, S, NHEAD, HEAD_DIM)
        v = v.reshape(B, S, NHEAD, HEAD_DIM)
        s = jnp.einsum('bqhd,bkhd->bhqk', q, k) / math.sqrt(HEAD_DIM)
        p = jax.nn.softmax(s, axis=-1)
        attn = jnp.einsum('bhqk,bkhd->bqhd', p, v).reshape(B, S, D)
        attn = attn @ params['wo'][l].astype(jnp.float32) + params['bo'][l][0]
        x = _layernorm(x + attn, params['ln1_w'][l][0], params['ln1_b'][l][0])
        h = jax.nn.relu(x @ params['w1'][l].astype(jnp.float32) + params['b1'][l][0])
        h = h @ params['w2'][l].astype(jnp.float32) + params['b2'][l][0]
        x = _layernorm(x + h, params['ln2_w'][l][0], params['ln2_b'][l][0])
    text_vec = x.mean(axis=1)
    struct = features @ params['fp_w'] + params['fp_b'][0]
    h = jax.nn.relu(jnp.concatenate([text_vec, struct], axis=1))
    h = jax.nn.relu(h @ params['r1_w'] + params['r1_b'][0])
    h = jax.nn.relu(h @ params['r2_w'] + params['r2_b'][0])
    return h @ params['r3_w'] + params['r3_b'][0]


# ------------------------- main -------------------------

if __name__ == "__main__":
    vocab_size = 50
    feature_dim = 16
    B, S = 2, 8

    key = jax.random.PRNGKey(0)
    k_tok, k_feat, k_par = jax.random.split(key, 3)
    tokens = jax.random.randint(k_tok, (B, S), 0, vocab_size + 1, dtype=jnp.int32)
    features = jax.random.normal(k_feat, (B, feature_dim), dtype=jnp.float32)
    params = init_params(k_par, vocab_size, feature_dim)

    out = predict(params, features, tokens)
    out = jax.block_until_ready(out)
    assert out.shape == (B, 1), out.shape

    ref = reference(params, features, tokens)
    # bf16 MXU inputs + approx reciprocal -> small deviations vs f32 reference.
    assert jnp.allclose(out, ref, rtol=2e-2, atol=2e-2), (out, ref)

    print("KERNEL_OK")
</pallas_src>

<mosaic_0001>
module attributes {stable_mosaic.version = 11 : i64} {
  func.func @fused_forward_kernel(%arg0: memref<2x8x32xf32, #tpu.memory_space<vmem>>, %arg1: memref<2x16xf32, #tpu.memory_space<vmem>>, %arg2: memref<2x32x96xbf16, #tpu.memory_space<vmem>>, %arg3: memref<2x1x96xf32, #tpu.memory_space<vmem>>, %arg4: memref<2x32x32xbf16, #tpu.memory_space<vmem>>, %arg5: memref<2x1x32xf32, #tpu.memory_space<vmem>>, %arg6: memref<2x1x32xf32, #tpu.memory_space<vmem>>, %arg7: memref<2x1x32xf32, #tpu.memory_space<vmem>>, %arg8: memref<2x32x2048xbf16, #tpu.memory_space<vmem>>, %arg9: memref<2x1x2048xf32, #tpu.memory_space<vmem>>, %arg10: memref<2x2048x32xbf16, #tpu.memory_space<vmem>>, %arg11: memref<2x1x32xf32, #tpu.memory_space<vmem>>, %arg12: memref<2x1x32xf32, #tpu.memory_space<vmem>>, %arg13: memref<2x1x32xf32, #tpu.memory_space<vmem>>, %arg14: memref<16x64xf32, #tpu.memory_space<vmem>>, %arg15: memref<1x64xf32, #tpu.memory_space<vmem>>, %arg16: memref<96x64xf32, #tpu.memory_space<vmem>>, %arg17: memref<1x64xf32, #tpu.memory_space<vmem>>, %arg18: memref<64x64xf32, #tpu.memory_space<vmem>>, %arg19: memref<1x64xf32, #tpu.memory_space<vmem>>, %arg20: memref<64x1xf32, #tpu.memory_space<vmem>>, %arg21: memref<1x1xf32, #tpu.memory_space<vmem>>, %arg22: memref<2x1xf32, #tpu.memory_space<vmem>>) attributes {dimension_semantics = [], scalar_prefetch = 0 : i64, scratch_operands = 0 : i64, tpu.core_type = #tpu.core_type<tc>} {
    %c0 = arith.constant 0 : index
    %c0_0 = arith.constant 0 : index
    %c0_1 = arith.constant 0 : index
    %0 = vector.load %arg0[%c0, %c0_0, %c0_1] : memref<2x8x32xf32, #tpu.memory_space<vmem>>, vector<2x8x32xf32>
    %1 = vector.shape_cast %0 : vector<2x8x32xf32> to vector<16x32xf32>
    %2 = arith.truncf %1 : vector<16x32xf32> to vector<16x32xbf16>
    %c0_2 = arith.constant 0 : index
    %c0_3 = arith.constant 0 : index
    %c0_4 = arith.constant 0 : index
    %3 = vector.load %arg2[%c0_2, %c0_3, %c0_4] : memref<2x32x96xbf16, #tpu.memory_space<vmem>>, vector<1x32x96xbf16>
    %4 = vector.shape_cast %3 : vector<1x32x96xbf16> to vector<32x96xbf16>
    %cst = arith.constant dense<0.000000e+00> : vector<16x96xf32>
    %5 = tpu.matmul %2, %4, %cst {dimension_numbers = #tpu.dot_dimension_numbers<[1], [0], [0], [1], [0, 0, 1, 1], [], []>} : vector<16x32xbf16>, vector<32x96xbf16>, vector<16x96xf32> -> vector<16x96xf32>
    %c0_5 = arith.constant 0 : index
    %c0_6 = arith.constant 0 : index
    %c0_7 = arith.constant 0 : index
    %6 = vector.load %arg3[%c0_5, %c0_6, %c0_7] : memref<2x1x96xf32, #tpu.memory_space<vmem>>, vector<1x1x96xf32>
    %7 = vector.shape_cast %6 : vector<1x1x96xf32> to vector<1x96xf32>
    %8 = vector.broadcast %7 : vector<1x96xf32> to vector<16x96xf32>
    %9 = arith.addf %5, %8 : vector<16x96xf32>
    %cst_8 = arith.constant 0.000000e+00 : f32
    %10 = vector.broadcast %cst_8 : f32 to vector<16x32xf32>
    %11 = vector.extract_strided_slice %9 {offsets = [0, 0], sizes = [16, 8], strides = [1, 1]} : vector<16x96xf32> to vector<16x8xf32>
    %12 = vector.shape_cast %11 : vector<16x8xf32> to vector<2x8x8xf32>
    %13 = vector.extract_strided_slice %9 {offsets = [0, 32], sizes = [16, 8], strides = [1, 1]} : vector<16x96xf32> to vector<16x8xf32>
    %14 = vector.shape_cast %13 : vector<16x8xf32> to vector<2x8x8xf32>
    %15 = vector.extract_strided_slice %9 {offsets = [0, 64], sizes = [16, 8], strides = [1, 1]} : vector<16x96xf32> to vector<16x8xf32>
    %16 = vector.shape_cast %15 : vector<16x8xf32> to vector<2x8x8xf32>
    %17 = arith.truncf %12 : vector<2x8x8xf32> to vector<2x8x8xbf16>
    %18 = arith.truncf %14 : vector<2x8x8xf32> to vector<2x8x8xbf16>
    "tpu.trace_start"() <{level = 10 : i32, message = "bqd,bkd->bqk"}> : () -> ()
    %cst_9 = arith.constant dense<0.000000e+00> : vector<2x8x8xf32>
    %19 = tpu.matmul %17, %18, %cst_9 {dimension_numbers = #tpu.dot_dimension_numbers<[2], [2], [1], [1], [0, 0, 0, 1, 1, 1], [0], [0]>} : vector<2x8x8xbf16>, vector<2x8x8xbf16>, vector<2x8x8xf32> -> vector<2x8x8xf32>
    "tpu.trace_stop"() : () -> ()
    %cst_10 = arith.constant 0.353553385 : f32
    %20 = vector.broadcast %cst_10 : f32 to vector<2x8x8xf32>
    %21 = arith.mulf %19, %20 : vector<2x8x8xf32>
    %cst_11 = arith.constant dense<0xFF800000> : vector<2x8xf32>
    %22 = vector.multi_reduction <maximumf>, %21, %cst_11 [2] : vector<2x8x8xf32> to vector<2x8xf32>
    %23 = vector.shape_cast %22 : vector<2x8xf32> to vector<2x8x1xf32>
    %24 = vector.broadcast %23 : vector<2x8x1xf32> to vector<2x8x8xf32>
    %25 = arith.subf %21, %24 : vector<2x8x8xf32>
    %26 = math.exp %25 : vector<2x8x8xf32>
    %cst_12 = arith.constant dense<0.000000e+00> : vector<2x8xf32>
    %27 = vector.multi_reduction <add>, %26, %cst_12 [2] : vector<2x8x8xf32> to vector<2x8xf32>
    %28 = vector.shape_cast %27 : vector<2x8xf32> to vector<2x8x1xf32>
    %29 = tpu.reciprocal %28 {approx = true} : vector<2x8x1xf32> -> vector<2x8x1xf32>
    %30 = vector.broadcast %29 : vector<2x8x1xf32> to vector<2x8x8xf32>
    %31 = arith.mulf %26, %30 : vector<2x8x8xf32>
    %32 = arith.truncf %31 : vector<2x8x8xf32> to vector<2x8x8xbf16>
    %33 = arith.truncf %16 : vector<2x8x8xf32> to vector<2x8x8xbf16>
    "tpu.trace_start"() <{level = 10 : i32, message = "bqk,bkd->bqd"}> : () -> ()
    %cst_13 = arith.constant dense<0.000000e+00> : vector<2x8x8xf32>
    %34 = tpu.matmul %32, %33, %cst_13 {dimension_numbers = #tpu.dot_dimension_numbers<[2], [1], [1], [2], [0, 0, 0, 1, 1, 2], [0], [0]>} : vector<2x8x8xbf16>, vector<2x8x8xbf16>, vector<2x8x8xf32> -> vector<2x8x8xf32>
    "tpu.trace_stop"() : () -> ()
    %35 = vector.shape_cast %34 : vector<2x8x8xf32> to vector<16x8xf32>
    %36 = arith.truncf %35 : vector<16x8xf32> to vector<16x8xbf16>
    %c0_14 = arith.constant 0 : index
    %c0_15 = arith.constant 0 : index
    %c0_16 = arith.constant 0 : index
    %37 = vector.load %arg4[%c0_14, %c0_15, %c0_16] : memref<2x32x32xbf16, #tpu.memory_space<vmem>>, vector<1x8x32xbf16>
    %38 = vector.shape_cast %37 : vector<1x8x32xbf16> to vector<8x32xbf16>
    %cst_17 = arith.constant dense<0.000000e+00> : vector<16x32xf32>
    %39 = tpu.matmul %36, %38, %cst_17 {dimension_numbers = #tpu.dot_dimension_numbers<[1], [0], [0], [1], [0, 0, 1, 1], [], []>} : vector<16x8xbf16>, vector<8x32xbf16>, vector<16x32xf32> -> vector<16x32xf32>
    %40 = arith.addf %10, %39 : vector<16x32xf32>
    %41 = vector.extract_strided_slice %9 {offsets = [0, 8], sizes = [16, 8], strides = [1, 1]} : vector<16x96xf32> to vector<16x8xf32>
    %42 = vector.shape_cast %41 : vector<16x8xf32> to vector<2x8x8xf32>
    %43 = vector.extract_strided_slice %9 {offsets = [0, 40], sizes = [16, 8], strides = [1, 1]} : vector<16x96xf32> to vector<16x8xf32>
    %44 = vector.shape_cast %43 : vector<16x8xf32> to vector<2x8x8xf32>
    %45 = vector.extract_strided_slice %9 {offsets = [0, 72], sizes = [16, 8], strides = [1, 1]} : vector<16x96xf32> to vector<16x8xf32>
    %46 = vector.shape_cast %45 : vector<16x8xf32> to vector<2x8x8xf32>
    %47 = arith.truncf %42 : vector<2x8x8xf32> to vector<2x8x8xbf16>
    %48 = arith.truncf %44 : vector<2x8x8xf32> to vector<2x8x8xbf16>
    "tpu.trace_start"() <{level = 10 : i32, message = "bqd,bkd->bqk"}> : () -> ()
    %cst_18 = arith.constant dense<0.000000e+00> : vector<2x8x8xf32>
    %49 = tpu.matmul %47, %48, %cst_18 {dimension_numbers = #tpu.dot_dimension_numbers<[2], [2], [1], [1], [0, 0, 0, 1, 1, 1], [0], [0]>} : vector<2x8x8xbf16>, vector<2x8x8xbf16>, vector<2x8x8xf32> -> vector<2x8x8xf32>
    "tpu.trace_stop"() : () -> ()
    %cst_19 = arith.constant 0.353553385 : f32
    %50 = vector.broadcast %cst_19 : f32 to vector<2x8x8xf32>
    %51 = arith.mulf %49, %50 : vector<2x8x8xf32>
    %cst_20 = arith.constant dense<0xFF800000> : vector<2x8xf32>
    %52 = vector.multi_reduction <maximumf>, %51, %cst_20 [2] : vector<2x8x8xf32> to vector<2x8xf32>
    %53 = vector.shape_cast %52 : vector<2x8xf32> to vector<2x8x1xf32>
    %54 = vector.broadcast %53 : vector<2x8x1xf32> to vector<2x8x8xf32>
    %55 = arith.subf %51, %54 : vector<2x8x8xf32>
    %56 = math.exp %55 : vector<2x8x8xf32>
    %cst_21 = arith.constant dense<0.000000e+00> : vector<2x8xf32>
    %57 = vector.multi_reduction <add>, %56, %cst_21 [2] : vector<2x8x8xf32> to vector<2x8xf32>
    %58 = vector.shape_cast %57 : vector<2x8xf32> to vector<2x8x1xf32>
    %59 = tpu.reciprocal %58 {approx = true} : vector<2x8x1xf32> -> vector<2x8x1xf32>
    %60 = vector.broadcast %59 : vector<2x8x1xf32> to vector<2x8x8xf32>
    %61 = arith.mulf %56, %60 : vector<2x8x8xf32>
    %62 = arith.truncf %61 : vector<2x8x8xf32> to vector<2x8x8xbf16>
    %63 = arith.truncf %46 : vector<2x8x8xf32> to vector<2x8x8xbf16>
    "tpu.trace_start"() <{level = 10 : i32, message = "bqk,bkd->bqd"}> : () -> ()
    %cst_22 = arith.constant dense<0.000000e+00> : vector<2x8x8xf32>
    %64 = tpu.matmul %62, %63, %cst_22 {dimension_numbers = #tpu.dot_dimension_numbers<[2], [1], [1], [2], [0, 0, 0, 1, 1, 2], [0], [0]>} : vector<2x8x8xbf16>, vector<2x8x8xbf16>, vector<2x8x8xf32> -> vector<2x8x8xf32>
    "tpu.trace_stop"() : () -> ()
    %65 = vector.shape_cast %64 : vector<2x8x8xf32> to vector<16x8xf32>
    %66 = arith.truncf %65 : vector<16x8xf32> to vector<16x8xbf16>
    %c0_23 = arith.constant 0 : index
    %c8 = arith.constant 8 : index
    %c0_24 = arith.constant 0 : index
    %67 = vector.load %arg4[%c0_23, %c8, %c0_24] : memref<2x32x32xbf16, #tpu.memory_space<vmem>>, vector<1x8x32xbf16>
    %68 = vector.shape_cast %67 : vector<1x8x32xbf16> to vector<8x32xbf16>
    %cst_25 = arith.constant dense<0.000000e+00> : vector<16x32xf32>
    %69 = tpu.matmul %66, %68, %cst_25 {dimension_numbers = #tpu.dot_dimension_numbers<[1], [0], [0], [1], [0, 0, 1, 1], [], []>} : vector<16x8xbf16>, vector<8x32xbf16>, vector<16x32xf32> -> vector<16x32xf32>
    %70 = arith.addf %40, %69 : vector<16x32xf32>
    %71 = vector.extract_strided_slice %9 {offsets = [0, 16], sizes = [16, 8], strides = [1, 1]} : vector<16x96xf32> to vector<16x8xf32>
    %72 = vector.shape_cast %71 : vector<16x8xf32> to vector<2x8x8xf32>
    %73 = vector.extract_strided_slice %9 {offsets = [0, 48], sizes = [16, 8], strides = [1, 1]} : vector<16x96xf32> to vector<16x8xf32>
    %74 = vector.shape_cast %73 : vector<16x8xf32> to vector<2x8x8xf32>
    %75 = vector.extract_strided_slice %9 {offsets = [0, 80], sizes = [16, 8], strides = [1, 1]} : vector<16x96xf32> to vector<16x8xf32>
    %76 = vector.shape_cast %75 : vector<16x8xf32> to vector<2x8x8xf32>
    %77 = arith.truncf %72 : vector<2x8x8xf32> to vector<2x8x8xbf16>
    %78 = arith.truncf %74 : vector<2x8x8xf32> to vector<2x8x8xbf16>
    "tpu.trace_start"() <{level = 10 : i32, message = "bqd,bkd->bqk"}> : () -> ()
    %cst_26 = arith.constant dense<0.000000e+00> : vector<2x8x8xf32>
    %79 = tpu.matmul %77, %78, %cst_26 {dimension_numbers = #tpu.dot_dimension_numbers<[2], [2], [1], [1], [0, 0, 0, 1, 1, 1], [0], [0]>} : vector<2x8x8xbf16>, vector<2x8x8xbf16>, vector<2x8x8xf32> -> vector<2x8x8xf32>
    "tpu.trace_stop"() : () -> ()
    %cst_27 = arith.constant 0.353553385 : f32
    %80 = vector.broadcast %cst_27 : f32 to vector<2x8x8xf32>
    %81 = arith.mulf %79, %80 : vector<2x8x8xf32>
    %cst_28 = arith.constant dense<0xFF800000> : vector<2x8xf32>
    %82 = vector.multi_reduction <maximumf>, %81, %cst_28 [2] : vector<2x8x8xf32> to vector<2x8xf32>
    %83 = vector.shape_cast %82 : vector<2x8xf32> to vector<2x8x1xf32>
    %84 = vector.broadcast %83 : vector<2x8x1xf32> to vector<2x8x8xf32>
    %85 = arith.subf %81, %84 : vector<2x8x8xf32>
    %86 = math.exp %85 : vector<2x8x8xf32>
    %cst_29 = arith.constant dense<0.000000e+00> : vector<2x8xf32>
    %87 = vector.multi_reduction <add>, %86, %cst_29 [2] : vector<2x8x8xf32> to vector<2x8xf32>
    %88 = vector.shape_cast %87 : vector<2x8xf32> to vector<2x8x1xf32>
    %89 = tpu.reciprocal %88 {approx = true} : vector<2x8x1xf32> -> vector<2x8x1xf32>
    %90 = vector.broadcast %89 : vector<2x8x1xf32> to vector<2x8x8xf32>
    %91 = arith.mulf %86, %90 : vector<2x8x8xf32>
    %92 = arith.truncf %91 : vector<2x8x8xf32> to vector<2x8x8xbf16>
    %93 = arith.truncf %76 : vector<2x8x8xf32> to vector<2x8x8xbf16>
    "tpu.trace_start"() <{level = 10 : i32, message = "bqk,bkd->bqd"}> : () -> ()
    %cst_30 = arith.constant dense<0.000000e+00> : vector<2x8x8xf32>
    %94 = tpu.matmul %92, %93, %cst_30 {dimension_numbers = #tpu.dot_dimension_numbers<[2], [1], [1], [2], [0, 0, 0, 1, 1, 2], [0], [0]>} : vector<2x8x8xbf16>, vector<2x8x8xbf16>, vector<2x8x8xf32> -> vector<2x8x8xf32>
    "tpu.trace_stop"() : () -> ()
    %95 = vector.shape_cast %94 : vector<2x8x8xf32> to vector<16x8xf32>
    %96 = arith.truncf %95 : vector<16x8xf32> to vector<16x8xbf16>
    %c0_31 = arith.constant 0 : index
    %c16 = arith.constant 16 : index
    %c0_32 = arith.constant 0 : index
    %97 = vector.load %arg4[%c0_31, %c16, %c0_32] : memref<2x32x32xbf16, #tpu.memory_space<vmem>>, vector<1x8x32xbf16>
    %98 = vector.shape_cast %97 : vector<1x8x32xbf16> to vector<8x32xbf16>
    %cst_33 = arith.constant dense<0.000000e+00> : vector<16x32xf32>
    %99 = tpu.matmul %96, %98, %cst_33 {dimension_numbers = #tpu.dot_dimension_numbers<[1], [0], [0], [1], [0, 0, 1, 1], [], []>} : vector<16x8xbf16>, vector<8x32xbf16>, vector<16x32xf32> -> vector<16x32xf32>
    %100 = arith.addf %70, %99 : vector<16x32xf32>
    %101 = vector.extract_strided_slice %9 {offsets = [0, 24], sizes = [16, 8], strides = [1, 1]} : vector<16x96xf32> to vector<16x8xf32>
    %102 = vector.shape_cast %101 : vector<16x8xf32> to vector<2x8x8xf32>
    %103 = vector.extract_strided_slice %9 {offsets = [0, 56], sizes = [16, 8], strides = [1, 1]} : vector<16x96xf32> to vector<16x8xf32>
    %104 = vector.shape_cast %103 : vector<16x8xf32> to vector<2x8x8xf32>
    %105 = vector.extract_strided_slice %9 {offsets = [0, 88], sizes = [16, 8], strides = [1, 1]} : vector<16x96xf32> to vector<16x8xf32>
    %106 = vector.shape_cast %105 : vector<16x8xf32> to vector<2x8x8xf32>
    %107 = arith.truncf %102 : vector<2x8x8xf32> to vector<2x8x8xbf16>
    %108 = arith.truncf %104 : vector<2x8x8xf32> to vector<2x8x8xbf16>
    "tpu.trace_start"() <{level = 10 : i32, message = "bqd,bkd->bqk"}> : () -> ()
    %cst_34 = arith.constant dense<0.000000e+00> : vector<2x8x8xf32>
    %109 = tpu.matmul %107, %108, %cst_34 {dimension_numbers = #tpu.dot_dimension_numbers<[2], [2], [1], [1], [0, 0, 0, 1, 1, 1], [0], [0]>} : vector<2x8x8xbf16>, vector<2x8x8xbf16>, vector<2x8x8xf32> -> vector<2x8x8xf32>
    "tpu.trace_stop"() : () -> ()
    %cst_35 = arith.constant 0.353553385 : f32
    %110 = vector.broadcast %cst_35 : f32 to vector<2x8x8xf32>
    %111 = arith.mulf %109, %110 : vector<2x8x8xf32>
    %cst_36 = arith.constant dense<0xFF800000> : vector<2x8xf32>
    %112 = vector.multi_reduction <maximumf>, %111, %cst_36 [2] : vector<2x8x8xf32> to vector<2x8xf32>
    %113 = vector.shape_cast %112 : vector<2x8xf32> to vector<2x8x1xf32>
    %114 = vector.broadcast %113 : vector<2x8x1xf32> to vector<2x8x8xf32>
    %115 = arith.subf %111, %114 : vector<2x8x8xf32>
    %116 = math.exp %115 : vector<2x8x8xf32>
    %cst_37 = arith.constant dense<0.000000e+00> : vector<2x8xf32>
    %117 = vector.multi_reduction <add>, %116, %cst_37 [2] : vector<2x8x8xf32> to vector<2x8xf32>
    %118 = vector.shape_cast %117 : vector<2x8xf32> to vector<2x8x1xf32>
    %119 = tpu.reciprocal %118 {approx = true} : vector<2x8x1xf32> -> vector<2x8x1xf32>
    %120 = vector.broadcast %119 : vector<2x8x1xf32> to vector<2x8x8xf32>
    %121 = arith.mulf %116, %120 : vector<2x8x8xf32>
    %122 = arith.truncf %121 : vector<2x8x8xf32> to vector<2x8x8xbf16>
    %123 = arith.truncf %106 : vector<2x8x8xf32> to vector<2x8x8xbf16>
    "tpu.trace_start"() <{level = 10 : i32, message = "bqk,bkd->bqd"}> : () -> ()
    %cst_38 = arith.constant dense<0.000000e+00> : vector<2x8x8xf32>
    %124 = tpu.matmul %122, %123, %cst_38 {dimension_numbers = #tpu.dot_dimension_numbers<[2], [1], [1], [2], [0, 0, 0, 1, 1, 2], [0], [0]>} : vector<2x8x8xbf16>, vector<2x8x8xbf16>, vector<2x8x8xf32> -> vector<2x8x8xf32>
    "tpu.trace_stop"() : () -> ()
    %125 = vector.shape_cast %124 : vector<2x8x8xf32> to vector<16x8xf32>
    %126 = arith.truncf %125 : vector<16x8xf32> to vector<16x8xbf16>
    %c0_39 = arith.constant 0 : index
    %c24 = arith.constant 24 : index
    %c0_40 = arith.constant 0 : index
    %127 = vector.load %arg4[%c0_39, %c24, %c0_40] : memref<2x32x32xbf16, #tpu.memory_space<vmem>>, vector<1x8x32xbf16>
    %128 = vector.shape_cast %127 : vector<1x8x32xbf16> to vector<8x32xbf16>
    %cst_41 = arith.constant dense<0.000000e+00> : vector<16x32xf32>
    %129 = tpu.matmul %126, %128, %cst_41 {dimension_numbers = #tpu.dot_dimension_numbers<[1], [0], [0], [1], [0, 0, 1, 1], [], []>} : vector<16x8xbf16>, vector<8x32xbf16>, vector<16x32xf32> -> vector<16x32xf32>
    %130 = arith.addf %100, %129 : vector<16x32xf32>
    %c0_42 = arith.constant 0 : index
    %c0_43 = arith.constant 0 : index
    %c0_44 = arith.constant 0 : index
    %131 = vector.load %arg5[%c0_42, %c0_43, %c0_44] : memref<2x1x32xf32, #tpu.memory_space<vmem>>, vector<1x1x32xf32>
    %132 = vector.shape_cast %131 : vector<1x1x32xf32> to vector<1x32xf32>
    %133 = vector.broadcast %132 : vector<1x32xf32> to vector<16x32xf32>
    %134 = arith.addf %130, %133 : vector<16x32xf32>
    %135 = arith.addf %1, %134 : vector<16x32xf32>
    %c0_45 = arith.constant 0 : index
    %c0_46 = arith.constant 0 : index
    %c0_47 = arith.constant 0 : index
    %136 = vector.load %arg6[%c0_45, %c0_46, %c0_47] : memref<2x1x32xf32, #tpu.memory_space<vmem>>, vector<1x1x32xf32>
    %137 = vector.shape_cast %136 : vector<1x1x32xf32> to vector<1x32xf32>
    %c0_48 = arith.constant 0 : index
    %c0_49 = arith.constant 0 : index
    %c0_50 = arith.constant 0 : index
    %138 = vector.load %arg7[%c0_48, %c0_49, %c0_50] : memref<2x1x32xf32, #tpu.memory_space<vmem>>, vector<1x1x32xf32>
    %139 = vector.shape_cast %138 : vector<1x1x32xf32> to vector<1x32xf32>
    %cst_51 = arith.constant dense<0.000000e+00> : vector<16xf32>
    %140 = vector.multi_reduction <add>, %135, %cst_51 [1] : vector<16x32xf32> to vector<16xf32>
    %141 = vector.shape_cast %140 : vector<16xf32> to vector<16x1xf32>
    %cst_52 = arith.constant 3.200000e+01 : f32
    %142 = vector.broadcast %cst_52 : f32 to vector<16x1xf32>
    %143 = arith.divf %141, %142 : vector<16x1xf32>
    %144 = vector.broadcast %143 : vector<16x1xf32> to vector<16x32xf32>
    %145 = arith.subf %135, %144 : vector<16x32xf32>
    %146 = arith.mulf %145, %145 : vector<16x32xf32>
    %cst_53 = arith.constant dense<0.000000e+00> : vector<16xf32>
    %147 = vector.multi_reduction <add>, %146, %cst_53 [1] : vector<16x32xf32> to vector<16xf32>
    %148 = vector.shape_cast %147 : vector<16xf32> to vector<16x1xf32>
    %cst_54 = arith.constant 3.200000e+01 : f32
    %149 = vector.broadcast %cst_54 : f32 to vector<16x1xf32>
    %150 = arith.divf %148, %149 : vector<16x1xf32>
    %cst_55 = arith.constant 9.99999974E-6 : f32
    %151 = vector.broadcast %cst_55 : f32 to vector<16x1xf32>
    %152 = arith.addf %150, %151 : vector<16x1xf32>
    %153 = math.rsqrt %152 : vector<16x1xf32>
    %154 = vector.broadcast %153 : vector<16x1xf32> to vector<16x32xf32>
    %155 = arith.mulf %145, %154 : vector<16x32xf32>
    %156 = vector.broadcast %137 : vector<1x32xf32> to vector<16x32xf32>
    %157 = arith.mulf %155, %156 : vector<16x32xf32>
    %158 = vector.broadcast %139 : vector<1x32xf32> to vector<16x32xf32>
    %159 = arith.addf %157, %158 : vector<16x32xf32>
    %160 = arith.truncf %159 : vector<16x32xf32> to vector<16x32xbf16>
    %cst_56 = arith.constant 0.000000e+00 : f32
    %161 = vector.broadcast %cst_56 : f32 to vector<16x32xf32>
    %c0_57 = arith.constant 0 : index
    %c0_58 = arith.constant 0 : index
    %c0_59 = arith.constant 0 : index
    %162 = vector.load %arg8[%c0_57, %c0_58, %c0_59] : memref<2x32x2048xbf16, #tpu.memory_space<vmem>>, vector<1x32x512xbf16>
    %163 = vector.shape_cast %162 : vector<1x32x512xbf16> to vector<32x512xbf16>
    %cst_60 = arith.constant dense<0.000000e+00> : vector<16x512xf32>
    %164 = tpu.matmul %160, %163, %cst_60 {dimension_numbers = #tpu.dot_dimension_numbers<[1], [0], [0], [1], [0, 0, 1, 1], [], []>} : vector<16x32xbf16>, vector<32x512xbf16>, vector<16x512xf32> -> vector<16x512xf32>
    %c0_61 = arith.constant 0 : index
    %c0_62 = arith.constant 0 : index
    %c0_63 = arith.constant 0 : index
    %165 = vector.load %arg9[%c0_61, %c0_62, %c0_63] : memref<2x1x2048xf32, #tpu.memory_space<vmem>>, vector<1x1x512xf32>
    %166 = vector.shape_cast %165 : vector<1x1x512xf32> to vector<1x512xf32>
    %167 = vector.broadcast %166 : vector<1x512xf32> to vector<16x512xf32>
    %168 = arith.addf %164, %167 : vector<16x512xf32>
    %cst_64 = arith.constant 0.000000e+00 : f32
    %169 = vector.broadcast %cst_64 : f32 to vector<16x512xf32>
    %170 = arith.maximumf %168, %169 : vector<16x512xf32>
    %171 = arith.truncf %170 : vector<16x512xf32> to vector<16x512xbf16>
    %c0_65 = arith.constant 0 : index
    %c0_66 = arith.constant 0 : index
    %c0_67 = arith.constant 0 : index
    %172 = vector.load %arg10[%c0_65, %c0_66, %c0_67] : memref<2x2048x32xbf16, #tpu.memory_space<vmem>>, vector<1x512x32xbf16>
    %173 = vector.shape_cast %172 : vector<1x512x32xbf16> to vector<512x32xbf16>
    %cst_68 = arith.constant dense<0.000000e+00> : vector<16x32xf32>
    %174 = tpu.matmul %171, %173, %cst_68 {dimension_numbers = #tpu.dot_dimension_numbers<[1], [0], [0], [1], [0, 0, 1, 1], [], []>} : vector<16x512xbf16>, vector<512x32xbf16>, vector<16x32xf32> -> vector<16x32xf32>
    %175 = arith.addf %161, %174 : vector<16x32xf32>
    %c0_69 = arith.constant 0 : index
    %c0_70 = arith.constant 0 : index
    %c512 = arith.constant 512 : index
    %176 = vector.load %arg8[%c0_69, %c0_70, %c512] : memref<2x32x2048xbf16, #tpu.memory_space<vmem>>, vector<1x32x512xbf16>
    %177 = vector.shape_cast %176 : vector<1x32x512xbf16> to vector<32x512xbf16>
    %cst_71 = arith.constant dense<0.000000e+00> : vector<16x512xf32>
    %178 = tpu.matmul %160, %177, %cst_71 {dimension_numbers = #tpu.dot_dimension_numbers<[1], [0], [0], [1], [0, 0, 1, 1], [], []>} : vector<16x32xbf16>, vector<32x512xbf16>, vector<16x512xf32> -> vector<16x512xf32>
    %c0_72 = arith.constant 0 : index
    %c0_73 = arith.constant 0 : index
    %c512_74 = arith.constant 512 : index
    %179 = vector.load %arg9[%c0_72, %c0_73, %c512_74] : memref<2x1x2048xf32, #tpu.memory_space<vmem>>, vector<1x1x512xf32>
    %180 = vector.shape_cast %179 : vector<1x1x512xf32> to vector<1x512xf32>
    %181 = vector.broadcast %180 : vector<1x512xf32> to vector<16x512xf32>
    %182 = arith.addf %178, %181 : vector<16x512xf32>
    %cst_75 = arith.constant 0.000000e+00 : f32
    %183 = vector.broadcast %cst_75 : f32 to vector<16x512xf32>
    %184 = arith.maximumf %182, %183 : vector<16x512xf32>
    %185 = arith.truncf %184 : vector<16x512xf32> to vector<16x512xbf16>
    %c0_76 = arith.constant 0 : index
    %c512_77 = arith.constant 512 : index
    %c0_78 = arith.constant 0 : index
    %186 = vector.load %arg10[%c0_76, %c512_77, %c0_78] : memref<2x2048x32xbf16, #tpu.memory_space<vmem>>, vector<1x512x32xbf16>
    %187 = vector.shape_cast %186 : vector<1x512x32xbf16> to vector<512x32xbf16>
    %cst_79 = arith.constant dense<0.000000e+00> : vector<16x32xf32>
    %188 = tpu.matmul %185, %187, %cst_79 {dimension_numbers = #tpu.dot_dimension_numbers<[1], [0], [0], [1], [0, 0, 1, 1], [], []>} : vector<16x512xbf16>, vector<512x32xbf16>, vector<16x32xf32> -> vector<16x32xf32>
    %189 = arith.addf %175, %188 : vector<16x32xf32>
    %c0_80 = arith.constant 0 : index
    %c0_81 = arith.constant 0 : index
    %c1024 = arith.constant 1024 : index
    %190 = vector.load %arg8[%c0_80, %c0_81, %c1024] : memref<2x32x2048xbf16, #tpu.memory_space<vmem>>, vector<1x32x512xbf16>
    %191 = vector.shape_cast %190 : vector<1x32x512xbf16> to vector<32x512xbf16>
    %cst_82 = arith.constant dense<0.000000e+00> : vector<16x512xf32>
    %192 = tpu.matmul %160, %191, %cst_82 {dimension_numbers = #tpu.dot_dimension_numbers<[1], [0], [0], [1], [0, 0, 1, 1], [], []>} : vector<16x32xbf16>, vector<32x512xbf16>, vector<16x512xf32> -> vector<16x512xf32>
    %c0_83 = arith.constant 0 : index
    %c0_84 = arith.constant 0 : index
    %c1024_85 = arith.constant 1024 : index
    %193 = vector.load %arg9[%c0_83, %c0_84, %c1024_85] : memref<2x1x2048xf32, #tpu.memory_space<vmem>>, vector<1x1x512xf32>
    %194 = vector.shape_cast %193 : vector<1x1x512xf32> to vector<1x512xf32>
    %195 = vector.broadcast %194 : vector<1x512xf32> to vector<16x512xf32>
    %196 = arith.addf %192, %195 : vector<16x512xf32>
    %cst_86 = arith.constant 0.000000e+00 : f32
    %197 = vector.broadcast %cst_86 : f32 to vector<16x512xf32>
    %198 = arith.maximumf %196, %197 : vector<16x512xf32>
    %199 = arith.truncf %198 : vector<16x512xf32> to vector<16x512xbf16>
    %c0_87 = arith.constant 0 : index
    %c1024_88 = arith.constant 1024 : index
    %c0_89 = arith.constant 0 : index
    %200 = vector.load %arg10[%c0_87, %c1024_88, %c0_89] : memref<2x2048x32xbf16, #tpu.memory_space<vmem>>, vector<1x512x32xbf16>
    %201 = vector.shape_cast %200 : vector<1x512x32xbf16> to vector<512x32xbf16>
    %cst_90 = arith.constant dense<0.000000e+00> : vector<16x32xf32>
    %202 = tpu.matmul %199, %201, %cst_90 {dimension_numbers = #tpu.dot_dimension_numbers<[1], [0], [0], [1], [0, 0, 1, 1], [], []>} : vector<16x512xbf16>, vector<512x32xbf16>, vector<16x32xf32> -> vector<16x32xf32>
    %203 = arith.addf %189, %202 : vector<16x32xf32>
    %c0_91 = arith.constant 0 : index
    %c0_92 = arith.constant 0 : index
    %c1536 = arith.constant 1536 : index
    %204 = vector.load %arg8[%c0_91, %c0_92, %c1536] : memref<2x32x2048xbf16, #tpu.memory_space<vmem>>, vector<1x32x512xbf16>
    %205 = vector.shape_cast %204 : vector<1x32x512xbf16> to vector<32x512xbf16>
    %cst_93 = arith.constant dense<0.000000e+00> : vector<16x512xf32>
    %206 = tpu.matmul %160, %205, %cst_93 {dimension_numbers = #tpu.dot_dimension_numbers<[1], [0], [0], [1], [0, 0, 1, 1], [], []>} : vector<16x32xbf16>, vector<32x512xbf16>, vector<16x512xf32> -> vector<16x512xf32>
    %c0_94 = arith.constant 0 : index
    %c0_95 = arith.constant 0 : index
    %c1536_96 = arith.constant 1536 : index
    %207 = vector.load %arg9[%c0_94, %c0_95, %c1536_96] : memref<2x1x2048xf32, #tpu.memory_space<vmem>>, vector<1x1x512xf32>
    %208 = vector.shape_cast %207 : vector<1x1x512xf32> to vector<1x512xf32>
    %209 = vector.broadcast %208 : vector<1x512xf32> to vector<16x512xf32>
    %210 = arith.addf %206, %209 : vector<16x512xf32>
    %cst_97 = arith.constant 0.000000e+00 : f32
    %211 = vector.broadcast %cst_97 : f32 to vector<16x512xf32>
    %212 = arith.maximumf %210, %211 : vector<16x512xf32>
    %213 = arith.truncf %212 : vector<16x512xf32> to vector<16x512xbf16>
    %c0_98 = arith.constant 0 : index
    %c1536_99 = arith.constant 1536 : index
    %c0_100 = arith.constant 0 : index
    %214 = vector.load %arg10[%c0_98, %c1536_99, %c0_100] : memref<2x2048x32xbf16, #tpu.memory_space<vmem>>, vector<1x512x32xbf16>
    %215 = vector.shape_cast %214 : vector<1x512x32xbf16> to vector<512x32xbf16>
    %cst_101 = arith.constant dense<0.000000e+00> : vector<16x32xf32>
    %216 = tpu.matmul %213, %215, %cst_101 {dimension_numbers = #tpu.dot_dimension_numbers<[1], [0], [0], [1], [0, 0, 1, 1], [], []>} : vector<16x512xbf16>, vector<512x32xbf16>, vector<16x32xf32> -> vector<16x32xf32>
    %217 = arith.addf %203, %216 : vector<16x32xf32>
    %c0_102 = arith.constant 0 : index
    %c0_103 = arith.constant 0 : index
    %c0_104 = arith.constant 0 : index
    %218 = vector.load %arg11[%c0_102, %c0_103, %c0_104] : memref<2x1x32xf32, #tpu.memory_space<vmem>>, vector<1x1x32xf32>
    %219 = vector.shape_cast %218 : vector<1x1x32xf32> to vector<1x32xf32>
    %220 = vector.broadcast %219 : vector<1x32xf32> to vector<16x32xf32>
    %221 = arith.addf %217, %220 : vector<16x32xf32>
    %222 = arith.addf %159, %221 : vector<16x32xf32>
    %c0_105 = arith.constant 0 : index
    %c0_106 = arith.constant 0 : index
    %c0_107 = arith.constant 0 : index
    %223 = vector.load %arg12[%c0_105, %c0_106, %c0_107] : memref<2x1x32xf32, #tpu.memory_space<vmem>>, vector<1x1x32xf32>
    %224 = vector.shape_cast %223 : vector<1x1x32xf32> to vector<1x32xf32>
    %c0_108 = arith.constant 0 : index
    %c0_109 = arith.constant 0 : index
    %c0_110 = arith.constant 0 : index
    %225 = vector.load %arg13[%c0_108, %c0_109, %c0_110] : memref<2x1x32xf32, #tpu.memory_space<vmem>>, vector<1x1x32xf32>
    %226 = vector.shape_cast %225 : vector<1x1x32xf32> to vector<1x32xf32>
    %cst_111 = arith.constant dense<0.000000e+00> : vector<16xf32>
    %227 = vector.multi_reduction <add>, %222, %cst_111 [1] : vector<16x32xf32> to vector<16xf32>
    %228 = vector.shape_cast %227 : vector<16xf32> to vector<16x1xf32>
    %cst_112 = arith.constant 3.200000e+01 : f32
    %229 = vector.broadcast %cst_112 : f32 to vector<16x1xf32>
    %230 = arith.divf %228, %229 : vector<16x1xf32>
    %231 = vector.broadcast %230 : vector<16x1xf32> to vector<16x32xf32>
    %232 = arith.subf %222, %231 : vector<16x32xf32>
    %233 = arith.mulf %232, %232 : vector<16x32xf32>
    %cst_113 = arith.constant dense<0.000000e+00> : vector<16xf32>
    %234 = vector.multi_reduction <add>, %233, %cst_113 [1] : vector<16x32xf32> to vector<16xf32>
    %235 = vector.shape_cast %234 : vector<16xf32> to vector<16x1xf32>
    %cst_114 = arith.constant 3.200000e+01 : f32
    %236 = vector.broadcast %cst_114 : f32 to vector<16x1xf32>
    %237 = arith.divf %235, %236 : vector<16x1xf32>
    %cst_115 = arith.constant 9.99999974E-6 : f32
    %238 = vector.broadcast %cst_115 : f32 to vector<16x1xf32>
    %239 = arith.addf %237, %238 : vector<16x1xf32>
    %240 = math.rsqrt %239 : vector<16x1xf32>
    %241 = vector.broadcast %240 : vector<16x1xf32> to vector<16x32xf32>
    %242 = arith.mulf %232, %241 : vector<16x32xf32>
    %243 = vector.broadcast %224 : vector<1x32xf32> to vector<16x32xf32>
    %244 = arith.mulf %242, %243 : vector<16x32xf32>
    %245 = vector.broadcast %226 : vector<1x32xf32> to vector<16x32xf32>
    %246 = arith.addf %244, %245 : vector<16x32xf32>
    %247 = arith.truncf %246 : vector<16x32xf32> to vector<16x32xbf16>
    %c1 = arith.constant 1 : index
    %c0_116 = arith.constant 0 : index
    %c0_117 = arith.constant 0 : index
    %248 = vector.load %arg2[%c1, %c0_116, %c0_117] : memref<2x32x96xbf16, #tpu.memory_space<vmem>>, vector<1x32x96xbf16>
    %249 = vector.shape_cast %248 : vector<1x32x96xbf16> to vector<32x96xbf16>
    %cst_118 = arith.constant dense<0.000000e+00> : vector<16x96xf32>
    %250 = tpu.matmul %247, %249, %cst_118 {dimension_numbers = #tpu.dot_dimension_numbers<[1], [0], [0], [1], [0, 0, 1, 1], [], []>} : vector<16x32xbf16>, vector<32x96xbf16>, vector<16x96xf32> -> vector<16x96xf32>
    %c1_119 = arith.constant 1 : index
    %c0_120 = arith.constant 0 : index
    %c0_121 = arith.constant 0 : index
    %251 = vector.load %arg3[%c1_119, %c0_120, %c0_121] : memref<2x1x96xf32, #tpu.memory_space<vmem>>, vector<1x1x96xf32>
    %252 = vector.shape_cast %251 : vector<1x1x96xf32> to vector<1x96xf32>
    %253 = vector.broadcast %252 : vector<1x96xf32> to vector<16x96xf32>
    %254 = arith.addf %250, %253 : vector<16x96xf32>
    %cst_122 = arith.constant 0.000000e+00 : f32
    %255 = vector.broadcast %cst_122 : f32 to vector<16x32xf32>
    %256 = vector.extract_strided_slice %254 {offsets = [0, 0], sizes = [16, 8], strides = [1, 1]} : vector<16x96xf32> to vector<16x8xf32>
    %257 = vector.shape_cast %256 : vector<16x8xf32> to vector<2x8x8xf32>
    %258 = vector.extract_strided_slice %254 {offsets = [0, 32], sizes = [16, 8], strides = [1, 1]} : vector<16x96xf32> to vector<16x8xf32>
    %259 = vector.shape_cast %258 : vector<16x8xf32> to vector<2x8x8xf32>
    %260 = vector.extract_strided_slice %254 {offsets = [0, 64], sizes = [16, 8], strides = [1, 1]} : vector<16x96xf32> to vector<16x8xf32>
    %261 = vector.shape_cast %260 : vector<16x8xf32> to vector<2x8x8xf32>
    %262 = arith.truncf %257 : vector<2x8x8xf32> to vector<2x8x8xbf16>
    %263 = arith.truncf %259 : vector<2x8x8xf32> to vector<2x8x8xbf16>
    "tpu.trace_start"() <{level = 10 : i32, message = "bqd,bkd->bqk"}> : () -> ()
    %cst_123 = arith.constant dense<0.000000e+00> : vector<2x8x8xf32>
    %264 = tpu.matmul %262, %263, %cst_123 {dimension_numbers = #tpu.dot_dimension_numbers<[2], [2], [1], [1], [0, 0, 0, 1, 1, 1], [0], [0]>} : vector<2x8x8xbf16>, vector<2x8x8xbf16>, vector<2x8x8xf32> -> vector<2x8x8xf32>
    "tpu.trace_stop"() : () -> ()
    %cst_124 = arith.constant 0.353553385 : f32
    %265 = vector.broadcast %cst_124 : f32 to vector<2x8x8xf32>
    %266 = arith.mulf %264, %265 : vector<2x8x8xf32>
    %cst_125 = arith.constant dense<0xFF800000> : vector<2x8xf32>
    %267 = vector.multi_reduction <maximumf>, %266, %cst_125 [2] : vector<2x8x8xf32> to vector<2x8xf32>
    %268 = vector.shape_cast %267 : vector<2x8xf32> to vector<2x8x1xf32>
    %269 = vector.broadcast %268 : vector<2x8x1xf32> to vector<2x8x8xf32>
    %270 = arith.subf %266, %269 : vector<2x8x8xf32>
    %271 = math.exp %270 : vector<2x8x8xf32>
    %cst_126 = arith.constant dense<0.000000e+00> : vector<2x8xf32>
    %272 = vector.multi_reduction <add>, %271, %cst_126 [2] : vector<2x8x8xf32> to vector<2x8xf32>
    %273 = vector.shape_cast %272 : vector<2x8xf32> to vector<2x8x1xf32>
    %274 = tpu.reciprocal %273 {approx = true} : vector<2x8x1xf32> -> vector<2x8x1xf32>
    %275 = vector.broadcast %274 : vector<2x8x1xf32> to vector<2x8x8xf32>
    %276 = arith.mulf %271, %275 : vector<2x8x8xf32>
    %277 = arith.truncf %276 : vector<2x8x8xf32> to vector<2x8x8xbf16>
    %278 = arith.truncf %261 : vector<2x8x8xf32> to vector<2x8x8xbf16>
    "tpu.trace_start"() <{level = 10 : i32, message = "bqk,bkd->bqd"}> : () -> ()
    %cst_127 = arith.constant dense<0.000000e+00> : vector<2x8x8xf32>
    %279 = tpu.matmul %277, %278, %cst_127 {dimension_numbers = #tpu.dot_dimension_numbers<[2], [1], [1], [2], [0, 0, 0, 1, 1, 2], [0], [0]>} : vector<2x8x8xbf16>, vector<2x8x8xbf16>, vector<2x8x8xf32> -> vector<2x8x8xf32>
    "tpu.trace_stop"() : () -> ()
    %280 = vector.shape_cast %279 : vector<2x8x8xf32> to vector<16x8xf32>
    %281 = arith.truncf %280 : vector<16x8xf32> to vector<16x8xbf16>
    %c1_128 = arith.constant 1 : index
    %c0_129 = arith.constant 0 : index
    %c0_130 = arith.constant 0 : index
    %282 = vector.load %arg4[%c1_128, %c0_129, %c0_130] : memref<2x32x32xbf16, #tpu.memory_space<vmem>>, vector<1x8x32xbf16>
    %283 = vector.shape_cast %282 : vector<1x8x32xbf16> to vector<8x32xbf16>
    %cst_131 = arith.constant dense<0.000000e+00> : vector<16x32xf32>
    %284 = tpu.matmul %281, %283, %cst_131 {dimension_numbers = #tpu.dot_dimension_numbers<[1], [0], [0], [1], [0, 0, 1, 1], [], []>} : vector<16x8xbf16>, vector<8x32xbf16>, vector<16x32xf32> -> vector<16x32xf32>
    %285 = arith.addf %255, %284 : vector<16x32xf32>
    %286 = vector.extract_strided_slice %254 {offsets = [0, 8], sizes = [16, 8], strides = [1, 1]} : vector<16x96xf32> to vector<16x8xf32>
    %287 = vector.shape_cast %286 : vector<16x8xf32> to vector<2x8x8xf32>
    %288 = vector.extract_strided_slice %254 {offsets = [0, 40], sizes = [16, 8], strides = [1, 1]} : vector<16x96xf32> to vector<16x8xf32>
    %289 = vector.shape_cast %288 : vector<16x8xf32> to vector<2x8x8xf32>
    %290 = vector.extract_strided_slice %254 {offsets = [0, 72], sizes = [16, 8], strides = [1, 1]} : vector<16x96xf32> to vector<16x8xf32>
    %291 = vector.shape_cast %290 : vector<16x8xf32> to vector<2x8x8xf32>
    %292 = arith.truncf %287 : vector<2x8x8xf32> to vector<2x8x8xbf16>
    %293 = arith.truncf %289 : vector<2x8x8xf32> to vector<2x8x8xbf16>
    "tpu.trace_start"() <{level = 10 : i32, message = "bqd,bkd->bqk"}> : () -> ()
    %cst_132 = arith.constant dense<0.000000e+00> : vector<2x8x8xf32>
    %294 = tpu.matmul %292, %293, %cst_132 {dimension_numbers = #tpu.dot_dimension_numbers<[2], [2], [1], [1], [0, 0, 0, 1, 1, 1], [0], [0]>} : vector<2x8x8xbf16>, vector<2x8x8xbf16>, vector<2x8x8xf32> -> vector<2x8x8xf32>
    "tpu.trace_stop"() : () -> ()
    %cst_133 = arith.constant 0.353553385 : f32
    %295 = vector.broadcast %cst_133 : f32 to vector<2x8x8xf32>
    %296 = arith.mulf %294, %295 : vector<2x8x8xf32>
    %cst_134 = arith.constant dense<0xFF800000> : vector<2x8xf32>
    %297 = vector.multi_reduction <maximumf>, %296, %cst_134 [2] : vector<2x8x8xf32> to vector<2x8xf32>
    %298 = vector.shape_cast %297 : vector<2x8xf32> to vector<2x8x1xf32>
    %299 = vector.broadcast %298 : vector<2x8x1xf32> to vector<2x8x8xf32>
    %300 = arith.subf %296, %299 : vector<2x8x8xf32>
    %301 = math.exp %300 : vector<2x8x8xf32>
    %cst_135 = arith.constant dense<0.000000e+00> : vector<2x8xf32>
    %302 = vector.multi_reduction <add>, %301, %cst_135 [2] : vector<2x8x8xf32> to vector<2x8xf32>
    %303 = vector.shape_cast %302 : vector<2x8xf32> to vector<2x8x1xf32>
    %304 = tpu.reciprocal %303 {approx = true} : vector<2x8x1xf32> -> vector<2x8x1xf32>
    %305 = vector.broadcast %304 : vector<2x8x1xf32> to vector<2x8x8xf32>
    %306 = arith.mulf %301, %305 : vector<2x8x8xf32>
    %307 = arith.truncf %306 : vector<2x8x8xf32> to vector<2x8x8xbf16>
    %308 = arith.truncf %291 : vector<2x8x8xf32> to vector<2x8x8xbf16>
    "tpu.trace_start"() <{level = 10 : i32, message = "bqk,bkd->bqd"}> : () -> ()
    %cst_136 = arith.constant dense<0.000000e+00> : vector<2x8x8xf32>
    %309 = tpu.matmul %307, %308, %cst_136 {dimension_numbers = #tpu.dot_dimension_numbers<[2], [1], [1], [2], [0, 0, 0, 1, 1, 2], [0], [0]>} : vector<2x8x8xbf16>, vector<2x8x8xbf16>, vector<2x8x8xf32> -> vector<2x8x8xf32>
    "tpu.trace_stop"() : () -> ()
    %310 = vector.shape_cast %309 : vector<2x8x8xf32> to vector<16x8xf32>
    %311 = arith.truncf %310 : vector<16x8xf32> to vector<16x8xbf16>
    %c1_137 = arith.constant 1 : index
    %c8_138 = arith.constant 8 : index
    %c0_139 = arith.constant 0 : index
    %312 = vector.load %arg4[%c1_137, %c8_138, %c0_139] : memref<2x32x32xbf16, #tpu.memory_space<vmem>>, vector<1x8x32xbf16>
    %313 = vector.shape_cast %312 : vector<1x8x32xbf16> to vector<8x32xbf16>
    %cst_140 = arith.constant dense<0.000000e+00> : vector<16x32xf32>
    %314 = tpu.matmul %311, %313, %cst_140 {dimension_numbers = #tpu.dot_dimension_numbers<[1], [0], [0], [1], [0, 0, 1, 1], [], []>} : vector<16x8xbf16>, vector<8x32xbf16>, vector<16x32xf32> -> vector<16x32xf32>
    %315 = arith.addf %285, %314 : vector<16x32xf32>
    %316 = vector.extract_strided_slice %254 {offsets = [0, 16], sizes = [16, 8], strides = [1, 1]} : vector<16x96xf32> to vector<16x8xf32>
    %317 = vector.shape_cast %316 : vector<16x8xf32> to vector<2x8x8xf32>
    %318 = vector.extract_strided_slice %254 {offsets = [0, 48], sizes = [16, 8], strides = [1, 1]} : vector<16x96xf32> to vector<16x8xf32>
    %319 = vector.shape_cast %318 : vector<16x8xf32> to vector<2x8x8xf32>
    %320 = vector.extract_strided_slice %254 {offsets = [0, 80], sizes = [16, 8], strides = [1, 1]} : vector<16x96xf32> to vector<16x8xf32>
    %321 = vector.shape_cast %320 : vector<16x8xf32> to vector<2x8x8xf32>
    %322 = arith.truncf %317 : vector<2x8x8xf32> to vector<2x8x8xbf16>
    %323 = arith.truncf %319 : vector<2x8x8xf32> to vector<2x8x8xbf16>
    "tpu.trace_start"() <{level = 10 : i32, message = "bqd,bkd->bqk"}> : () -> ()
    %cst_141 = arith.constant dense<0.000000e+00> : vector<2x8x8xf32>
    %324 = tpu.matmul %322, %323, %cst_141 {dimension_numbers = #tpu.dot_dimension_numbers<[2], [2], [1], [1], [0, 0, 0, 1, 1, 1], [0], [0]>} : vector<2x8x8xbf16>, vector<2x8x8xbf16>, vector<2x8x8xf32> -> vector<2x8x8xf32>
    "tpu.trace_stop"() : () -> ()
    %cst_142 = arith.constant 0.353553385 : f32
    %325 = vector.broadcast %cst_142 : f32 to vector<2x8x8xf32>
    %326 = arith.mulf %324, %325 : vector<2x8x8xf32>
    %cst_143 = arith.constant dense<0xFF800000> : vector<2x8xf32>
    %327 = vector.multi_reduction <maximumf>, %326, %cst_143 [2] : vector<2x8x8xf32> to vector<2x8xf32>
    %328 = vector.shape_cast %327 : vector<2x8xf32> to vector<2x8x1xf32>
    %329 = vector.broadcast %328 : vector<2x8x1xf32> to vector<2x8x8xf32>
    %330 = arith.subf %326, %329 : vector<2x8x8xf32>
    %331 = math.exp %330 : vector<2x8x8xf32>
    %cst_144 = arith.constant dense<0.000000e+00> : vector<2x8xf32>
    %332 = vector.multi_reduction <add>, %331, %cst_144 [2] : vector<2x8x8xf32> to vector<2x8xf32>
    %333 = vector.shape_cast %332 : vector<2x8xf32> to vector<2x8x1xf32>
    %334 = tpu.reciprocal %333 {approx = true} : vector<2x8x1xf32> -> vector<2x8x1xf32>
    %335 = vector.broadcast %334 : vector<2x8x1xf32> to vector<2x8x8xf32>
    %336 = arith.mulf %331, %335 : vector<2x8x8xf32>
    %337 = arith.truncf %336 : vector<2x8x8xf32> to vector<2x8x8xbf16>
    %338 = arith.truncf %321 : vector<2x8x8xf32> to vector<2x8x8xbf16>
    "tpu.trace_start"() <{level = 10 : i32, message = "bqk,bkd->bqd"}> : () -> ()
    %cst_145 = arith.constant dense<0.000000e+00> : vector<2x8x8xf32>
    %339 = tpu.matmul %337, %338, %cst_145 {dimension_numbers = #tpu.dot_dimension_numbers<[2], [1], [1], [2], [0, 0, 0, 1, 1, 2], [0], [0]>} : vector<2x8x8xbf16>, vector<2x8x8xbf16>, vector<2x8x8xf32> -> vector<2x8x8xf32>
    "tpu.trace_stop"() : () -> ()
    %340 = vector.shape_cast %339 : vector<2x8x8xf32> to vector<16x8xf32>
    %341 = arith.truncf %340 : vector<16x8xf32> to vector<16x8xbf16>
    %c1_146 = arith.constant 1 : index
    %c16_147 = arith.constant 16 : index
    %c0_148 = arith.constant 0 : index
    %342 = vector.load %arg4[%c1_146, %c16_147, %c0_148] : memref<2x32x32xbf16, #tpu.memory_space<vmem>>, vector<1x8x32xbf16>
    %343 = vector.shape_cast %342 : vector<1x8x32xbf16> to vector<8x32xbf16>
    %cst_149 = arith.constant dense<0.000000e+00> : vector<16x32xf32>
    %344 = tpu.matmul %341, %343, %cst_149 {dimension_numbers = #tpu.dot_dimension_numbers<[1], [0], [0], [1], [0, 0, 1, 1], [], []>} : vector<16x8xbf16>, vector<8x32xbf16>, vector<16x32xf32> -> vector<16x32xf32>
    %345 = arith.addf %315, %344 : vector<16x32xf32>
    %346 = vector.extract_strided_slice %254 {offsets = [0, 24], sizes = [16, 8], strides = [1, 1]} : vector<16x96xf32> to vector<16x8xf32>
    %347 = vector.shape_cast %346 : vector<16x8xf32> to vector<2x8x8xf32>
    %348 = vector.extract_strided_slice %254 {offsets = [0, 56], sizes = [16, 8], strides = [1, 1]} : vector<16x96xf32> to vector<16x8xf32>
    %349 = vector.shape_cast %348 : vector<16x8xf32> to vector<2x8x8xf32>
    %350 = vector.extract_strided_slice %254 {offsets = [0, 88], sizes = [16, 8], strides = [1, 1]} : vector<16x96xf32> to vector<16x8xf32>
    %351 = vector.shape_cast %350 : vector<16x8xf32> to vector<2x8x8xf32>
    %352 = arith.truncf %347 : vector<2x8x8xf32> to vector<2x8x8xbf16>
    %353 = arith.truncf %349 : vector<2x8x8xf32> to vector<2x8x8xbf16>
    "tpu.trace_start"() <{level = 10 : i32, message = "bqd,bkd->bqk"}> : () -> ()
    %cst_150 = arith.constant dense<0.000000e+00> : vector<2x8x8xf32>
    %354 = tpu.matmul %352, %353, %cst_150 {dimension_numbers = #tpu.dot_dimension_numbers<[2], [2], [1], [1], [0, 0, 0, 1, 1, 1], [0], [0]>} : vector<2x8x8xbf16>, vector<2x8x8xbf16>, vector<2x8x8xf32> -> vector<2x8x8xf32>
    "tpu.trace_stop"() : () -> ()
    %cst_151 = arith.constant 0.353553385 : f32
    %355 = vector.broadcast %cst_151 : f32 to vector<2x8x8xf32>
    %356 = arith.mulf %354, %355 : vector<2x8x8xf32>
    %cst_152 = arith.constant dense<0xFF800000> : vector<2x8xf32>
    %357 = vector.multi_reduction <maximumf>, %356, %cst_152 [2] : vector<2x8x8xf32> to vector<2x8xf32>
    %358 = vector.shape_cast %357 : vector<2x8xf32> to vector<2x8x1xf32>
    %359 = vector.broadcast %358 : vector<2x8x1xf32> to vector<2x8x8xf32>
    %360 = arith.subf %356, %359 : vector<2x8x8xf32>
    %361 = math.exp %360 : vector<2x8x8xf32>
    %cst_153 = arith.constant dense<0.000000e+00> : vector<2x8xf32>
    %362 = vector.multi_reduction <add>, %361, %cst_153 [2] : vector<2x8x8xf32> to vector<2x8xf32>
    %363 = vector.shape_cast %362 : vector<2x8xf32> to vector<2x8x1xf32>
    %364 = tpu.reciprocal %363 {approx = true} : vector<2x8x1xf32> -> vector<2x8x1xf32>
    %365 = vector.broadcast %364 : vector<2x8x1xf32> to vector<2x8x8xf32>
    %366 = arith.mulf %361, %365 : vector<2x8x8xf32>
    %367 = arith.truncf %366 : vector<2x8x8xf32> to vector<2x8x8xbf16>
    %368 = arith.truncf %351 : vector<2x8x8xf32> to vector<2x8x8xbf16>
    "tpu.trace_start"() <{level = 10 : i32, message = "bqk,bkd->bqd"}> : () -> ()
    %cst_154 = arith.constant dense<0.000000e+00> : vector<2x8x8xf32>
    %369 = tpu.matmul %367, %368, %cst_154 {dimension_numbers = #tpu.dot_dimension_numbers<[2], [1], [1], [2], [0, 0, 0, 1, 1, 2], [0], [0]>} : vector<2x8x8xbf16>, vector<2x8x8xbf16>, vector<2x8x8xf32> -> vector<2x8x8xf32>
    "tpu.trace_stop"() : () -> ()
    %370 = vector.shape_cast %369 : vector<2x8x8xf32> to vector<16x8xf32>
    %371 = arith.truncf %370 : vector<16x8xf32> to vector<16x8xbf16>
    %c1_155 = arith.constant 1 : index
    %c24_156 = arith.constant 24 : index
    %c0_157 = arith.constant 0 : index
    %372 = vector.load %arg4[%c1_155, %c24_156, %c0_157] : memref<2x32x32xbf16, #tpu.memory_space<vmem>>, vector<1x8x32xbf16>
    %373 = vector.shape_cast %372 : vector<1x8x32xbf16> to vector<8x32xbf16>
    %cst_158 = arith.constant dense<0.000000e+00> : vector<16x32xf32>
    %374 = tpu.matmul %371, %373, %cst_158 {dimension_numbers = #tpu.dot_dimension_numbers<[1], [0], [0], [1], [0, 0, 1, 1], [], []>} : vector<16x8xbf16>, vector<8x32xbf16>, vector<16x32xf32> -> vector<16x32xf32>
    %375 = arith.addf %345, %374 : vector<16x32xf32>
    %c1_159 = arith.constant 1 : index
    %c0_160 = arith.constant 0 : index
    %c0_161 = arith.constant 0 : index
    %376 = vector.load %arg5[%c1_159, %c0_160, %c0_161] : memref<2x1x32xf32, #tpu.memory_space<vmem>>, vector<1x1x32xf32>
    %377 = vector.shape_cast %376 : vector<1x1x32xf32> to vector<1x32xf32>
    %378 = vector.broadcast %377 : vector<1x32xf32> to vector<16x32xf32>
    %379 = arith.addf %375, %378 : vector<16x32xf32>
    %380 = arith.addf %246, %379 : vector<16x32xf32>
    %c1_162 = arith.constant 1 : index
    %c0_163 = arith.constant 0 : index
    %c0_164 = arith.constant 0 : index
    %381 = vector.load %arg6[%c1_162, %c0_163, %c0_164] : memref<2x1x32xf32, #tpu.memory_space<vmem>>, vector<1x1x32xf32>
    %382 = vector.shape_cast %381 : vector<1x1x32xf32> to vector<1x32xf32>
    %c1_165 = arith.constant 1 : index
    %c0_166 = arith.constant 0 : index
    %c0_167 = arith.constant 0 : index
    %383 = vector.load %arg7[%c1_165, %c0_166, %c0_167] : memref<2x1x32xf32, #tpu.memory_space<vmem>>, vector<1x1x32xf32>
    %384 = vector.shape_cast %383 : vector<1x1x32xf32> to vector<1x32xf32>
    %cst_168 = arith.constant dense<0.000000e+00> : vector<16xf32>
    %385 = vector.multi_reduction <add>, %380, %cst_168 [1] : vector<16x32xf32> to vector<16xf32>
    %386 = vector.shape_cast %385 : vector<16xf32> to vector<16x1xf32>
    %cst_169 = arith.constant 3.200000e+01 : f32
    %387 = vector.broadcast %cst_169 : f32 to vector<16x1xf32>
    %388 = arith.divf %386, %387 : vector<16x1xf32>
    %389 = vector.broadcast %388 : vector<16x1xf32> to vector<16x32xf32>
    %390 = arith.subf %380, %389 : vector<16x32xf32>
    %391 = arith.mulf %390, %390 : vector<16x32xf32>
    %cst_170 = arith.constant dense<0.000000e+00> : vector<16xf32>
    %392 = vector.multi_reduction <add>, %391, %cst_170 [1] : vector<16x32xf32> to vector<16xf32>
    %393 = vector.shape_cast %392 : vector<16xf32> to vector<16x1xf32>
    %cst_171 = arith.constant 3.200000e+01 : f32
    %394 = vector.broadcast %cst_171 : f32 to vector<16x1xf32>
    %395 = arith.divf %393, %394 : vector<16x1xf32>
    %cst_172 = arith.constant 9.99999974E-6 : f32
    %396 = vector.broadcast %cst_172 : f32 to vector<16x1xf32>
    %397 = arith.addf %395, %396 : vector<16x1xf32>
    %398 = math.rsqrt %397 : vector<16x1xf32>
    %399 = vector.broadcast %398 : vector<16x1xf32> to vector<16x32xf32>
    %400 = arith.mulf %390, %399 : vector<16x32xf32>
    %401 = vector.broadcast %382 : vector<1x32xf32> to vector<16x32xf32>
    %402 = arith.mulf %400, %401 : vector<16x32xf32>
    %403 = vector.broadcast %384 : vector<1x32xf32> to vector<16x32xf32>
    %404 = arith.addf %402, %403 : vector<16x32xf32>
    %405 = arith.truncf %404 : vector<16x32xf32> to vector<16x32xbf16>
    %cst_173 = arith.constant 0.000000e+00 : f32
    %406 = vector.broadcast %cst_173 : f32 to vector<16x32xf32>
    %c1_174 = arith.constant 1 : index
    %c0_175 = arith.constant 0 : index
    %c0_176 = arith.constant 0 : index
    %407 = vector.load %arg8[%c1_174, %c0_175, %c0_176] : memref<2x32x2048xbf16, #tpu.memory_space<vmem>>, vector<1x32x512xbf16>
    %408 = vector.shape_cast %407 : vector<1x32x512xbf16> to vector<32x512xbf16>
    %cst_177 = arith.constant dense<0.000000e+00> : vector<16x512xf32>
    %409 = tpu.matmul %405, %408, %cst_177 {dimension_numbers = #tpu.dot_dimension_numbers<[1], [0], [0], [1], [0, 0, 1, 1], [], []>} : vector<16x32xbf16>, vector<32x512xbf16>, vector<16x512xf32> -> vector<16x512xf32>
    %c1_178 = arith.constant 1 : index
    %c0_179 = arith.constant 0 : index
    %c0_180 = arith.constant 0 : index
    %410 = vector.load %arg9[%c1_178, %c0_179, %c0_180] : memref<2x1x2048xf32, #tpu.memory_space<vmem>>, vector<1x1x512xf32>
    %411 = vector.shape_cast %410 : vector<1x1x512xf32> to vector<1x512xf32>
    %412 = vector.broadcast %411 : vector<1x512xf32> to vector<16x512xf32>
    %413 = arith.addf %409, %412 : vector<16x512xf32>
    %cst_181 = arith.constant 0.000000e+00 : f32
    %414 = vector.broadcast %cst_181 : f32 to vector<16x512xf32>
    %415 = arith.maximumf %413, %414 : vector<16x512xf32>
    %416 = arith.truncf %415 : vector<16x512xf32> to vector<16x512xbf16>
    %c1_182 = arith.constant 1 : index
    %c0_183 = arith.constant 0 : index
    %c0_184 = arith.constant 0 : index
    %417 = vector.load %arg10[%c1_182, %c0_183, %c0_184] : memref<2x2048x32xbf16, #tpu.memory_space<vmem>>, vector<1x512x32xbf16>
    %418 = vector.shape_cast %417 : vector<1x512x32xbf16> to vector<512x32xbf16>
    %cst_185 = arith.constant dense<0.000000e+00> : vector<16x32xf32>
    %419 = tpu.matmul %416, %418, %cst_185 {dimension_numbers = #tpu.dot_dimension_numbers<[1], [0], [0], [1], [0, 0, 1, 1], [], []>} : vector<16x512xbf16>, vector<512x32xbf16>, vector<16x32xf32> -> vector<16x32xf32>
    %420 = arith.addf %406, %419 : vector<16x32xf32>
    %c1_186 = arith.constant 1 : index
    %c0_187 = arith.constant 0 : index
    %c512_188 = arith.constant 512 : index
    %421 = vector.load %arg8[%c1_186, %c0_187, %c512_188] : memref<2x32x2048xbf16, #tpu.memory_space<vmem>>, vector<1x32x512xbf16>
    %422 = vector.shape_cast %421 : vector<1x32x512xbf16> to vector<32x512xbf16>
    %cst_189 = arith.constant dense<0.000000e+00> : vector<16x512xf32>
    %423 = tpu.matmul %405, %422, %cst_189 {dimension_numbers = #tpu.dot_dimension_numbers<[1], [0], [0], [1], [0, 0, 1, 1], [], []>} : vector<16x32xbf16>, vector<32x512xbf16>, vector<16x512xf32> -> vector<16x512xf32>
    %c1_190 = arith.constant 1 : index
    %c0_191 = arith.constant 0 : index
    %c512_192 = arith.constant 512 : index
    %424 = vector.load %arg9[%c1_190, %c0_191, %c512_192] : memref<2x1x2048xf32, #tpu.memory_space<vmem>>, vector<1x1x512xf32>
    %425 = vector.shape_cast %424 : vector<1x1x512xf32> to vector<1x512xf32>
    %426 = vector.broadcast %425 : vector<1x512xf32> to vector<16x512xf32>
    %427 = arith.addf %423, %426 : vector<16x512xf32>
    %cst_193 = arith.constant 0.000000e+00 : f32
    %428 = vector.broadcast %cst_193 : f32 to vector<16x512xf32>
    %429 = arith.maximumf %427, %428 : vector<16x512xf32>
    %430 = arith.truncf %429 : vector<16x512xf32> to vector<16x512xbf16>
    %c1_194 = arith.constant 1 : index
    %c512_195 = arith.constant 512 : index
    %c0_196 = arith.constant 0 : index
    %431 = vector.load %arg10[%c1_194, %c512_195, %c0_196] : memref<2x2048x32xbf16, #tpu.memory_space<vmem>>, vector<1x512x32xbf16>
    %432 = vector.shape_cast %431 : vector<1x512x32xbf16> to vector<512x32xbf16>
    %cst_197 = arith.constant dense<0.000000e+00> : vector<16x32xf32>
    %433 = tpu.matmul %430, %432, %cst_197 {dimension_numbers = #tpu.dot_dimension_numbers<[1], [0], [0], [1], [0, 0, 1, 1], [], []>} : vector<16x512xbf16>, vector<512x32xbf16>, vector<16x32xf32> -> vector<16x32xf32>
    %434 = arith.addf %420, %433 : vector<16x32xf32>
    %c1_198 = arith.constant 1 : index
    %c0_199 = arith.constant 0 : index
    %c1024_200 = arith.constant 1024 : index
    %435 = vector.load %arg8[%c1_198, %c0_199, %c1024_200] : memref<2x32x2048xbf16, #tpu.memory_space<vmem>>, vector<1x32x512xbf16>
    %436 = vector.shape_cast %435 : vector<1x32x512xbf16> to vector<32x512xbf16>
    %cst_201 = arith.constant dense<0.000000e+00> : vector<16x512xf32>
    %437 = tpu.matmul %405, %436, %cst_201 {dimension_numbers = #tpu.dot_dimension_numbers<[1], [0], [0], [1], [0, 0, 1, 1], [], []>} : vector<16x32xbf16>, vector<32x512xbf16>, vector<16x512xf32> -> vector<16x512xf32>
    %c1_202 = arith.constant 1 : index
    %c0_203 = arith.constant 0 : index
    %c1024_204 = arith.constant 1024 : index
    %438 = vector.load %arg9[%c1_202, %c0_203, %c1024_204] : memref<2x1x2048xf32, #tpu.memory_space<vmem>>, vector<1x1x512xf32>
    %439 = vector.shape_cast %438 : vector<1x1x512xf32> to vector<1x512xf32>
    %440 = vector.broadcast %439 : vector<1x512xf32> to vector<16x512xf32>
    %441 = arith.addf %437, %440 : vector<16x512xf32>
    %cst_205 = arith.constant 0.000000e+00 : f32
    %442 = vector.broadcast %cst_205 : f32 to vector<16x512xf32>
    %443 = arith.maximumf %441, %442 : vector<16x512xf32>
    %444 = arith.truncf %443 : vector<16x512xf32> to vector<16x512xbf16>
    %c1_206 = arith.constant 1 : index
    %c1024_207 = arith.constant 1024 : index
    %c0_208 = arith.constant 0 : index
    %445 = vector.load %arg10[%c1_206, %c1024_207, %c0_208] : memref<2x2048x32xbf16, #tpu.memory_space<vmem>>, vector<1x512x32xbf16>
    %446 = vector.shape_cast %445 : vector<1x512x32xbf16> to vector<512x32xbf16>
    %cst_209 = arith.constant dense<0.000000e+00> : vector<16x32xf32>
    %447 = tpu.matmul %444, %446, %cst_209 {dimension_numbers = #tpu.dot_dimension_numbers<[1], [0], [0], [1], [0, 0, 1, 1], [], []>} : vector<16x512xbf16>, vector<512x32xbf16>, vector<16x32xf32> -> vector<16x32xf32>
    %448 = arith.addf %434, %447 : vector<16x32xf32>
    %c1_210 = arith.constant 1 : index
    %c0_211 = arith.constant 0 : index
    %c1536_212 = arith.constant 1536 : index
    %449 = vector.load %arg8[%c1_210, %c0_211, %c1536_212] : memref<2x32x2048xbf16, #tpu.memory_space<vmem>>, vector<1x32x512xbf16>
    %450 = vector.shape_cast %449 : vector<1x32x512xbf16> to vector<32x512xbf16>
    %cst_213 = arith.constant dense<0.000000e+00> : vector<16x512xf32>
    %451 = tpu.matmul %405, %450, %cst_213 {dimension_numbers = #tpu.dot_dimension_numbers<[1], [0], [0], [1], [0, 0, 1, 1], [], []>} : vector<16x32xbf16>, vector<32x512xbf16>, vector<16x512xf32> -> vector<16x512xf32>
    %c1_214 = arith.constant 1 : index
    %c0_215 = arith.constant 0 : index
    %c1536_216 = arith.constant 1536 : index
    %452 = vector.load %arg9[%c1_214, %c0_215, %c1536_216] : memref<2x1x2048xf32, #tpu.memory_space<vmem>>, vector<1x1x512xf32>
    %453 = vector.shape_cast %452 : vector<1x1x512xf32> to vector<1x512xf32>
    %454 = vector.broadcast %453 : vector<1x512xf32> to vector<16x512xf32>
    %455 = arith.addf %451, %454 : vector<16x512xf32>
    %cst_217 = arith.constant 0.000000e+00 : f32
    %456 = vector.broadcast %cst_217 : f32 to vector<16x512xf32>
    %457 = arith.maximumf %455, %456 : vector<16x512xf32>
    %458 = arith.truncf %457 : vector<16x512xf32> to vector<16x512xbf16>
    %c1_218 = arith.constant 1 : index
    %c1536_219 = arith.constant 1536 : index
    %c0_220 = arith.constant 0 : index
    %459 = vector.load %arg10[%c1_218, %c1536_219, %c0_220] : memref<2x2048x32xbf16, #tpu.memory_space<vmem>>, vector<1x512x32xbf16>
    %460 = vector.shape_cast %459 : vector<1x512x32xbf16> to vector<512x32xbf16>
    %cst_221 = arith.constant dense<0.000000e+00> : vector<16x32xf32>
    %461 = tpu.matmul %458, %460, %cst_221 {dimension_numbers = #tpu.dot_dimension_numbers<[1], [0], [0], [1], [0, 0, 1, 1], [], []>} : vector<16x512xbf16>, vector<512x32xbf16>, vector<16x32xf32> -> vector<16x32xf32>
    %462 = arith.addf %448, %461 : vector<16x32xf32>
    %c1_222 = arith.constant 1 : index
    %c0_223 = arith.constant 0 : index
    %c0_224 = arith.constant 0 : index
    %463 = vector.load %arg11[%c1_222, %c0_223, %c0_224] : memref<2x1x32xf32, #tpu.memory_space<vmem>>, vector<1x1x32xf32>
    %464 = vector.shape_cast %463 : vector<1x1x32xf32> to vector<1x32xf32>
    %465 = vector.broadcast %464 : vector<1x32xf32> to vector<16x32xf32>
    %466 = arith.addf %462, %465 : vector<16x32xf32>
    %467 = arith.addf %404, %466 : vector<16x32xf32>
    %c1_225 = arith.constant 1 : index
    %c0_226 = arith.constant 0 : index
    %c0_227 = arith.constant 0 : index
    %468 = vector.load %arg12[%c1_225, %c0_226, %c0_227] : memref<2x1x32xf32, #tpu.memory_space<vmem>>, vector<1x1x32xf32>
    %469 = vector.shape_cast %468 : vector<1x1x32xf32> to vector<1x32xf32>
    %c1_228 = arith.constant 1 : index
    %c0_229 = arith.constant 0 : index
    %c0_230 = arith.constant 0 : index
    %470 = vector.load %arg13[%c1_228, %c0_229, %c0_230] : memref<2x1x32xf32, #tpu.memory_space<vmem>>, vector<1x1x32xf32>
    %471 = vector.shape_cast %470 : vector<1x1x32xf32> to vector<1x32xf32>
    %cst_231 = arith.constant dense<0.000000e+00> : vector<16xf32>
    %472 = vector.multi_reduction <add>, %467, %cst_231 [1] : vector<16x32xf32> to vector<16xf32>
    %473 = vector.shape_cast %472 : vector<16xf32> to vector<16x1xf32>
    %cst_232 = arith.constant 3.200000e+01 : f32
    %474 = vector.broadcast %cst_232 : f32 to vector<16x1xf32>
    %475 = arith.divf %473, %474 : vector<16x1xf32>
    %476 = vector.broadcast %475 : vector<16x1xf32> to vector<16x32xf32>
    %477 = arith.subf %467, %476 : vector<16x32xf32>
    %478 = arith.mulf %477, %477 : vector<16x32xf32>
    %cst_233 = arith.constant dense<0.000000e+00> : vector<16xf32>
    %479 = vector.multi_reduction <add>, %478, %cst_233 [1] : vector<16x32xf32> to vector<16xf32>
    %480 = vector.shape_cast %479 : vector<16xf32> to vector<16x1xf32>
    %cst_234 = arith.constant 3.200000e+01 : f32
    %481 = vector.broadcast %cst_234 : f32 to vector<16x1xf32>
    %482 = arith.divf %480, %481 : vector<16x1xf32>
    %cst_235 = arith.constant 9.99999974E-6 : f32
    %483 = vector.broadcast %cst_235 : f32 to vector<16x1xf32>
    %484 = arith.addf %482, %483 : vector<16x1xf32>
    %485 = math.rsqrt %484 : vector<16x1xf32>
    %486 = vector.broadcast %485 : vector<16x1xf32> to vector<16x32xf32>
    %487 = arith.mulf %477, %486 : vector<16x32xf32>
    %488 = vector.broadcast %469 : vector<1x32xf32> to vector<16x32xf32>
    %489 = arith.mulf %487, %488 : vector<16x32xf32>
    %490 = vector.broadcast %471 : vector<1x32xf32> to vector<16x32xf32>
    %491 = arith.addf %489, %490 : vector<16x32xf32>
    %492 = vector.shape_cast %491 : vector<16x32xf32> to vector<2x8x32xf32>
    %cst_236 = arith.constant dense<0.000000e+00> : vector<2x32xf32>
    %493 = vector.multi_reduction <add>, %492, %cst_236 [1] : vector<2x8x32xf32> to vector<2x32xf32>
    %cst_237 = arith.constant 8.000000e+00 : f32
    %494 = vector.broadcast %cst_237 : f32 to vector<2x32xf32>
    %495 = arith.divf %493, %494 : vector<2x32xf32>
    %c0_238 = arith.constant 0 : index
    %c0_239 = arith.constant 0 : index
    %496 = vector.load %arg1[%c0_238, %c0_239] : memref<2x16xf32, #tpu.memory_space<vmem>>, vector<2x16xf32>
    %c0_240 = arith.constant 0 : index
    %c0_241 = arith.constant 0 : index
    %497 = vector.load %arg14[%c0_240, %c0_241] : memref<16x64xf32, #tpu.memory_space<vmem>>, vector<16x64xf32>
    %cst_242 = arith.constant dense<0.000000e+00> : vector<2x64xf32>
    %498 = tpu.matmul %496, %497, %cst_242 {dimension_numbers = #tpu.dot_dimension_numbers<[1], [0], [0], [1], [0, 0, 1, 1], [], []>} : vector<2x16xf32>, vector<16x64xf32>, vector<2x64xf32> -> vector<2x64xf32>
    %c0_243 = arith.constant 0 : index
    %c0_244 = arith.constant 0 : index
    %499 = vector.load %arg15[%c0_243, %c0_244] : memref<1x64xf32, #tpu.memory_space<vmem>>, vector<1x64xf32>
    %500 = vector.broadcast %499 : vector<1x64xf32> to vector<2x64xf32>
    %501 = arith.addf %498, %500 : vector<2x64xf32>
    %cst_245 = arith.constant 0.000000e+00 : f32
    %502 = vector.broadcast %cst_245 : f32 to vector<2x32xf32>
    %503 = arith.maximumf %495, %502 : vector<2x32xf32>
    %cst_246 = arith.constant 0.000000e+00 : f32
    %504 = vector.broadcast %cst_246 : f32 to vector<2x64xf32>
    %505 = arith.maximumf %501, %504 : vector<2x64xf32>
    %c0_247 = arith.constant 0 : index
    %c0_248 = arith.constant 0 : index
    %506 = vector.load %arg16[%c0_247, %c0_248] : memref<96x64xf32, #tpu.memory_space<vmem>>, vector<32x64xf32>
    %cst_249 = arith.constant dense<0.000000e+00> : vector<2x64xf32>
    %507 = tpu.matmul %503, %506, %cst_249 {dimension_numbers = #tpu.dot_dimension_numbers<[1], [0], [0], [1], [0, 0, 1, 1], [], []>} : vector<2x32xf32>, vector<32x64xf32>, vector<2x64xf32> -> vector<2x64xf32>
    %c32 = arith.constant 32 : index
    %c0_250 = arith.constant 0 : index
    %508 = vector.load %arg16[%c32, %c0_250] : memref<96x64xf32, #tpu.memory_space<vmem>>, vector<64x64xf32>
    %cst_251 = arith.constant dense<0.000000e+00> : vector<2x64xf32>
    %509 = tpu.matmul %505, %508, %cst_251 {dimension_numbers = #tpu.dot_dimension_numbers<[1], [0], [0], [1], [0, 0, 1, 1], [], []>} : vector<2x64xf32>, vector<64x64xf32>, vector<2x64xf32> -> vector<2x64xf32>
    %510 = arith.addf %507, %509 : vector<2x64xf32>
    %c0_252 = arith.constant 0 : index
    %c0_253 = arith.constant 0 : index
    %511 = vector.load %arg17[%c0_252, %c0_253] : memref<1x64xf32, #tpu.memory_space<vmem>>, vector<1x64xf32>
    %512 = vector.broadcast %511 : vector<1x64xf32> to vector<2x64xf32>
    %513 = arith.addf %510, %512 : vector<2x64xf32>
    %cst_254 = arith.constant 0.000000e+00 : f32
    %514 = vector.broadcast %cst_254 : f32 to vector<2x64xf32>
    %515 = arith.maximumf %513, %514 : vector<2x64xf32>
    %c0_255 = arith.constant 0 : index
    %c0_256 = arith.constant 0 : index
    %516 = vector.load %arg18[%c0_255, %c0_256] : memref<64x64xf32, #tpu.memory_space<vmem>>, vector<64x64xf32>
    %cst_257 = arith.constant dense<0.000000e+00> : vector<2x64xf32>
    %517 = tpu.matmul %515, %516, %cst_257 {dimension_numbers = #tpu.dot_dimension_numbers<[1], [0], [0], [1], [0, 0, 1, 1], [], []>} : vector<2x64xf32>, vector<64x64xf32>, vector<2x64xf32> -> vector<2x64xf32>
    %c0_258 = arith.constant 0 : index
    %c0_259 = arith.constant 0 : index
    %518 = vector.load %arg19[%c0_258, %c0_259] : memref<1x64xf32, #tpu.memory_space<vmem>>, vector<1x64xf32>
    %519 = vector.broadcast %518 : vector<1x64xf32> to vector<2x64xf32>
    %520 = arith.addf %517, %519 : vector<2x64xf32>
    %cst_260 = arith.constant 0.000000e+00 : f32
    %521 = vector.broadcast %cst_260 : f32 to vector<2x64xf32>
    %522 = arith.maximumf %520, %521 : vector<2x64xf32>
    %c0_261 = arith.constant 0 : index
    %c0_262 = arith.constant 0 : index
    %523 = vector.load %arg20[%c0_261, %c0_262] : memref<64x1xf32, #tpu.memory_space<vmem>>, vector<64x1xf32>
    %cst_263 = arith.constant dense<0.000000e+00> : vector<2x1xf32>
    %524 = tpu.matmul %522, %523, %cst_263 {dimension_numbers = #tpu.dot_dimension_numbers<[1], [0], [0], [1], [0, 0, 1, 1], [], []>} : vector<2x64xf32>, vector<64x1xf32>, vector<2x1xf32> -> vector<2x1xf32>
    %c0_264 = arith.constant 0 : index
    %c0_265 = arith.constant 0 : index
    %525 = vector.load %arg21[%c0_264, %c0_265] : memref<1x1xf32, #tpu.memory_space<vmem>>, vector<1x1xf32>
    %526 = vector.broadcast %525 : vector<1x1xf32> to vector<2x1xf32>
    %527 = arith.addf %524, %526 : vector<2x1xf32>
    %c0_266 = arith.constant 0 : index
    %c0_267 = arith.constant 0 : index
    %528 = vector.load %arg22[%c0_266, %c0_267] : memref<2x1xf32, #tpu.memory_space<vmem>>, vector<2x1xf32>
    tpu.vector_store %arg22[%c0_266, %c0_267], %527 {strides = array<i32>} : memref<2x1xf32, #tpu.memory_space<vmem>>, vector<2x1xf32>,
    return
  }
}

</mosaic_0001>

<bundles_post_ra>
// kernel: predict.1
= control target key start
LH: loop header
LB: loop body
LE: loop exit
PB: predicated region body
PF: predicated region fallthrough
CT: control target
= control target key end

     0   :  { %v9062_v0 = vmov 0.0   ;;  %vm9063_vm0 = vmmov 0   ;;  %vm100_vm1 = vcmask 261120   ;;  %vm150_vm2 = vcmask 64512   ;;  %s11033_s27 = smov 64   ;;  %s11029_s28 = smov 120   ;;  %s10985_s2 = inlined_call_operand.vmem [shape: bf16[2,32,96], index: 2, kind: input, shape index: {}]   ;;  %s10986_s0 = inlined_call_operand.vmem [shape: f32[2,8,32], index: 0, kind: input, shape index: {}]   ;;  %s10987_s3 = inlined_call_operand.vmem [shape: f32[2,1,96], index: 3, kind: input, shape index: {}]   ;;  %s10988_s4 = inlined_call_operand.vmem [shape: bf16[2,32,32], index: 4, kind: input, shape index: {}]   ;;  %s10989_s5 = inlined_call_operand.vmem [shape: f32[2,1,32], index: 5, kind: input, shape index: {}]   ;;  %s10990_s8 = inlined_call_operand.vmem [shape: bf16[2,32,2048], index: 8, kind: input, shape index: {}]   ;;  %s10991_s10 = inlined_call_operand.vmem [shape: bf16[2,2048,32], index: 10, kind: input, shape index: {}]   ;;  %s10992_s6 = inlined_call_operand.vmem [shape: f32[2,1,32], index: 6, kind: input, shape index: {}]   ;;  %s10993_s7 = inlined_call_operand.vmem [shape: f32[2,1,32], index: 7, kind: input, shape index: {}]   ;;  %s10994_s9 = inlined_call_operand.vmem [shape: f32[2,1,2048], index: 9, kind: input, shape index: {}]   ;;  %s10995_s11 = inlined_call_operand.vmem [shape: f32[2,1,32], index: 11, kind: input, shape index: {}]   ;;  %s10996_s12 = inlined_call_operand.vmem [shape: f32[2,1,32], index: 12, kind: input, shape index: {}]   ;;  %s10997_s13 = inlined_call_operand.vmem [shape: f32[2,1,32], index: 13, kind: input, shape index: {}]   ;;  %s10998_s14 = inlined_call_operand.vmem [shape: f32[16,64], index: 14, kind: input, shape index: {}]   ;;  %s10999_s1 = inlined_call_operand.vmem [shape: f32[2,16], index: 1, kind: input, shape index: {}]   ;;  %s11000_s16 = inlined_call_operand.vmem [shape: f32[96,64], index: 16, kind: input, shape index: {}]   ;;  %s11001_s15 = inlined_call_operand.vmem [shape: f32[1,64], index: 15, kind: input, shape index: {}]   ;;  %s11002_s18 = inlined_call_operand.vmem [shape: f32[64,64], index: 18, kind: input, shape index: {}]   ;;  %s11003_s20 = inlined_call_operand.vmem [shape: f32[64,1], index: 20, kind: input, shape index: {}]   ;;  %s11004_s17 = inlined_call_operand.vmem [shape: f32[1,64], index: 17, kind: input, shape index: {}]   ;;  %s11005_s21 = inlined_call_operand.<no memory space> [shape: f32[1,1], index: 21, kind: input, shape index: {}]   ;;  %s11006_s19 = inlined_call_operand.vmem [shape: f32[1,64], index: 19, kind: input, shape index: {}]   ;;  %s11007_s22 = inlined_call_operand.vmem [shape: f32[2,1], index: 22, kind: output, shape index: {}]  }
   0x1   :  { %11037 = sst [smem:[#allocation3_spill]] %s10985_s2  ;;  %8331 = vmatprep.subr.bf16.mxu0 %v9062_v0  ;;  %8335 = vmatprep.mubr.msk.bf16.mxu0 %vm9063_vm0, %v9062_v0  ;;  %vm277_vm3 = vcmask 1043456   ;;  %s11027_s30 = smov 56   ;;  %vm6715_vm4 = vcmask 130048   ;;  %vm6804_vm5 = vcmask 523264   ;;  %vm6880_vm6 = vcmask 1041409  }
   0x2   :  { %11038 = sst [smem:[#allocation4_spill]] %s10986_s0  ;;  %s11047_s29 = sld [smem:[#allocation3_spill]]  ;;  %8339 = vmatprep.subr.bf16.mxu1 %v9062_v0  ;;  %8341 = vmatprep.mubr.msk.bf16.mxu1 %vm9063_vm0, %v9062_v0  ;;  %vm7140_vm7 = vcmask 1024  }
   0x3   :  { %11039 = sst [smem:[#allocation5_spill]] %s10987_s3  ;;  %s11048_s0 = sld [smem:[#allocation4_spill]] }
   0x4   :  { %11040 = sst [smem:[#allocation6_spill]] %s10988_s4  ;;  %s11049_s26 = sld [smem:[#allocation5_spill]] }
   0x5   :  { %11041 = sst [smem:[#allocation7_spill]] %s10989_s5  ;;  %s11035_s3 = smov 96  }
   0x6   :  { %11042 = sst [smem:[#allocation8_spill]] %s10990_s8  ;;  %s11031_s4 = smov 88  }
   0x7   :  { %11043 = sst [smem:[#allocation9_spill]] %s10991_s10  ;;  %s11023_s5 = smov 112  }
   0x8   :  { %11044 = sst [smem:[#allocation10_spill]] %s11005_s21  ;;  %v8722_v1 = vld [vmem:[%s11047_s29] sm:$0xff]   ;;  %v8723_v2 = vld [vmem:[%s11047_s29 + $0x8] sm:$0xff]   ;;  %s11025_s2 = smov 80  }
   0x9   :  { %11045 = sst [smem:[#allocation11_spill]] %s11006_s19  ;;  %8332 = vmatpush3.bf16.msra.mxu0 %v8722_v1  ;;  %v9207_v3 = vld [vmem:[%s11048_s0] sm:$0xff]  ;;  %v9212_v4 = vld [vmem:[%s11048_s0 + $0x8] sm:$0xff]  ;;  %s11050_s8 = sld [smem:[#allocation6_spill]] }
   0xa   :  { %11046 = sst [smem:[#allocation12_spill]] %s11007_s22  ;;  %8333 = vmatprep.subr.bf16.mxu0 %v9062_v0  ;;  %v76_v5 = vpack.c.bf16 %v9212_v4, %v9207_v3  ;;  %v7146_v6 = vld [vmem:[%s11049_s26] ss:$0 sm:$0xff]  ;;  %s11021_s25 = smov 48  }
   0xb   :  { %s11019_s23 = smov 72   ;;  %s11015_s0 = smov 104  }
   0xc   :  { %s11017_s24 = smov 40   ;;  %s11056_s10 = smov 88  }
   0xd   :  { %8334 = vmatpush3.bf16.msra.mxu0 %v8723_v2  ;;  %s11058_s19 = smov 56   ;;  %s11059_s21 = smov 80  }
   0xe   :  { %8345 = vmatprep.subr.bf16.mxu0 %v9062_v0  ;;  %s11060_s22 = smov 112  }
  0x10   :  { %8336 = vmatmul.mubr.msk.bf16.vlgmr.msra.gmra.mrb[0].mxu0 %vm100_vm1, %v76_v5 }
  0x11   :  { %8347 = vmatprep.mubr.msk.bf16.mxu0 %vm9063_vm0, %v9062_v0 }
  0xe3   :  { %v138_v7 = vpop.f32.mrb[0].mxu0 }
  0xe4   :  { %v139_v8 = vadd.f32 %v7146_v6, %v138_v7  ;;  %v8337_v9 = vpop.f32.mrb[1].mxu0 }
  0xe5   :  { %v141_v10 = vpop.f32.mrb[2].mxu0 }
  0xe6   :  { %v9224_v11 = vpack.c.bf16 %v139_v8, %v139_v8  ;;  %v142_v12 = vadd.f32 %v7146_v6, %v141_v10  ;;  %v8338_v13 = vpop.f32.mrb[3].mxu0 }
  0xe8   :  { %148 = vrot.lane.b32.xlu0 %v9224_v11, %s11035_s3  ;;  %v9228_v14 = vpack.c.bf16 %v142_v12, %v142_v12 }
  0xec   :  { %198 = vrot.lane.b32.xlu0 %v9228_v14, %s11035_s3  ;;  %s11066_s3 = sld [smem:[#allocation11_spill]] }
 0x15a   :  { %v149_v15 = vpop.permute.xlu0 %148 }
 0x15b   :  { %v155_v16 = vsel %vm150_vm2, %v149_v15, 0 }
 0x15c   :  { %8340 = vmatpush3.bf16.xpose.msra.mxu1 %v155_v16 }
 0x15d   :  { %8351 = vmatprep.subr.bf16.mxu1 %v9062_v0 }
 0x15e   :  { %v199_v17 = vpop.permute.xlu0 %198 }
 0x15f   :  { %v204_v18 = vsel %vm150_vm2, %v199_v17, 0 }
 0x160   :  { %8346 = vmatpush3.bf16.xpose.msra.mxu0 %v204_v18 }
 0x161   :  { %8357 = vmatprep.subr.bf16.mxu0 %v9062_v0 }
 0x163   :  { %8342 = vmatmul.mubr.msk.bf16.vlgmr.msra.gmra.mrb[0].mxu1 %vm150_vm2, %v9224_v11 }
 0x164   :  { %8353 = vmatprep.mubr.msk.bf16.mxu1 %vm9063_vm0, %v9062_v0 }
 0x167   :  { %8348 = vmatmul.mubr.msk.bf16.vlgmr.msra.gmra.mrb[4].mxu0 %vm150_vm2, %v9228_v14 }
 0x168   :  { %8359 = vmatprep.mubr.msk.bf16.mxu0 %vm9063_vm0, %v9062_v0 }
 0x236   :  { %v191_v19 = vpop.f32.mrb[0].mxu1 }
 0x237   :  { %v246_v20 = vmul.f32 0.35355338, %v191_v19  ;;  %v8343_v21 = vpop.f32.mrb[1].mxu1 }
 0x238   :  { %v194_v22 = vpop.f32.mrb[2].mxu1 }
 0x239   :  { %v8344_v23 = vpop.f32.mrb[3].mxu1  ;;  %v248_v24 = vsel %vm150_vm2, %v246_v20, -inf }
 0x23a   :  { %249 = vmax.xlane.f32.xlu1 %v248_v24  ;;  %v240_v25 = vpop.f32.mrb[4].mxu0 }
 0x23b   :  { %v247_v26 = vmul.f32 0.35355338, %v240_v25  ;;  %v8349_v27 = vpop.f32.mrb[5].mxu0 }
 0x23c   :  { %v243_v28 = vpop.f32.mrb[6].mxu0 }
 0x23d   :  { %v8350_v29 = vpop.f32.mrb[7].mxu0  ;;  %v251_v30 = vsel %vm150_vm2, %v247_v26, -inf }
 0x23e   :  { %252 = vmax.xlane.f32.xlu1 %v251_v30 }
 0x24f   :  { %272 = vrot.lane.b32.xlu1 %v9224_v11, %s11033_s27 }
 0x253   :  { %321 = vrot.lane.b32.xlu1 %v9228_v14, %s11033_s27  ;;  %s11057_s27 = smov 120  }
 0x257   :  { %373 = vrot.lane.b32.xlu1 %v9224_v11, %s11031_s4 }
 0x2c7   :  { %v250_v31 = vpop.xlane.xlu1 %249 }
 0x2c8   :  { %v254_v32 = vsub.f32 %v246_v20, %v250_v31 }
 0x2ca   :  { %v256_v33 = vmul.f32 1.442695, %v254_v32 }
 0x2cb   :  { %v253_v34 = vpop.xlane.xlu1 %252 }
 0x2cc   :  { %8982 = vpow2.f32 %v256_v33  ;;  %v255_v35 = vsub.f32 %v247_v26, %v253_v34 }
 0x2ce   :  { %v258_v36 = vmul.f32 1.442695, %v255_v35 }
 0x2cf   :  { %v273_v37 = vpop.permute.xlu1 %272 }
 0x2d0   :  { %8984 = vpow2.f32 %v258_v36  ;;  %v279_v38 = vsel %vm277_vm3, %v273_v37, 0 }
 0x2d1   :  { %8352 = vmatpush3.bf16.msra.mxu1 %v279_v38  ;;  %v594_v38 = vld [vmem:[%s11050_s8 + $0x4] sm:$0xf] }
 0x2d2   :  { %8363 = vmatprep.subr.bf16.mxu1 %v9062_v0 }
 0x2d3   :  { %v322_v39 = vpop.permute.xlu1 %321 }
 0x2d4   :  { %v327_v40 = vsel %vm277_vm3, %v322_v39, 0 }
 0x2d5   :  { %8358 = vmatpush3.bf16.msra.mxu0 %v327_v40 }
 0x2d6   :  { %v8983_v41 = vpop.eup %8982  ;;  %8369 = vmatprep.subr.bf16.mxu0 %v9062_v0 }
 0x2d7   :  { %v260_v42 = vsel %vm150_vm2, %v8983_v41, 0.0  ;;  %v374_v45 = vpop.permute.xlu1 %373 }
 0x2d8   :  { %261 = vadd.xlane.f32.xlu0 %v260_v42  ;;  %v379_v52 = vsel %vm150_vm2, %v374_v45, 0 }
 0x2da   :  { %v8985_v43 = vpop.eup %8984 }
 0x2db   :  { %v263_v44 = vsel %vm150_vm2, %v8985_v43, 0.0 }
 0x2dc   :  { %264 = vadd.xlane.f32.xlu1 %v263_v44 }
 0x2ed   :  { %423 = vrot.lane.b32.xlu1 %v9228_v14, %s11031_s4  ;;  %s11062_s4 = smov 72  }
 0x2ee   :  { %371 = vrot.lane.b32.xlu0 %v9224_v11, %s11029_s28 }
 0x2f1   :  { %421 = vrot.lane.b32.xlu1 %v9228_v14, %s11029_s28  ;;  %s11063_s28 = smov 104  }
 0x365   :  { %v262_v46 = vpop.xlane.xlu0 %261 }
 0x366   :  { %8986 = vrcp.f32 %v262_v46 }
 0x369   :  { %v265_v47 = vpop.xlane.xlu1 %264  ;;  %v372_v57 = vpop.permute.xlu0 %371 }
 0x36a   :  { %8988 = vrcp.f32 %v265_v47 }
 0x36d   :  { %v424_v54 = vpop.permute.xlu1 %423 }
 0x36e   :  { %v429_v56 = vsel %vm150_vm2, %v424_v54, 0 }
 0x370   :  { %v8987_v48 = vpop.eup %8986 }
 0x371   :  { %v268_v49 = vmul.f32 %v8987_v48, %v8983_v41  ;;  %v422_v58 = vpop.permute.xlu1 %421  ;;  %v599_v41 = vsel %vm277_vm3, %v594_v38, 0 }
 0x373   :  { %v270_v50 = vpack.c.bf16 %v268_v49, %v268_v49 }
 0x374   :  { %v8989_v51 = vpop.eup %8988 }
 0x375   :  { %v269_v53 = vmul.f32 %v8989_v51, %v8985_v43  ;;  %8354 = vmatmul.mubr.msk.bf16.vlgmr.msra.gmra.mrb[4].mxu1 %vm150_vm2, %v270_v50  ;;  %v370_v43 = vld [vmem:[%s11050_s8] sm:$0xf] }
 0x376   :  { %8364 = vmatpush3.bf16.xpose.msra.mxu1 %v379_v52  ;;  %8365 = vmatprep.mubr.msk.bf16.mxu1 %vm9063_vm0, %v9062_v0  ;;  %v646_v46 = vsel %vm277_vm3, %v370_v43, 0 }
 0x377   :  { %v271_v55 = vpack.c.bf16 %v269_v53, %v269_v53  ;;  %8375 = vmatprep.subr.bf16.mxu1 %v9062_v0 }
 0x379   :  { %8360 = vmatmul.mubr.msk.bf16.vlgmr.msra.gmra.mrb[8].mxu0 %vm150_vm2, %v271_v55 }
 0x37a   :  { %8370 = vmatpush3.bf16.xpose.msra.mxu0 %v429_v56  ;;  %8371 = vmatprep.mubr.msk.bf16.mxu0 %vm9063_vm0, %v9062_v0 }
 0x37b   :  { %8381 = vmatprep.subr.bf16.mxu0 %v9062_v0 }
 0x37d   :  { %8366 = vmatmul.mubr.msk.bf16.vlgmr.msra.gmra.mrb[8].mxu1 %vm150_vm2, %v372_v57 }
 0x37e   :  { %8377 = vmatprep.mubr.msk.bf16.mxu1 %vm9063_vm0, %v9062_v0 }
 0x381   :  { %8372 = vmatmul.mubr.msk.bf16.vlgmr.msra.gmra.mrb[12].mxu0 %vm150_vm2, %v422_v58 }
 0x382   :  { %8383 = vmatprep.mubr.msk.bf16.mxu0 %vm9063_vm0, %v9062_v0 }
 0x448   :  { %v9280_v59 = vpop.f32.mrb[4].mxu1 }
 0x449   :  { %v8355_v60 = vpop.f32.mrb[5].mxu1 }
 0x44a   :  { %v318_v61 = vpop.f32.mrb[6].mxu1 }
 0x44b   :  { %v8356_v62 = vpop.f32.mrb[7].mxu1 }
 0x44c   :  { %v9282_v63 = vpop.f32.mrb[8].mxu0 }
 0x44d   :  { %v369_v1 = vpack.c.bf16 %v9282_v63, %v9280_v59  ;;  %v8361_v2 = vpop.f32.mrb[9].mxu0 }
 0x44e   :  { %v366_v5 = vpop.f32.mrb[10].mxu0 }
 0x44f   :  { %v8362_v6 = vpop.f32.mrb[11].mxu0 }
 0x450   :  { %v415_v7 = vpop.f32.mrb[8].mxu1 }
 0x451   :  { %v471_v8 = vmul.f32 0.35355338, %v415_v7  ;;  %v8367_v9 = vpop.f32.mrb[9].mxu1 }
 0x452   :  { %v418_v10 = vpop.f32.mrb[10].mxu1 }
 0x453   :  { %v8368_v12 = vpop.f32.mrb[11].mxu1  ;;  %v473_v13 = vsel %vm150_vm2, %v471_v8, -inf }
 0x454   :  { %474 = vmax.xlane.f32.xlu1 %v473_v13  ;;  %v465_v15 = vpop.f32.mrb[12].mxu0 }
 0x455   :  { %v472_v16 = vmul.f32 0.35355338, %v465_v15  ;;  %v8373_v17 = vpop.f32.mrb[13].mxu0 }
 0x456   :  { %v468_v18 = vpop.f32.mrb[14].mxu0 }
 0x457   :  { %v8374_v19 = vpop.f32.mrb[15].mxu0  ;;  %v476_v20 = vsel %vm150_vm2, %v472_v16, -inf }
 0x458   :  { %477 = vmax.xlane.f32.xlu0 %v476_v20 }
 0x46e   :  { %545 = vrot.lane.b32.xlu0 %v9228_v14, %s11027_s30 }
 0x472   :  { %689 = vrot.lane.b32.xlu0 %v9224_v11, %s11023_s5 }
 0x4e1   :  { %v475_v21 = vpop.xlane.xlu1 %474 }
 0x4e2   :  { %v479_v22 = vsub.f32 %v471_v8, %v475_v21 }
 0x4e4   :  { %v481_v23 = vmul.f32 1.442695, %v479_v22 }
 0x4e5   :  { %v478_v24 = vpop.xlane.xlu0 %477 }
 0x4e6   :  { %8990 = vpow2.f32 %v481_v23  ;;  %v480_v25 = vsub.f32 %v472_v16, %v478_v24 }
 0x4e8   :  { %v483_v26 = vmul.f32 1.442695, %v480_v25 }
 0x4e9   :  { %v546_v27 = vpop.permute.xlu0 %545 }
 0x4ea   :  { %8992 = vpow2.f32 %v483_v26  ;;  %v551_v28 = vsel %vm277_vm3, %v546_v27, 0 }
 0x4eb   :  { %8382 = vmatpush3.bf16.msra.mxu0 %v551_v28 }
 0x4ec   :  { %8393 = vmatprep.subr.bf16.mxu0 %v9062_v0 }
 0x4ed   :  { %v690_v63 = vpop.permute.xlu0 %689 }
 0x4f0   :  { %v8991_v29 = vpop.eup %8990 }
 0x4f1   :  { %v485_v30 = vsel %vm150_vm2, %v8991_v29, 0.0 }
 0x4f2   :  { %486 = vadd.xlane.f32.xlu1 %v485_v30 }
 0x4f4   :  { %v8993_v31 = vpop.eup %8992 }
 0x4f5   :  { %v488_v32 = vsel %vm150_vm2, %v8993_v31, 0.0 }
 0x4f6   :  { %489 = vadd.xlane.f32.xlu1 %v488_v32 }
 0x507   :  { %497 = vrot.lane.b32.xlu1 %v9224_v11, %s11027_s30 }
 0x50b   :  { %691 = vrot.lane.b32.xlu1 %v9224_v11, %s11025_s2 }
 0x50f   :  { %741 = vrot.lane.b32.xlu1 %v9228_v14, %s11025_s2  ;;  %s11061_s2 = smov 48  }
 0x513   :  { %739 = vrot.lane.b32.xlu1 %v9228_v14, %s11023_s5  ;;  %s11053_s5 = sld [smem:[#allocation9_spill]] }
 0x57f   :  { %v487_v33 = vpop.xlane.xlu1 %486 }
 0x580   :  { %8994 = vrcp.f32 %v487_v33 }
 0x583   :  { %v490_v34 = vpop.xlane.xlu1 %489 }
 0x584   :  { %8996 = vrcp.f32 %v490_v34 }
 0x587   :  { %v498_v35 = vpop.permute.xlu1 %497 }
 0x588   :  { %v503_v36 = vsel %vm277_vm3, %v498_v35, 0 }
 0x589   :  { %8376 = vmatpush3.bf16.msra.mxu1 %v503_v36 }
 0x58a   :  { %v8995_v37 = vpop.eup %8994  ;;  %8387 = vmatprep.subr.bf16.mxu1 %v9062_v0 }
 0x58b   :  { %v493_v39 = vmul.f32 %v8995_v37, %v8991_v29  ;;  %v692_v47 = vpop.permute.xlu1 %691 }
 0x58c   :  { %v697_v59 = vsel %vm150_vm2, %v692_v47, 0 }
 0x58d   :  { %v495_v40 = vpack.c.bf16 %v493_v39, %v493_v39 }
 0x58e   :  { %v8997_v42 = vpop.eup %8996 }
 0x58f   :  { %v494_v44 = vmul.f32 %v8997_v42, %v8993_v31  ;;  %8378 = vmatmul.mubr.msk.bf16.vlgmr.msra.gmra.mrb[12].mxu1 %vm150_vm2, %v495_v40  ;;  %v742_v48 = vpop.permute.xlu1 %741 }
 0x590   :  { %8388 = vmatpush3.bf16.msra.mxu1 %v599_v41  ;;  %8389 = vmatprep.mubr.msk.bf16.mxu1 %vm9063_vm0, %v9062_v0  ;;  %v747_v49 = vsel %vm150_vm2, %v742_v48, 0 }
 0x591   :  { %v496_v45 = vpack.c.bf16 %v494_v44, %v494_v44  ;;  %8399 = vmatprep.subr.bf16.mxu1 %v9062_v0 }
 0x593   :  { %8384 = vmatmul.mubr.msk.bf16.vlgmr.msra.gmra.mrb[16].mxu0 %vm150_vm2, %v496_v45  ;;  %v740_v50 = vpop.permute.xlu1 %739 }
 0x594   :  { %8394 = vmatpush3.bf16.msra.mxu0 %v646_v46  ;;  %8395 = vmatprep.mubr.msk.bf16.mxu0 %vm9063_vm0, %v9062_v0 }
 0x595   :  { %8405 = vmatprep.subr.bf16.mxu0 %v9062_v0 }
 0x59b   :  { %8396 = vmatmul.mubr.msk.bf16.vlgmr.msra.gmra.mrb[20].mxu0 %vm150_vm2, %v369_v1 }
 0x59c   :  { %8407 = vmatprep.mubr.msk.bf16.mxu0 %vm9063_vm0, %v9062_v0 }
 0x59d   :  { %8406 = vmatpush3.bf16.xpose.msra.mxu0 %v747_v49 }
 0x59e   :  { %8417 = vmatprep.subr.bf16.mxu0 %v9062_v0 }
 0x5a4   :  { %8408 = vmatmul.mubr.msk.bf16.vlgmr.msra.gmra.mrb[24].mxu0 %vm150_vm2, %v740_v50  ;;  %v912_v50 = vld [vmem:[%s11050_s8 + $0x8] sm:$0xf] }
 0x5a5   :  { %8419 = vmatprep.mubr.msk.bf16.mxu0 %vm9063_vm0, %v9062_v0 }
 0x662   :  { %v539_v51 = vpop.f32.mrb[12].mxu1 }
 0x663   :  { %v8379_v52 = vpop.f32.mrb[13].mxu1 }
 0x664   :  { %v542_v53 = vpop.f32.mrb[14].mxu1 }
 0x665   :  { %v8380_v54 = vpop.f32.mrb[15].mxu1 }
 0x666   :  { %v587_v55 = vpop.f32.mrb[16].mxu0 }
 0x667   :  { %v593_v56 = vpack.c.bf16 %v587_v55, %v539_v51  ;;  %v8385_v57 = vpop.f32.mrb[17].mxu0  ;;  %v917_v51 = vsel %vm277_vm3, %v912_v50, 0 }
 0x668   :  { %v590_v58 = vpop.f32.mrb[18].mxu0 }
 0x669   :  { %v8386_v60 = vpop.f32.mrb[19].mxu0  ;;  %8390 = vmatmul.mubr.msk.bf16.vlgmr.msra.gmra.mrb[16].mxu1 %vm150_vm2, %v593_v56 }
 0x66a   :  { %8400 = vmatpush3.bf16.xpose.msra.mxu1 %v697_v59  ;;  %8401 = vmatprep.mubr.msk.bf16.mxu1 %vm9063_vm0, %v9062_v0 }
 0x66b   :  { %8411 = vmatprep.subr.bf16.mxu1 %v9062_v0 }
 0x66e   :  { %v682_v61 = vpop.f32.mrb[20].mxu0 }
 0x66f   :  { %v8397_v62 = vpop.f32.mrb[21].mxu0 }
 0x670   :  { %v685_v1 = vpop.f32.mrb[22].mxu0 }
 0x671   :  { %v8398_v2 = vpop.f32.mrb[23].mxu0  ;;  %8402 = vmatmul.mubr.msk.bf16.vlgmr.msra.gmra.mrb[20].mxu1 %vm150_vm2, %v690_v63 }
 0x672   :  { %8413 = vmatprep.mubr.msk.bf16.mxu1 %vm9063_vm0, %v9062_v0 }
 0x677   :  { %v783_v5 = vpop.f32.mrb[24].mxu0 }
 0x678   :  { %v790_v6 = vmul.f32 0.35355338, %v783_v5  ;;  %v8409_v7 = vpop.f32.mrb[25].mxu0 }
 0x679   :  { %v786_v8 = vpop.f32.mrb[26].mxu0 }
 0x67a   :  { %v8410_v9 = vpop.f32.mrb[27].mxu0  ;;  %v794_v10 = vsel %vm150_vm2, %v790_v6, -inf }
 0x67b   :  { %795 = vmax.xlane.f32.xlu1 %v794_v10 }
 0x68c   :  { %815 = vrot.lane.b32.xlu1 %v9224_v11, %s11021_s25 }
 0x690   :  { %964 = vrot.lane.b32.xlu1 %v9224_v11, %s11019_s23 }
 0x694   :  { %1014 = vrot.lane.b32.xlu1 %v9228_v14, %s11019_s23  ;;  %s11052_s23 = sld [smem:[#allocation8_spill]] }
 0x698   :  { %1012 = vrot.lane.b32.xlu1 %v9228_v14, %s11015_s0 }
 0x708   :  { %v796_v12 = vpop.xlane.xlu1 %795 }
 0x709   :  { %v798_v16 = vsub.f32 %v790_v6, %v796_v12 }
 0x70b   :  { %v801_v17 = vmul.f32 1.442695, %v798_v16 }
 0x70c   :  { %v816_v13 = vpop.permute.xlu1 %815 }
 0x70d   :  { %v821_v15 = vsel %vm277_vm3, %v816_v13, 0  ;;  %8998 = vpow2.f32 %v801_v17 }
 0x70e   :  { %8412 = vmatpush3.bf16.msra.mxu1 %v821_v15 }
 0x70f   :  { %8423 = vmatprep.subr.bf16.mxu1 %v9062_v0 }
 0x710   :  { %v965_v45 = vpop.permute.xlu1 %964 }
 0x711   :  { %v970_v47 = vsel %vm150_vm2, %v965_v45, 0 }
 0x714   :  { %v1015_v56 = vpop.permute.xlu1 %1014 }
 0x717   :  { %v8999_v30 = vpop.eup %8998 }
 0x718   :  { %v806_v31 = vsel %vm150_vm2, %v8999_v30, 0.0  ;;  %v1013_v8 = vpop.permute.xlu1 %1012 }
 0x73c   :  { %v635_v18 = vpop.f32.mrb[16].mxu1 }
 0x73d   :  { %v9352_v19 = vadd.f32 %v682_v61, %v635_v18  ;;  %v8391_v20 = vpop.f32.mrb[17].mxu1  ;;  %v1020_v61 = vsel %vm150_vm2, %v1015_v56, 0 }
 0x73e   :  { %v638_v21 = vpop.f32.mrb[18].mxu1 }
 0x73f   :  { %v9354_v22 = vadd.f32 %v685_v1, %v638_v21  ;;  %v8392_v23 = vpop.f32.mrb[19].mxu1 }
 0x744   :  { %v733_v24 = vpop.f32.mrb[20].mxu1 }
 0x745   :  { %v789_v25 = vmul.f32 0.35355338, %v733_v24  ;;  %v8403_v26 = vpop.f32.mrb[21].mxu1 }
 0x746   :  { %v736_v27 = vpop.f32.mrb[22].mxu1 }
 0x747   :  { %v8404_v28 = vpop.f32.mrb[23].mxu1  ;;  %v791_v29 = vsel %vm150_vm2, %v789_v25, -inf }
 0x748   :  { %792 = vmax.xlane.f32.xlu0 %v791_v29 }
 0x74c   :  { %807 = vadd.xlane.f32.xlu0 %v806_v31 }
 0x7d5   :  { %v793_v32 = vpop.xlane.xlu0 %792 }
 0x7d6   :  { %v797_v33 = vsub.f32 %v789_v25, %v793_v32 }
 0x7d8   :  { %v799_v34 = vmul.f32 1.442695, %v797_v33 }
 0x7d9   :  { %v808_v37 = vpop.xlane.xlu0 %807 }
 0x7da   :  { %9000 = vpow2.f32 %v799_v34 }
 0x7db   :  { %9002 = vrcp.f32 %v808_v37 }
 0x7e4   :  { %v9001_v35 = vpop.eup %9000 }
 0x7e5   :  { %v803_v36 = vsel %vm150_vm2, %v9001_v35, 0.0  ;;  %v9003_v38 = vpop.eup %9002 }
 0x7e6   :  { %804 = vadd.xlane.f32.xlu0 %v803_v36  ;;  %v812_v40 = vmul.f32 %v9003_v38, %v8999_v30  ;;  %v1185_v38 = vld [vmem:[%s11050_s8 + $0xc] sm:$0xf] }
 0x7e8   :  { %v814_v43 = vpack.c.bf16 %v812_v40, %v812_v40 }
 0x7fc   :  { %863 = vrot.lane.b32.xlu0 %v9228_v14, %s11021_s25  ;;  %s11067_s25 = sld [smem:[#allocation12_spill]] }
 0x800   :  { %962 = vrot.lane.b32.xlu0 %v9224_v11, %s11015_s0  ;;  %s11054_s0 = smov 96  }
 0x873   :  { %v805_v39 = vpop.xlane.xlu0 %804 }
 0x874   :  { %9004 = vrcp.f32 %v805_v39  ;;  %v1190_v39 = vsel %vm277_vm3, %v1185_v38, 0 }
 0x877   :  { %v864_v41 = vpop.permute.xlu0 %863 }
 0x878   :  { %v869_v42 = vsel %vm277_vm3, %v864_v41, 0 }
 0x879   :  { %8418 = vmatpush3.bf16.msra.mxu0 %v869_v42 }
 0x87a   :  { %8429 = vmatprep.subr.bf16.mxu0 %v9062_v0 }
 0x87b   :  { %v963_v49 = vpop.permute.xlu0 %962 }
 0x87c   :  { %8420 = vmatmul.mubr.msk.bf16.vlgmr.msra.gmra.mrb[28].mxu0 %vm150_vm2, %v814_v43 }
 0x87d   :  { %8431 = vmatprep.mubr.msk.bf16.mxu0 %vm9063_vm0, %v9062_v0 }
 0x87e   :  { %v9005_v44 = vpop.eup %9004 }
 0x87f   :  { %v811_v46 = vmul.f32 %v9005_v44, %v9001_v35 }
 0x881   :  { %v813_v48 = vpack.c.bf16 %v811_v46, %v811_v46 }
 0x882   :  { %8430 = vmatpush3.bf16.xpose.msra.mxu0 %v970_v47 }
 0x883   :  { %8414 = vmatmul.mubr.msk.bf16.vlgmr.msra.gmra.mrb[24].mxu1 %vm150_vm2, %v813_v48  ;;  %8441 = vmatprep.subr.bf16.mxu0 %v9062_v0 }
 0x884   :  { %8425 = vmatprep.mubr.msk.bf16.mxu1 %vm9063_vm0, %v9062_v0  ;;  %8424 = vmatpush3.bf16.msra.mxu1 %v917_v51 }
 0x885   :  { %8435 = vmatprep.subr.bf16.mxu1 %v9062_v0 }
 0x889   :  { %8432 = vmatmul.mubr.msk.bf16.vlgmr.msra.gmra.mrb[32].mxu0 %vm150_vm2, %v963_v49 }
 0x88a   :  { %8443 = vmatprep.mubr.msk.bf16.mxu0 %vm9063_vm0, %v9062_v0 }
 0x94f   :  { %v905_v52 = vpop.f32.mrb[28].mxu0 }
 0x950   :  { %v8421_v53 = vpop.f32.mrb[29].mxu0 }
 0x951   :  { %v908_v54 = vpop.f32.mrb[30].mxu0 }
 0x952   :  { %v8422_v55 = vpop.f32.mrb[31].mxu0 }
 0x956   :  { %v857_v57 = vpop.f32.mrb[24].mxu1 }
 0x957   :  { %v911_v58 = vpack.c.bf16 %v905_v52, %v857_v57  ;;  %v8415_v59 = vpop.f32.mrb[25].mxu1 }
 0x958   :  { %v860_v60 = vpop.f32.mrb[26].mxu1 }
 0x959   :  { %v8416_v62 = vpop.f32.mrb[27].mxu1  ;;  %8426 = vmatmul.mubr.msk.bf16.vlgmr.msra.gmra.mrb[28].mxu1 %vm150_vm2, %v911_v58 }
 0x95a   :  { %8436 = vmatpush3.bf16.xpose.msra.mxu1 %v1020_v61  ;;  %8437 = vmatprep.mubr.msk.bf16.mxu1 %vm9063_vm0, %v9062_v0 }
 0x95b   :  { %8447 = vmatprep.subr.bf16.mxu1 %v9062_v0 }
 0x95c   :  { %v1006_v63 = vpop.f32.mrb[32].mxu0 }
 0x95d   :  { %v1062_v1 = vmul.f32 0.35355338, %v1006_v63  ;;  %v8433_v2 = vpop.f32.mrb[33].mxu0 }
 0x95e   :  { %v1009_v5 = vpop.f32.mrb[34].mxu0 }
 0x95f   :  { %v8434_v6 = vpop.f32.mrb[35].mxu0  ;;  %v1064_v7 = vsel %vm150_vm2, %v1062_v1, -inf }
 0x960   :  { %1065 = vmax.xlane.f32.xlu0 %v1064_v7 }
 0x961   :  { %8438 = vmatmul.mubr.msk.bf16.vlgmr.msra.gmra.mrb[32].mxu1 %vm150_vm2, %v1013_v8 }
 0x962   :  { %8449 = vmatprep.mubr.msk.bf16.mxu1 %vm9063_vm0, %v9062_v0 }
 0x9ed   :  { %v1066_v9 = vpop.xlane.xlu0 %1065 }
 0x9ee   :  { %v1070_v10 = vsub.f32 %v1062_v1, %v1066_v9 }
 0x9f0   :  { %v1072_v12 = vmul.f32 1.442695, %v1070_v10 }
 0x9f2   :  { %9006 = vpow2.f32 %v1072_v12 }
 0x9fc   :  { %v9007_v13 = vpop.eup %9006 }
 0x9fd   :  { %v1076_v15 = vsel %vm150_vm2, %v9007_v13, 0.0 }
 0x9fe   :  { %1077 = vadd.xlane.f32.xlu0 %v1076_v15 }
 0xa2c   :  { %v953_v16 = vpop.f32.mrb[28].mxu1 }
 0xa2d   :  { %v960_v17 = vadd.f32 %v953_v16, %v9352_v19  ;;  %v8427_v18 = vpop.f32.mrb[29].mxu1 }
 0xa2e   :  { %v956_v20 = vpop.f32.mrb[30].mxu1  ;;  %v1293_v18 = vld [vmem:[%s11052_s23 + $0x8] sm:$0xff] }
 0xa2f   :  { %v961_v21 = vadd.f32 %v956_v20, %v9354_v22  ;;  %v8428_v23 = vpop.f32.mrb[31].mxu1 }
 0xa34   :  { %v1056_v24 = vpop.f32.mrb[32].mxu1 }
 0xa35   :  { %v1063_v25 = vmul.f32 0.35355338, %v1056_v24  ;;  %v8439_v26 = vpop.f32.mrb[33].mxu1 }
 0xa36   :  { %v1059_v27 = vpop.f32.mrb[34].mxu1  ;;  %v1296_v26 = vld [vmem:[%s11052_s23 + $0x80] sm:$0xff] }
 0xa37   :  { %v8440_v28 = vpop.f32.mrb[35].mxu1  ;;  %v1067_v29 = vsel %vm150_vm2, %v1063_v25, -inf  ;;  %v1298_v27 = vld [vmem:[%s11052_s23 + $0xc0] sm:$0xff] }
 0xa38   :  { %1068 = vmax.xlane.f32.xlu1 %v1067_v29  ;;  %v1297_v28 = vld [vmem:[%s11052_s23 + $0x88] sm:$0xff]  ;;  %v7178_v29 = vcombine.high %v1296_v26, %v1298_v27 }
 0xa49   :  { %1088 = vrot.lane.b32.xlu1 %v9224_v11, %s11017_s24 }
 0xa8b   :  { %v1078_v30 = vpop.xlane.xlu0 %1077 }
 0xa8c   :  { %9008 = vrcp.f32 %v1078_v30  ;;  %v1299_v30 = vld [vmem:[%s11052_s23 + $0xc8] sm:$0xff] }
 0xa96   :  { %v9009_v19 = vpop.eup %9008 }
 0xa97   :  { %v1084_v33 = vmul.f32 %v9009_v19, %v9007_v13  ;;  %v7177_v19 = vcombine.low %v1296_v26, %v1298_v27  ;;  %v8745_v26 = vld [vmem:[%s11053_s5 + $0x1e8] sm:$0xff]  }
 0xa98   :  { %v8746_v27 = vld [vmem:[%s11053_s5 + $0x128] sm:$0xff]  }
 0xa99   :  { %v1086_v36 = vpack.c.bf16 %v1084_v33, %v1084_v33  ;;  %v1527_v33 = vld [vmem:[%s11052_s23 + $0x10] sm:$0xff] }
 0xac5   :  { %v1069_v31 = vpop.xlane.xlu1 %1068 }
 0xac6   :  { %v1071_v32 = vsub.f32 %v1063_v25, %v1069_v31  ;;  %v7179_v31 = vcombine.low %v1297_v28, %v1299_v30 }
 0xac8   :  { %v1074_v22 = vmul.f32 1.442695, %v1071_v32  ;;  %v7180_v32 = vcombine.high %v1297_v28, %v1299_v30  ;;  %v8747_v28 = vld [vmem:[%s11053_s5 + $0x1a8] sm:$0xff]   ;;  %v8749_v30 = vld [vmem:[%s11053_s5 + $0x1f0] sm:$0xff]  }
 0xac9   :  { %v1089_v34 = vpop.permute.xlu1 %1088 }
 0xaca   :  { %9010 = vpow2.f32 %v1074_v22  ;;  %v1094_v35 = vsel %vm277_vm3, %v1089_v34, 0  ;;  %v1529_v22 = vld [vmem:[%s11052_s23 + $0x50] sm:$0xff]  ;;  %v1528_v34 = vld [vmem:[%s11052_s23 + $0x18] sm:$0xff] }
 0xacb   :  { %8442 = vmatpush3.bf16.msra.mxu0 %v1094_v35  ;;  %v9075_v35 = vmov 0  }
 0xacc   :  { %8453 = vmatprep.subr.bf16.mxu0 %v9062_v0 }
 0xace   :  { %8444 = vmatmul.mubr.msk.bf16.vlgmr.msra.gmra.mrb[36].mxu0 %vm150_vm2, %v1086_v36  ;;  %v7184_v36 = vcombine.high %v1527_v33, %v1529_v22 }
 0xacf   :  { %8455 = vmatprep.mubr.msk.bf16.mxu0 %vm9063_vm0, %v9062_v0  ;;  %8454 = vmatpush3.bf16.msra.mxu0 %v1190_v39 }
 0xad4   :  { %v9011_v11 = vpop.eup %9010 }
 0xad5   :  { %v1079_v37 = vsel %vm150_vm2, %v9011_v11, 0.0 }
 0xad6   :  { %1080 = vadd.xlane.f32.xlu0 %v1079_v37  ;;  %v7183_v37 = vcombine.low %v1527_v33, %v1529_v22  ;;  %v8753_v33 = vld [vmem:[%s11053_s5 + $0x1f8] sm:$0xff]  }
 0xad7   :  { %v8754_v22 = vld [vmem:[%s11053_s5 + $0x138] sm:$0xff]  }
 0xaec   :  { %1136 = vrot.lane.b32.xlu0 %v9228_v14, %s11017_s24  ;;  %s11051_s24 = sld [smem:[#allocation7_spill]] }
 0xaf2   :  { %v7170_v55 = vld [vmem:[%s11051_s24] ss:$0 sm:$0xff] }
 0xb63   :  { %v1081_v40 = vpop.xlane.xlu0 %1080 }
 0xb64   :  { %9012 = vrcp.f32 %v1081_v40 }
 0xb67   :  { %v1137_v41 = vpop.permute.xlu0 %1136 }
 0xb68   :  { %v1142_v42 = vsel %vm277_vm3, %v1137_v41, 0 }
 0xb69   :  { %8448 = vmatpush3.bf16.msra.mxu1 %v1142_v42 }
 0xb6e   :  { %v9013_v43 = vpop.eup %9012 }
 0xb6f   :  { %v1085_v44 = vmul.f32 %v9013_v43, %v9011_v11  ;;  %v1530_v11 = vld [vmem:[%s11052_s23 + $0x58] sm:$0xff] }
 0xb70   :  { %v7185_v38 = vcombine.low %v1528_v34, %v1530_v11  ;;  %v7186_v39 = vcombine.high %v1528_v34, %v1530_v11  ;;  %v8755_v34 = vld [vmem:[%s11053_s5 + $0x1b8] sm:$0xff]   ;;  %v8757_v11 = vld [vmem:[%s11053_s5 + $0xc0] sm:$0xff]  }
 0xb71   :  { %v1087_v45 = vpack.c.bf16 %v1085_v44, %v1085_v44 }
 0xb73   :  { %8450 = vmatmul.mubr.msk.bf16.vlgmr.msra.gmra.mrb[36].mxu1 %vm150_vm2, %v1087_v45 }
 0xb74   :  { %1397 = vmatprep.mubr.bf16.mxu1 %v9075_v35 }
 0xba1   :  { %v1130_v46 = vpop.f32.mrb[36].mxu0 }
 0xba2   :  { %v8445_v14 = vpop.f32.mrb[37].mxu0 }
 0xba3   :  { %v1133_v47 = vpop.f32.mrb[38].mxu0 }
 0xba4   :  { %v8446_v48 = vpop.f32.mrb[39].mxu0 }
 0xc46   :  { %v1178_v49 = vpop.f32.mrb[36].mxu1 }
 0xc47   :  { %v1184_v50 = vpack.c.bf16 %v1178_v49, %v1130_v46  ;;  %v8451_v51 = vpop.f32.mrb[37].mxu1  ;;  %v7171_v46 = vld [vmem:[%s10992_s6] ss:$0 sm:$0xff] }
 0xc48   :  { %v1181_v52 = vpop.f32.mrb[38].mxu1  ;;  %v7172_v49 = vld [vmem:[%s10993_s7] ss:$0 sm:$0xff] }
 0xc49   :  { %v8452_v53 = vpop.f32.mrb[39].mxu1  ;;  %8456 = vmatmul.mubr.msk.bf16.vlgmr.msra.gmra.mrb[40].mxu0 %vm150_vm2, %v1184_v50  ;;  %v1531_v52 = vld [vmem:[%s11052_s23 + $0x90] sm:$0xff] }
 0xc4a   :  { %1440 = vmatprep.mubr.bf16.mxu0 %v9075_v35  ;;  %v1533_v53 = vld [vmem:[%s11052_s23 + $0xd0] sm:$0xff] }
 0xd1c   :  { %v1226_v54 = vpop.f32.mrb[40].mxu0 }
 0xd1d   :  { %v1233_v56 = vadd.f32 %v1226_v54, %v960_v17  ;;  %v8457_v57 = vpop.f32.mrb[41].mxu0  ;;  %v1294_v17 = vld [vmem:[%s11052_s23 + $0x40] sm:$0xff]  ;;  %v1532_v54 = vld [vmem:[%s11052_s23 + $0x98] sm:$0xff] }
 0xd1e   :  { %v1229_v58 = vpop.f32.mrb[42].mxu0 }
 0xd1f   :  { %v1242_v59 = vadd.f32 %v7170_v55, %v1233_v56  ;;  %v1234_v60 = vadd.f32 %v1229_v58, %v961_v21  ;;  %v8458_v61 = vpop.f32.mrb[43].mxu0  ;;  %v1295_v21 = vld [vmem:[%s11052_s23 + $0x48] sm:$0xff] }
 0xd20   :  { %v7175_v24 = vcombine.low %v1293_v18, %v1295_v21  ;;  %v7176_v25 = vcombine.high %v1293_v18, %v1295_v21  ;;  %v8739_v18 = vld [vmem:[%s11053_s5 + $0x198] sm:$0xff]   ;;  %v8741_v21 = vld [vmem:[%s11053_s5 + $0x1e0] sm:$0xff]  }
 0xd21   :  { %v1243_v62 = vadd.f32 %v7170_v55, %v1234_v60  ;;  %v1244_v63 = vadd.f32 %v1242_v59, %v9207_v3  ;;  %v1534_v55 = vld [vmem:[%s11052_s23 + $0xd8] sm:$0xff]  ;;  %v7188_v60 = vcombine.high %v1531_v52, %v1533_v53 }
 0xd22   :  { %1408 = vmatprep.subr.bf16.mxu0 %v7176_v25  ;;  %v7190_v61 = vcombine.high %v1532_v54, %v1534_v55  ;;  %v8744_v25 = vld [vmem:[%s11053_s5 + $0x168] sm:$0xff]  }
 0xd23   :  { %v1248_v1 = vsel %vm100_vm1, %v1244_v63, 0.0  ;;  %v1245_v2 = vadd.f32 %v1243_v62, %v9212_v4  ;;  %v1292_v4 = vld [vmem:[%s11052_s23] sm:$0xff]  ;;  %1409 = vmatpush1.bf16.msra.mxu0 %v7175_v24 }
 0xd24   :  { %1249 = vadd.xlane.f32.xlu1 %v1248_v1  ;;  %v7174_v20 = vcombine.high %v1292_v4, %v1294_v17  ;;  %v7173_v23 = vcombine.low %v1292_v4, %v1294_v17  ;;  %1410 = vmatprep.subr.bf16.mxu0 %v7180_v32  ;;  %v8724_v62 = vld [vmem:[%s11053_s5 + $0x140] sm:$0xff]   ;;  %v7187_v1 = vcombine.low %v1531_v52, %v1533_v53  ;;  %v8737_v4 = vld [vmem:[%s11053_s5 + $0x1d8] sm:$0xff]  }
 0xd25   :  { %v1251_v5 = vsel %vm100_vm1, %v1245_v2, 0.0  ;;  %v8738_v17 = vld [vmem:[%s11053_s5 + $0x118] sm:$0xff]   ;;  %v8743_v24 = vld [vmem:[%s11053_s5 + $0x1a0] sm:$0xff]  }
 0xd26   :  { %1252 = vadd.xlane.f32.xlu0 %v1251_v5  ;;  %1365 = vmatprep.subr.bf16.mxu1 %v7174_v20  ;;  %v8726_v5 = vld [vmem:[%s11053_s5 + $0x100] sm:$0xff]   ;;  %v8752_v32 = vld [vmem:[%s11053_s5 + $0x178] sm:$0xff]  }
 0xd27   :  { %1366 = vmatpush1.bf16.msra.mxu1 %v7173_v23  ;;  %1411 = vmatpush1.bf16.msra.mxu0 %v7179_v31  ;;  %v8740_v20 = vld [vmem:[%s11053_s5 + $0x160] sm:$0xff]   ;;  %v8751_v31 = vld [vmem:[%s11053_s5 + $0x1b0] sm:$0xff]  }
 0xd28   :  { %1367 = vmatprep.subr.bf16.mxu1 %v7178_v29  ;;  %1640 = vmatprep.subr.bf16.mxu0 %v7186_v39  ;;  %v8742_v23 = vld [vmem:[%s11053_s5 + $0x120] sm:$0xff]   ;;  %v8748_v29 = vld [vmem:[%s11053_s5 + $0x170] sm:$0xff]  }
 0xd2b   :  { %1368 = vmatpush1.bf16.msra.mxu1 %v7177_v19  ;;  %v8750_v19 = vld [vmem:[%s11053_s5 + $0x130] sm:$0xff]  }
 0xd2c   :  { %1597 = vmatprep.subr.bf16.mxu1 %v7184_v36  ;;  %v8756_v36 = vld [vmem:[%s11053_s5 + $0x40] sm:$0xff]  }
 0xdb1   :  { %v1250_v6 = vpop.xlane.xlu1 %1249 }
 0xdb2   :  { %v1255_v7 = vmul.f32 0.03125, %v1250_v6  ;;  %v8727_v6 = vld [vmem:[%s11053_s5 + $0x180] sm:$0xff]  }
 0xdb3   :  { %v1253_v8 = vpop.xlane.xlu0 %1252 }
 0xdb4   :  { %v1257_v9 = vsub.f32 %v1244_v63, %v1255_v7  ;;  %v1256_v10 = vmul.f32 0.03125, %v1253_v8  ;;  %v8725_v63 = vld [vmem:[%s11053_s5 + $0x1c0] sm:$0xff]   ;;  %v8728_v7 = vld [vmem:[%s11053_s5 + $0x148] sm:$0xff]  }
 0xdb5   :  { %v8729_v8 = vld [vmem:[%s11053_s5 + $0x1c8] sm:$0xff]  }
 0xdb6   :  { %v1258_v12 = vsub.f32 %v1245_v2, %v1256_v10  ;;  %v1259_v13 = vmul.f32 %v1257_v9, %v1257_v9  ;;  %v7189_v2 = vcombine.low %v1532_v54, %v1534_v55  ;;  %v8731_v10 = vld [vmem:[%s11053_s5 + $0x188] sm:$0xff]  }
 0xdb8   :  { %v1261_v15 = vsel %vm100_vm1, %v1259_v13, 0.0  ;;  %v1260_v16 = vmul.f32 %v1258_v12, %v1258_v12  ;;  %v8733_v13 = vld [vmem:[%s11053_s5 + $0x1d0] sm:$0xff]  }
 0xdb9   :  { %1262 = vadd.xlane.f32.xlu1 %v1261_v15  ;;  %v8734_v15 = vld [vmem:[%s11053_s5 + $0x110] sm:$0xff]  }
 0xdba   :  { %v1264_v3 = vsel %vm100_vm1, %v1260_v16, 0.0  ;;  %v8735_v16 = vld [vmem:[%s11053_s5 + $0x190] sm:$0xff]  }
 0xdbb   :  { %1265 = vadd.xlane.f32.xlu0 %v1264_v3  ;;  %v8736_v3 = vld [vmem:[%s11053_s5 + $0x158] sm:$0xff]  }
 0xe46   :  { %v1263_v40 = vpop.xlane.xlu1 %1262 }
 0xe47   :  { %v1267_v41 = vmul.f32 0.03125, %v1263_v40 }
 0xe48   :  { %v1266_v42 = vpop.xlane.xlu0 %1265 }
 0xe49   :  { %v1269_v43 = vadd.f32 1e-05, %v1267_v41  ;;  %v1268_v44 = vmul.f32 0.03125, %v1266_v42  ;;  %v1300_v41 = vld [vmem:[%s10994_s9] sm:$0xf] }
 0xe4b   :  { %9014 = vrsqrt.f32 %v1269_v43  ;;  %v1270_v45 = vadd.f32 1e-05, %v1268_v44 }
 0xe4d   :  { %9016 = vrsqrt.f32 %v1270_v45 }
 0xe55   :  { %v9015_v14 = vpop.eup %9014 }
 0xe56   :  { %v1273_v47 = vmul.f32 %v9015_v14, %v1257_v9  ;;  %v8730_v9 = vld [vmem:[%s11053_s5 + $0x108] sm:$0xff]  }
 0xe57   :  { %v9017_v48 = vpop.eup %9016 }
 0xe58   :  { %v1281_v50 = vmul.f32 %v7171_v46, %v1273_v47  ;;  %v1274_v51 = vmul.f32 %v9017_v48, %v1258_v12  ;;  %v8732_v12 = vld [vmem:[%s11053_s5 + $0x150] sm:$0xff]  }
 0xe5a   :  { %v1282_v56 = vmul.f32 %v7171_v46, %v1274_v51  ;;  %v9476_v57 = vadd.f32 %v7172_v49, %v1281_v50 }
 0xe5c   :  { %v9478_v58 = vadd.f32 %v7172_v49, %v1282_v56  ;;  %v1535_v49 = vld [vmem:[%s10994_s9 + $0x4] sm:$0xf] }
 0xe5e   :  { %v9482_v59 = vpack.c.bf16 %v9478_v58, %v9476_v57 }
 0xe60   :  { %7181 = vmatmul.mubr.msk.bf16.vlgmr.msra.gmra.mrb[40].mxu1 %vm100_vm1, %v9482_v59  ;;  %7182 = vmatmul.mubr.msk.bf16.vlgmr.msra.gmra.mrb[44].mxu0 %vm100_vm1, %v9482_v59 }
 0xe61   :  { %1598 = vmatpush1.bf16.msra.mxu1 %v7183_v37  ;;  %1641 = vmatpush1.bf16.msra.mxu0 %v7185_v38  ;;  %v1302_v37 = vlaneseq }
 0xe62   :  { %1599 = vmatprep.subr.bf16.mxu1 %v7188_v60  ;;  %1642 = vmatprep.subr.bf16.mxu0 %v7190_v61 }
 0xe63   :  { %1629 = vmatprep.mubr.bf16.mxu1 %v9075_v35  ;;  %1672 = vmatprep.mubr.bf16.mxu0 %v9075_v35  ;;  %v1303_v38 = vshrl.u32 %v1302_v37, 7 }
 0xe65   :  { %1600 = vmatpush1.bf16.msra.mxu1 %v7187_v1  ;;  %1643 = vmatpush1.bf16.msra.mxu0 %v7189_v2  ;;  %v9596_v39 = vsub.s32 0, %v1303_v38  ;;  %v9598_v40 = vsub.s32 2, %v1303_v38  ;;  %v9603_v42 = vsub.s32 1, %v1303_v38  ;;  %v9605_v43 = vsub.s32 3, %v1303_v38 }
 0xe66   :  { %7901 = vmatprep.subr.bf16.mxu1 %v8724_v62  ;;  %7923 = vmatprep.subr.bf16.mxu0 %v8725_v63 }
 0xe67   :  { %v1305_v44 = vrot.slane %v1300_v41, %v9596_v39  ;;  %v1313_v45 = vrot.slane %v1300_v41, %v9598_v40  ;;  %v1309_v46 = vrot.slane %v1300_v41, %v9603_v42  ;;  %v1317_v14 = vrot.slane %v1300_v41, %v9605_v43 }
 0xe68   :  { %7191 = vmatmul.mubr.msk.bf16.vlgmr.msra.gmra.mrb[44].mxu1 %vm100_vm1, %v9482_v59  ;;  %7192 = vmatmul.mubr.msk.bf16.vlgmr.msra.gmra.mrb[48].mxu0 %vm100_vm1, %v9482_v59  ;;  %v1540_v2 = vrot.slane %v1535_v49, %v9596_v39 }
 0xe69   :  { %7902 = vmatpush3.bf16.msra.mxu1 %v8726_v5  ;;  %7924 = vmatpush3.bf16.msra.mxu0 %v8727_v6  ;;  %v1548_v5 = vrot.slane %v1535_v49, %v9598_v40 }
 0xe6a   :  { %7903 = vmatprep.subr.bf16.mxu1 %v8728_v7  ;;  %7925 = vmatprep.subr.bf16.mxu0 %v8729_v8  ;;  %v1544_v8 = vrot.slane %v1535_v49, %v9603_v42 }
 0xe6d   :  { %7904 = vmatpush3.bf16.msra.mxu1 %v8730_v9  ;;  %7926 = vmatpush3.bf16.msra.mxu0 %v8731_v10  ;;  %v1552_v9 = vrot.slane %v1535_v49, %v9605_v43 }
 0xe6e   :  { %7905 = vmatprep.subr.bf16.mxu1 %v8732_v12  ;;  %7927 = vmatprep.subr.bf16.mxu0 %v8733_v13 }
 0xe71   :  { %7906 = vmatpush3.bf16.msra.mxu1 %v8734_v15  ;;  %7928 = vmatpush3.bf16.msra.mxu0 %v8735_v16 }
 0xe72   :  { %7907 = vmatprep.subr.bf16.mxu1 %v8736_v3  ;;  %7929 = vmatprep.subr.bf16.mxu0 %v8737_v4 }
 0xe75   :  { %7908 = vmatpush3.bf16.msra.mxu1 %v8738_v17  ;;  %7930 = vmatpush3.bf16.msra.mxu0 %v8739_v18 }
 0xe76   :  { %7909 = vmatprep.subr.bf16.mxu1 %v8740_v20  ;;  %7931 = vmatprep.subr.bf16.mxu0 %v8741_v21 }
 0xe79   :  { %7910 = vmatpush3.bf16.msra.mxu1 %v8742_v23  ;;  %7932 = vmatpush3.bf16.msra.mxu0 %v8743_v24 }
 0xe7a   :  { %7911 = vmatprep.subr.bf16.mxu1 %v8744_v25  ;;  %7933 = vmatprep.subr.bf16.mxu0 %v8745_v26 }
 0xe7d   :  { %7912 = vmatpush3.bf16.msra.mxu1 %v8746_v27  ;;  %7934 = vmatpush3.bf16.msra.mxu0 %v8747_v28 }
 0xe7e   :  { %7913 = vmatprep.subr.bf16.mxu1 %v8748_v29  ;;  %7935 = vmatprep.subr.bf16.mxu0 %v8749_v30 }
 0xe81   :  { %7914 = vmatpush3.bf16.msra.mxu1 %v8750_v19  ;;  %7936 = vmatpush3.bf16.msra.mxu0 %v8751_v31 }
 0xe82   :  { %7915 = vmatprep.subr.bf16.mxu1 %v8752_v32  ;;  %7937 = vmatprep.subr.bf16.mxu0 %v8753_v33 }
 0xe85   :  { %7916 = vmatpush3.bf16.msra.mxu1 %v8754_v22  ;;  %7938 = vmatpush3.bf16.msra.mxu0 %v8755_v34 }
 0xe86   :  { %7945 = vmatprep.subr.bf16.mxu1 %v8756_v36  ;;  %7967 = vmatprep.subr.bf16.mxu0 %v8757_v11 }
 0xf33   :  { %v1399_v47 = vpop.f32.mrb[40].mxu1  ;;  %v1442_v48 = vpop.f32.mrb[44].mxu0 }
 0xf34   :  { %v1400_v50 = vadd.f32 %v1399_v47, %v1305_v44  ;;  %v1443_v51 = vadd.f32 %v1442_v48, %v1313_v45  ;;  %v1401_v52 = vpop.f32.mrb[41].mxu1  ;;  %v1444_v53 = vpop.f32.mrb[45].mxu0 }
 0xf35   :  { %v1402_v54 = vadd.f32 %v1401_v52, %v1309_v46  ;;  %v1445_v55 = vadd.f32 %v1444_v53, %v1317_v14  ;;  %v1403_v56 = vpop.f32.mrb[42].mxu1  ;;  %v1446_v60 = vpop.f32.mrb[46].mxu0  ;;  %v8758_v53 = vld [vmem:[%s11053_s5] sm:$0xff]  }
 0xf36   :  { %v1404_v61 = vadd.f32 %v1403_v56, %v1305_v44  ;;  %v1447_v62 = vadd.f32 %v1446_v60, %v1313_v45  ;;  %v1405_v63 = vpop.f32.mrb[43].mxu1  ;;  %v1448_v1 = vpop.f32.mrb[47].mxu0  ;;  %v1451_v10 = vmax.f32 %v1400_v50, 0.0  ;;  %v1453_v12 = vmax.f32 %v1443_v51, 0.0  ;;  %v8761_v56 = vld [vmem:[%s11053_s5 + $0xc8] sm:$0xff]  }
 0xf37   :  { %v1406_v6 = vadd.f32 %v1405_v63, %v1309_v46  ;;  %v1449_v7 = vadd.f32 %v1448_v1, %v1317_v14  ;;  %v1452_v16 = vmax.f32 %v1402_v54, 0.0  ;;  %v1454_v3 = vmax.f32 %v1445_v55, 0.0  ;;  %v8759_v54 = vld [vmem:[%s11053_s5 + $0x80] sm:$0xff]   ;;  %v8760_v55 = vld [vmem:[%s11053_s5 + $0x48] sm:$0xff]   ;;  %v8765_v63 = vld [vmem:[%s11053_s5 + $0xd0] sm:$0xff]  }
 0xf38   :  { %v1455_v13 = vmax.f32 %v1404_v61, 0.0  ;;  %v1457_v15 = vmax.f32 %v1447_v62, 0.0  ;;  %v8762_v60 = vld [vmem:[%s11053_s5 + $0x8] sm:$0xff]   ;;  %v8764_v62 = vld [vmem:[%s11053_s5 + $0x50] sm:$0xff]  }
 0xf39   :  { %v1456_v4 = vmax.f32 %v1406_v6, 0.0  ;;  %v1458_v17 = vmax.f32 %v1449_v7, 0.0  ;;  %v8763_v61 = vld [vmem:[%s11053_s5 + $0x88] sm:$0xff]   ;;  %v8766_v1 = vld [vmem:[%s11053_s5 + $0x10] sm:$0xff]   ;;  %v8769_v6 = vld [vmem:[%s11053_s5 + $0xd8] sm:$0xff]  }
 0xf3a   :  { %v9618_v18 = vpack.c.bf16 %v1455_v13, %v1451_v10  ;;  %v9620_v20 = vpack.c.bf16 %v1457_v15, %v1453_v12  ;;  %v8770_v7 = vld [vmem:[%s11053_s5 + $0x18] sm:$0xff]   ;;  %v8773_v10 = vld [vmem:[%s11053_s5 + $0xe0] sm:$0xff]   ;;  %v8776_v15 = vld [vmem:[%s11053_s5 + $0x68] sm:$0xff]  }
 0xf3b   :  { %v1460_v21 = vpack.c.bf16 %v1456_v4, %v1452_v16  ;;  %v1462_v23 = vpack.c.bf16 %v1458_v17, %v1454_v3  ;;  %v1631_v24 = vpop.f32.mrb[44].mxu1  ;;  %v1674_v25 = vpop.f32.mrb[48].mxu0  ;;  %v8774_v12 = vld [vmem:[%s11053_s5 + $0x20] sm:$0xff]   ;;  %v8777_v16 = vld [vmem:[%s11053_s5 + $0xe8] sm:$0xff]   ;;  %v8780_v17 = vld [vmem:[%s11053_s5 + $0x70] sm:$0xff]  }
 0xf3c   :  { %v1632_v26 = vadd.f32 %v1631_v24, %v1540_v2  ;;  %v1675_v27 = vadd.f32 %v1674_v25, %v1548_v5  ;;  %v1633_v28 = vpop.f32.mrb[45].mxu1  ;;  %v1676_v29 = vpop.f32.mrb[49].mxu0  ;;  %v8775_v13 = vld [vmem:[%s11053_s5 + $0xa0] sm:$0xff]   ;;  %v8778_v3 = vld [vmem:[%s11053_s5 + $0x28] sm:$0xff]   ;;  %v8783_v24 = vld [vmem:[%s11053_s5 + $0xb0] sm:$0xff]  }
 0xf3d   :  { %v1634_v30 = vadd.f32 %v1633_v28, %v1544_v8  ;;  %v1677_v19 = vadd.f32 %v1676_v29, %v1552_v9  ;;  %v1635_v31 = vpop.f32.mrb[46].mxu1  ;;  %v1678_v32 = vpop.f32.mrb[50].mxu0  ;;  %v8779_v4 = vld [vmem:[%s11053_s5 + $0xa8] sm:$0xff]   ;;  %v8784_v25 = vld [vmem:[%s11053_s5 + $0x78] sm:$0xff]   ;;  %v2309_v28 = vld [vmem:[%s11052_s23 + $0x60] sm:$0xff] }
 0xf3e   :  { %v1636_v33 = vadd.f32 %v1635_v31, %v1540_v2  ;;  %v1679_v22 = vadd.f32 %v1678_v32, %v1548_v5  ;;  %v1637_v34 = vpop.f32.mrb[47].mxu1  ;;  %v1680_v36 = vpop.f32.mrb[51].mxu0  ;;  %v1683_v38 = vmax.f32 %v1632_v26, 0.0  ;;  %v1685_v41 = vmax.f32 %v1675_v27, 0.0  ;;  %v8767_v2 = vld [vmem:[%s11053_s5 + $0x90] sm:$0xff]   ;;  %v8768_v5 = vld [vmem:[%s11053_s5 + $0x58] sm:$0xff]  }
 0xf3f   :  { %v1638_v11 = vadd.f32 %v1637_v34, %v1544_v8  ;;  %v1681_v37 = vadd.f32 %v1680_v36, %v1552_v9  ;;  %v1684_v46 = vmax.f32 %v1634_v30, 0.0  ;;  %v1686_v14 = vmax.f32 %v1677_v19, 0.0  ;;  %v8771_v8 = vld [vmem:[%s11053_s5 + $0x98] sm:$0xff]   ;;  %v8772_v9 = vld [vmem:[%s11053_s5 + $0x60] sm:$0xff]   ;;  %v2308_v29 = vld [vmem:[%s11052_s23 + $0x28] sm:$0xff] }
 0xf40   :  { %v1687_v44 = vmax.f32 %v1636_v33, 0.0  ;;  %v1689_v45 = vmax.f32 %v1679_v22, 0.0  ;;  %v8785_v26 = vld [vmem:[%s11053_s5 + $0xf8] sm:$0xff]   ;;  %v2307_v27 = vld [vmem:[%s11052_s23 + $0x20] sm:$0xff]  ;;  %v2310_v30 = vld [vmem:[%s11052_s23 + $0x68] sm:$0xff] }
 0xf41   :  { %v1688_v47 = vmax.f32 %v1638_v11, 0.0  ;;  %v1690_v48 = vmax.f32 %v1681_v37, 0.0  ;;  %v8786_v19 = vld [vmem:[%s11053_s5 + $0x38] sm:$0xff]   ;;  %v7258_v32 = vcombine.high %v2307_v27, %v2309_v28  ;;  %v7260_v33 = vcombine.high %v2308_v29, %v2310_v30  ;;  %v2311_v22 = vld [vmem:[%s11052_s23 + $0xa0] sm:$0xff]  ;;  %v2312_v36 = vld [vmem:[%s11052_s23 + $0xa8] sm:$0xff] }
 0xf42   :  { %v1691_v49 = vpack.c.bf16 %v1687_v44, %v1683_v38  ;;  %v1693_v50 = vpack.c.bf16 %v1689_v45, %v1685_v41  ;;  %v8787_v31 = vld [vmem:[%s11053_s5 + $0xb8] sm:$0xff]   ;;  %v2313_v34 = vld [vmem:[%s11052_s23 + $0xe0] sm:$0xff]  ;;  %v2314_v11 = vld [vmem:[%s11052_s23 + $0xe8] sm:$0xff]  ;;  %v7257_v37 = vcombine.low %v2307_v27, %v2309_v28  ;;  %v7259_v38 = vcombine.low %v2308_v29, %v2310_v30 }
 0xf43   :  { %v1692_v51 = vpack.c.bf16 %v1688_v47, %v1684_v46  ;;  %v1694_v52 = vpack.c.bf16 %v1690_v48, %v1686_v14  ;;  %v7262_v41 = vcombine.high %v2311_v22, %v2313_v34  ;;  %v7264_v44 = vcombine.high %v2312_v36, %v2314_v11  ;;  %v8790_v14 = vld [vmem:[%s11053_s5 + $0x200] sm:$0xff]   ;;  %v8792_v48 = vld [vmem:[%s11053_s5 + $0x248] sm:$0xff]  }
 0xf44   :  { %v7261_v45 = vcombine.low %v2311_v22, %v2313_v34  ;;  %v7263_v46 = vcombine.low %v2312_v36, %v2314_v11  ;;  %v8791_v47 = vld [vmem:[%s11053_s5 + $0x280] sm:$0xff]  }
 0xf45   :  { %1983 = vmatprep.mubr.bf16.mxu1 %v1692_v51  ;;  %2024 = vmatprep.mubr.bf16.mxu0 %v1694_v52  ;;  %v8795_v51 = vld [vmem:[%s11053_s5 + $0x288] sm:$0xff]   ;;  %v8796_v52 = vld [vmem:[%s11053_s5 + $0x250] sm:$0xff]  }
 0xf46   :  { %1984 = vmatmul.mubr.bf16.vlgmr.msra.gmra.mrb[48].mxu1 %v1691_v49  ;;  %2025 = vmatmul.mubr.bf16.vlgmr.msra.gmra.mrb[52].mxu0 %v1693_v50  ;;  %v8793_v49 = vld [vmem:[%s11053_s5 + $0x2c8] sm:$0xff]  }
 0xf47   :  { %7946 = vmatpush3.bf16.msra.mxu1 %v8758_v53  ;;  %7968 = vmatpush3.bf16.msra.mxu0 %v8759_v54  ;;  %v8794_v50 = vld [vmem:[%s11053_s5 + $0x208] sm:$0xff]   ;;  %v8797_v53 = vld [vmem:[%s11053_s5 + $0x2d0] sm:$0xff]  }
 0xf48   :  { %2257 = vmatprep.mubr.bf16.mxu1 %v1460_v21  ;;  %2298 = vmatprep.mubr.bf16.mxu0 %v1462_v23  ;;  %v8781_v21 = vld [vmem:[%s11053_s5 + $0xf0] sm:$0xff]  }
 0xf49   :  { %7947 = vmatprep.subr.bf16.mxu1 %v8760_v55  ;;  %7969 = vmatprep.subr.bf16.mxu0 %v8761_v56  ;;  %v8782_v23 = vld [vmem:[%s11053_s5 + $0x30] sm:$0xff]   ;;  %v8800_v56 = vld [vmem:[%s11053_s5 + $0x258] sm:$0xff]  }
 0xf4a   :  { %v8798_v54 = vld [vmem:[%s11053_s5 + $0x210] sm:$0xff]  }
 0xf4b   :  { %7948 = vmatpush3.bf16.msra.mxu1 %v8762_v60  ;;  %7970 = vmatpush3.bf16.msra.mxu0 %v8763_v61  ;;  %v8799_v55 = vld [vmem:[%s11053_s5 + $0x290] sm:$0xff]   ;;  %v8801_v60 = vld [vmem:[%s11053_s5 + $0x2d8] sm:$0xff]  }
 0xf4c   :  { %7949 = vmatprep.subr.bf16.mxu1 %v8764_v62  ;;  %7971 = vmatprep.subr.bf16.mxu0 %v8765_v63  ;;  %v8802_v61 = vld [vmem:[%s11053_s5 + $0x218] sm:$0xff]   ;;  %v8804_v63 = vld [vmem:[%s11053_s5 + $0x260] sm:$0xff]  }
 0xf4d   :  { %v8803_v62 = vld [vmem:[%s11053_s5 + $0x298] sm:$0xff]  }
 0xf4f   :  { %7950 = vmatpush3.bf16.msra.mxu1 %v8766_v1  ;;  %7972 = vmatpush3.bf16.msra.mxu0 %v8767_v2  ;;  %v8805_v1 = vld [vmem:[%s11053_s5 + $0x2e0] sm:$0xff]  }
 0xf50   :  { %7951 = vmatprep.subr.bf16.mxu1 %v8768_v5  ;;  %7973 = vmatprep.subr.bf16.mxu0 %v8769_v6  ;;  %v8806_v2 = vld [vmem:[%s11053_s5 + $0x220] sm:$0xff]   ;;  %v8808_v6 = vld [vmem:[%s11053_s5 + $0x268] sm:$0xff]  }
 0xf51   :  { %v8807_v5 = vld [vmem:[%s11053_s5 + $0x2a0] sm:$0xff]  }
 0xf53   :  { %7952 = vmatpush3.bf16.msra.mxu1 %v8770_v7  ;;  %7974 = vmatpush3.bf16.msra.mxu0 %v8771_v8  ;;  %v8809_v7 = vld [vmem:[%s11053_s5 + $0x2e8] sm:$0xff]  }
 0xf54   :  { %7953 = vmatprep.subr.bf16.mxu1 %v8772_v9  ;;  %7975 = vmatprep.subr.bf16.mxu0 %v8773_v10  ;;  %v8810_v8 = vld [vmem:[%s11053_s5 + $0x228] sm:$0xff]   ;;  %v8812_v10 = vld [vmem:[%s11053_s5 + $0x270] sm:$0xff]  }
 0xf55   :  { %v8811_v9 = vld [vmem:[%s11053_s5 + $0x2a8] sm:$0xff]  }
 0xf57   :  { %7954 = vmatpush3.bf16.msra.mxu1 %v8774_v12  ;;  %7976 = vmatpush3.bf16.msra.mxu0 %v8775_v13  ;;  %v8813_v12 = vld [vmem:[%s11053_s5 + $0x2f0] sm:$0xff]  }
 0xf58   :  { %7955 = vmatprep.subr.bf16.mxu1 %v8776_v15  ;;  %7977 = vmatprep.subr.bf16.mxu0 %v8777_v16  ;;  %v8814_v13 = vld [vmem:[%s11053_s5 + $0x230] sm:$0xff]   ;;  %v8816_v16 = vld [vmem:[%s11053_s5 + $0x278] sm:$0xff]  }
 0xf59   :  { %v8815_v15 = vld [vmem:[%s11053_s5 + $0x2b0] sm:$0xff]  }
 0xf5b   :  { %7956 = vmatpush3.bf16.msra.mxu1 %v8778_v3  ;;  %7978 = vmatpush3.bf16.msra.mxu0 %v8779_v4  ;;  %v8817_v3 = vld [vmem:[%s11053_s5 + $0x2f8] sm:$0xff]  }
 0xf5c   :  { %7957 = vmatprep.subr.bf16.mxu1 %v8780_v17  ;;  %7979 = vmatprep.subr.bf16.mxu0 %v8781_v21  ;;  %v8818_v4 = vld [vmem:[%s11053_s5 + $0x238] sm:$0xff]   ;;  %v9843_v21 = vld [vmem:[%s11052_s23 + $0x30] sm:$0xff] }
 0xf5d   :  { %v8819_v17 = vld [vmem:[%s11053_s5 + $0x2b8] sm:$0xff]  }
 0xf5f   :  { %7958 = vmatpush3.bf16.msra.mxu1 %v8782_v23  ;;  %7980 = vmatpush3.bf16.msra.mxu0 %v8783_v24  ;;  %v9848_v23 = vld [vmem:[%s11052_s23 + $0x70] sm:$0xff]  ;;  %v9853_v24 = vld [vmem:[%s11052_s23 + $0x38] sm:$0xff] }
 0xf60   :  { %7959 = vmatprep.subr.bf16.mxu1 %v8784_v25  ;;  %7981 = vmatprep.subr.bf16.mxu0 %v8785_v26  ;;  %v7300_v25 = vcombine.high %v9843_v21, %v9848_v23  ;;  %v9860_v26 = vld [vmem:[%s11052_s23 + $0x78] sm:$0xff]  ;;  %v7299_v27 = vcombine.low %v9843_v21, %v9848_v23  ;;  %v8822_v21 = vld [vmem:[%s11053_s5 + $0x300] sm:$0xff]  }
 0xf61   :  { %v7301_v28 = vcombine.low %v9853_v24, %v9860_v26  ;;  %v7302_v29 = vcombine.high %v9853_v24, %v9860_v26  ;;  %v8823_v23 = vld [vmem:[%s11053_s5 + $0x380] sm:$0xff]   ;;  %v8824_v24 = vld [vmem:[%s11053_s5 + $0x348] sm:$0xff]  }
 0xf62   :  { %v8825_v26 = vld [vmem:[%s11053_s5 + $0x3c8] sm:$0xff]  }
 0xf63   :  { %7960 = vmatpush3.bf16.msra.mxu1 %v8786_v19  ;;  %7982 = vmatpush3.bf16.msra.mxu0 %v8787_v31 }
 0xf64   :  { %2377 = vmatprep.subr.bf16.mxu1 %v7258_v32  ;;  %2420 = vmatprep.subr.bf16.mxu0 %v7260_v33 }
 0xf66   :  { %2258 = vmatmul.mubr.bf16.vlgmr.msra.gmra.mrb[52].mxu1 %v9618_v18  ;;  %2299 = vmatmul.mubr.bf16.vlgmr.msra.gmra.mrb[56].mxu0 %v9620_v20  ;;  %v8788_v18 = vld [vmem:[%s11053_s5 + $0x240] sm:$0xff]  }
 0xf67   :  { %2378 = vmatpush1.bf16.msra.mxu1 %v7257_v37  ;;  %2421 = vmatpush1.bf16.msra.mxu0 %v7259_v38  ;;  %v8789_v20 = vld [vmem:[%s11053_s5 + $0x2c0] sm:$0xff]  }
 0xf68   :  { %2379 = vmatprep.subr.bf16.mxu1 %v7262_v41  ;;  %2422 = vmatprep.subr.bf16.mxu0 %v7264_v44 }
 0xf69   :  { %2409 = vmatprep.mubr.bf16.mxu1 %v9075_v35  ;;  %2452 = vmatprep.mubr.bf16.mxu0 %v9075_v35 }
 0xf6b   :  { %2380 = vmatpush1.bf16.msra.mxu1 %v7261_v45  ;;  %2423 = vmatpush1.bf16.msra.mxu0 %v7263_v46 }
 0xf6c   :  { %7989 = vmatprep.subr.bf16.mxu1 %v8788_v18  ;;  %8011 = vmatprep.subr.bf16.mxu0 %v8789_v20 }
 0xf6e   :  { %7265 = vmatmul.mubr.msk.bf16.vlgmr.msra.gmra.mrb[56].mxu1 %vm100_vm1, %v9482_v59  ;;  %7266 = vmatmul.mubr.msk.bf16.vlgmr.msra.gmra.mrb[60].mxu0 %vm100_vm1, %v9482_v59 }
 0xf6f   :  { %7990 = vmatpush3.bf16.msra.mxu1 %v8790_v14  ;;  %8012 = vmatpush3.bf16.msra.mxu0 %v8791_v47 }
 0xf70   :  { %7991 = vmatprep.subr.bf16.mxu1 %v8792_v48  ;;  %8013 = vmatprep.subr.bf16.mxu0 %v8793_v49 }
 0xf73   :  { %7992 = vmatpush3.bf16.msra.mxu1 %v8794_v50  ;;  %8014 = vmatpush3.bf16.msra.mxu0 %v8795_v51  ;;  %v2315_v51 = vld [vmem:[%s10994_s9 + $0x8] sm:$0xf] }
 0xf74   :  { %7993 = vmatprep.subr.bf16.mxu1 %v8796_v52  ;;  %8015 = vmatprep.subr.bf16.mxu0 %v8797_v53 }
 0xf77   :  { %7994 = vmatpush3.bf16.msra.mxu1 %v8798_v54  ;;  %8016 = vmatpush3.bf16.msra.mxu0 %v8799_v55 }
 0xf78   :  { %7995 = vmatprep.subr.bf16.mxu1 %v8800_v56  ;;  %8017 = vmatprep.subr.bf16.mxu0 %v8801_v60  ;;  %v2320_v60 = vrot.slane %v2315_v51, %v9596_v39 }
 0xf7b   :  { %7996 = vmatpush3.bf16.msra.mxu1 %v8802_v61  ;;  %8018 = vmatpush3.bf16.msra.mxu0 %v8803_v62  ;;  %v2328_v61 = vrot.slane %v2315_v51, %v9598_v40 }
 0xf7c   :  { %7997 = vmatprep.subr.bf16.mxu1 %v8804_v63  ;;  %8019 = vmatprep.subr.bf16.mxu0 %v8805_v1  ;;  %v2324_v1 = vrot.slane %v2315_v51, %v9603_v42 }
 0xf7f   :  { %7998 = vmatpush3.bf16.msra.mxu1 %v8806_v2  ;;  %8020 = vmatpush3.bf16.msra.mxu0 %v8807_v5  ;;  %v2332_v2 = vrot.slane %v2315_v51, %v9605_v43  ;;  %v8820_v51 = vld [vmem:[%s11053_s5 + $0x340] sm:$0xff]  }
 0xf80   :  { %7999 = vmatprep.subr.bf16.mxu1 %v8808_v6  ;;  %8021 = vmatprep.subr.bf16.mxu0 %v8809_v7 }
 0xf83   :  { %8000 = vmatpush3.bf16.msra.mxu1 %v8810_v8  ;;  %8022 = vmatpush3.bf16.msra.mxu0 %v8811_v9 }
 0xf84   :  { %8001 = vmatprep.subr.bf16.mxu1 %v8812_v10  ;;  %8023 = vmatprep.subr.bf16.mxu0 %v8813_v12 }
 0xf87   :  { %8002 = vmatpush3.bf16.msra.mxu1 %v8814_v13  ;;  %8024 = vmatpush3.bf16.msra.mxu0 %v8815_v15 }
 0xf88   :  { %8003 = vmatprep.subr.bf16.mxu1 %v8816_v16  ;;  %8025 = vmatprep.subr.bf16.mxu0 %v8817_v3 }
 0xf8b   :  { %8004 = vmatpush3.bf16.msra.mxu1 %v8818_v4  ;;  %8026 = vmatpush3.bf16.msra.mxu0 %v8819_v17 }
 0xf8c   :  { %2885 = vmatprep.subr.bf16.mxu1 %v7300_v25  ;;  %2928 = vmatprep.subr.bf16.mxu0 %v7302_v29 }
0x1019   :  { %v7917_v30 = vpop.f32.mrb[48].mxu1  ;;  %v7939_v19 = vpop.f32.mrb[52].mxu0 }
0x101a   :  { %v7918_v31 = vpop.f32.mrb[49].mxu1  ;;  %v7940_v32 = vpop.f32.mrb[53].mxu0 }
0x101b   :  { %v7919_v33 = vadd.f32 %v7918_v31, %v7917_v30  ;;  %v7941_v22 = vadd.f32 %v7940_v32, %v7939_v19  ;;  %v7920_v34 = vpop.f32.mrb[50].mxu1  ;;  %v7942_v36 = vpop.f32.mrb[54].mxu0 }
0x101c   :  { %v7921_v11 = vpop.f32.mrb[51].mxu1  ;;  %v7943_v37 = vpop.f32.mrb[55].mxu0 }
0x101d   :  { %v2027_v38 = vadd.f32 %v7941_v22, %v7919_v33  ;;  %v7922_v41 = vadd.f32 %v7921_v11, %v7920_v34  ;;  %v7944_v44 = vadd.f32 %v7943_v37, %v7942_v36  ;;  %v2819_v34 = vld [vmem:[%s11052_s23 + $0xb0] sm:$0xff] }
0x101e   :  { %v2821_v36 = vld [vmem:[%s11052_s23 + $0xf0] sm:$0xff] }
0x101f   :  { %v2030_v45 = vadd.f32 %v7944_v44, %v7922_v41  ;;  %v2820_v44 = vld [vmem:[%s11052_s23 + $0xb8] sm:$0xff] }
0x1039   :  { %v7961_v46 = vpop.f32.mrb[52].mxu1  ;;  %v7983_v18 = vpop.f32.mrb[56].mxu0 }
0x103a   :  { %v7962_v20 = vpop.f32.mrb[53].mxu1  ;;  %v7984_v14 = vpop.f32.mrb[57].mxu0 }
0x103b   :  { %v7963_v47 = vadd.f32 %v7962_v20, %v7961_v46  ;;  %v7985_v48 = vadd.f32 %v7984_v14, %v7983_v18  ;;  %v7964_v49 = vpop.f32.mrb[54].mxu1  ;;  %v7986_v50 = vpop.f32.mrb[58].mxu0 }
0x103c   :  { %v7965_v52 = vpop.f32.mrb[55].mxu1  ;;  %v7987_v53 = vpop.f32.mrb[59].mxu0 }
0x103d   :  { %v2260_v54 = vadd.f32 %v7963_v47, %v2027_v38  ;;  %v7966_v55 = vadd.f32 %v7965_v52, %v7964_v49  ;;  %v7988_v56 = vadd.f32 %v7987_v53, %v7986_v50  ;;  %v7304_v47 = vcombine.high %v2819_v34, %v2821_v36  ;;  %v8821_v52 = vld [vmem:[%s11053_s5 + $0x3c0] sm:$0xff]   ;;  %v8828_v53 = vld [vmem:[%s11053_s5 + $0x350] sm:$0xff]  }
0x103e   :  { %v7303_v49 = vcombine.low %v2819_v34, %v2821_v36 }
0x103f   :  { %v9873_v62 = vadd.f32 %v7985_v48, %v2260_v54  ;;  %v2263_v63 = vadd.f32 %v7966_v55, %v2030_v45  ;;  %v2822_v45 = vld [vmem:[%s11052_s23 + $0xf8] sm:$0xff]  ;;  %v8830_v54 = vld [vmem:[%s11053_s5 + $0x310] sm:$0xff]  }
0x1040   :  { %v7306_v48 = vcombine.high %v2820_v44, %v2822_v45  ;;  %v7305_v50 = vcombine.low %v2820_v44, %v2822_v45  ;;  %v8831_v55 = vld [vmem:[%s11053_s5 + $0x390] sm:$0xff]  }
0x1041   :  { %v9877_v5 = vadd.f32 %v7988_v56, %v2263_v63  ;;  %v2411_v6 = vpop.f32.mrb[56].mxu1  ;;  %v2454_v7 = vpop.f32.mrb[60].mxu0  ;;  %v8832_v56 = vld [vmem:[%s11053_s5 + $0x358] sm:$0xff]  }
0x1042   :  { %v2412_v8 = vadd.f32 %v2411_v6, %v2320_v60  ;;  %v2455_v9 = vadd.f32 %v2454_v7, %v2328_v61  ;;  %v2413_v10 = vpop.f32.mrb[57].mxu1  ;;  %v2456_v12 = vpop.f32.mrb[61].mxu0  ;;  %v8835_v63 = vld [vmem:[%s11053_s5 + $0x398] sm:$0xff]   ;;  %v8838_v6 = vld [vmem:[%s11053_s5 + $0x320] sm:$0xff]  }
0x1043   :  { %v2414_v13 = vadd.f32 %v2413_v10, %v2324_v1  ;;  %v2457_v15 = vadd.f32 %v2456_v12, %v2332_v2  ;;  %v2415_v16 = vpop.f32.mrb[58].mxu1  ;;  %v2458_v3 = vpop.f32.mrb[62].mxu0  ;;  %v8839_v7 = vld [vmem:[%s11053_s5 + $0x3a0] sm:$0xff]   ;;  %v8842_v10 = vld [vmem:[%s11053_s5 + $0x328] sm:$0xff]  }
0x1044   :  { %v2416_v4 = vadd.f32 %v2415_v16, %v2320_v60  ;;  %v2459_v17 = vadd.f32 %v2458_v3, %v2328_v61  ;;  %v2417_v25 = vpop.f32.mrb[59].mxu1  ;;  %v2460_v29 = vpop.f32.mrb[63].mxu0  ;;  %v2463_v31 = vmax.f32 %v2412_v8, 0.0  ;;  %v2465_v32 = vmax.f32 %v2455_v9, 0.0  ;;  %v8833_v60 = vld [vmem:[%s11053_s5 + $0x3d8] sm:$0xff]   ;;  %v8840_v8 = vld [vmem:[%s11053_s5 + $0x368] sm:$0xff]  }
0x1045   :  { %v2418_v30 = vadd.f32 %v2417_v25, %v2324_v1  ;;  %v2461_v19 = vadd.f32 %v2460_v29, %v2332_v2  ;;  %v2464_v11 = vmax.f32 %v2414_v13, 0.0  ;;  %v2466_v37 = vmax.f32 %v2457_v15, 0.0  ;;  %v8834_v61 = vld [vmem:[%s11053_s5 + $0x318] sm:$0xff]   ;;  %v8836_v1 = vld [vmem:[%s11053_s5 + $0x360] sm:$0xff]   ;;  %v8841_v9 = vld [vmem:[%s11053_s5 + $0x3e8] sm:$0xff]  }
0x1046   :  { %v2467_v33 = vmax.f32 %v2416_v4, 0.0  ;;  %v2469_v22 = vmax.f32 %v2459_v17, 0.0  ;;  %v8837_v2 = vld [vmem:[%s11053_s5 + $0x3e0] sm:$0xff]   ;;  %v8843_v12 = vld [vmem:[%s11053_s5 + $0x3a8] sm:$0xff]   ;;  %v8844_v13 = vld [vmem:[%s11053_s5 + $0x370] sm:$0xff]  }
0x1047   :  { %v2468_v38 = vmax.f32 %v2418_v30, 0.0  ;;  %v2470_v41 = vmax.f32 %v2461_v19, 0.0  ;;  %v8845_v15 = vld [vmem:[%s11053_s5 + $0x3f0] sm:$0xff]   ;;  %v8848_v4 = vld [vmem:[%s11053_s5 + $0x378] sm:$0xff]  }
0x1048   :  { %v2471_v46 = vpack.c.bf16 %v2467_v33, %v2463_v31  ;;  %v2473_v18 = vpack.c.bf16 %v2469_v22, %v2465_v32  ;;  %v8846_v16 = vld [vmem:[%s11053_s5 + $0x330] sm:$0xff]   ;;  %v8849_v17 = vld [vmem:[%s11053_s5 + $0x3f8] sm:$0xff]  }
0x1049   :  { %v2472_v20 = vpack.c.bf16 %v2468_v38, %v2464_v11  ;;  %v2474_v14 = vpack.c.bf16 %v2470_v41, %v2466_v37  ;;  %v8847_v3 = vld [vmem:[%s11053_s5 + $0x3b0] sm:$0xff]   ;;  %v8850_v25 = vld [vmem:[%s11053_s5 + $0x338] sm:$0xff]   ;;  %v2823_v11 = vld [vmem:[%s10994_s9 + $0xc] sm:$0xf] }
0x104a   :  { %v8851_v29 = vld [vmem:[%s11053_s5 + $0x3b8] sm:$0xff]  }
0x104b   :  { %2763 = vmatprep.mubr.bf16.mxu1 %v2472_v20  ;;  %2804 = vmatprep.mubr.bf16.mxu0 %v2474_v14 }
0x104c   :  { %2764 = vmatmul.mubr.bf16.vlgmr.msra.gmra.mrb[60].mxu1 %v2471_v46  ;;  %2805 = vmatmul.mubr.bf16.vlgmr.msra.gmra.mrb[64].mxu0 %v2473_v18  ;;  %v2828_v46 = vrot.slane %v2823_v11, %v9596_v39  ;;  %v2836_v18 = vrot.slane %v2823_v11, %v9598_v40 }
0x104d   :  { %2886 = vmatpush1.bf16.msra.mxu1 %v7299_v27  ;;  %2929 = vmatpush1.bf16.msra.mxu0 %v7301_v28  ;;  %v8826_v27 = vld [vmem:[%s11053_s5 + $0x308] sm:$0xff]  }
0x104e   :  { %2887 = vmatprep.subr.bf16.mxu1 %v7304_v47  ;;  %2930 = vmatprep.subr.bf16.mxu0 %v7306_v48  ;;  %v8827_v28 = vld [vmem:[%s11053_s5 + $0x388] sm:$0xff]   ;;  %v2832_v47 = vrot.slane %v2823_v11, %v9603_v42  ;;  %v2840_v48 = vrot.slane %v2823_v11, %v9605_v43 }
0x104f   :  { %2917 = vmatprep.mubr.bf16.mxu1 %v9075_v35  ;;  %2960 = vmatprep.mubr.bf16.mxu0 %v9075_v35 }
0x1051   :  { %2888 = vmatpush1.bf16.msra.mxu1 %v7303_v49  ;;  %2931 = vmatpush1.bf16.msra.mxu0 %v7305_v50 }
0x1052   :  { %8033 = vmatprep.subr.bf16.mxu1 %v8820_v51  ;;  %8055 = vmatprep.subr.bf16.mxu0 %v8821_v52 }
0x1054   :  { %7307 = vmatmul.mubr.msk.bf16.vlgmr.msra.gmra.mrb[64].mxu1 %vm100_vm1, %v9482_v59  ;;  %7308 = vmatmul.mubr.msk.bf16.vlgmr.msra.gmra.mrb[68].mxu0 %vm100_vm1, %v9482_v59  ;;  %v8829_v59 = vld [vmem:[%s11053_s5 + $0x3d0] sm:$0xff]  }
0x1055   :  { %8034 = vmatpush3.bf16.msra.mxu1 %v8822_v21  ;;  %8056 = vmatpush3.bf16.msra.mxu0 %v8823_v23 }
0x1056   :  { %8035 = vmatprep.subr.bf16.mxu1 %v8824_v24  ;;  %8057 = vmatprep.subr.bf16.mxu0 %v8825_v26 }
0x1059   :  { %8036 = vmatpush3.bf16.msra.mxu1 %v8826_v27  ;;  %8058 = vmatpush3.bf16.msra.mxu0 %v8827_v28 }
0x105a   :  { %8037 = vmatprep.subr.bf16.mxu1 %v8828_v53  ;;  %8059 = vmatprep.subr.bf16.mxu0 %v8829_v59 }
0x105d   :  { %8038 = vmatpush3.bf16.msra.mxu1 %v8830_v54  ;;  %8060 = vmatpush3.bf16.msra.mxu0 %v8831_v55 }
0x105e   :  { %8039 = vmatprep.subr.bf16.mxu1 %v8832_v56  ;;  %8061 = vmatprep.subr.bf16.mxu0 %v8833_v60 }
0x1061   :  { %8040 = vmatpush3.bf16.msra.mxu1 %v8834_v61  ;;  %8062 = vmatpush3.bf16.msra.mxu0 %v8835_v63 }
0x1062   :  { %8041 = vmatprep.subr.bf16.mxu1 %v8836_v1  ;;  %8063 = vmatprep.subr.bf16.mxu0 %v8837_v2 }
0x1065   :  { %8042 = vmatpush3.bf16.msra.mxu1 %v8838_v6  ;;  %8064 = vmatpush3.bf16.msra.mxu0 %v8839_v7 }
0x1066   :  { %8043 = vmatprep.subr.bf16.mxu1 %v8840_v8  ;;  %8065 = vmatprep.subr.bf16.mxu0 %v8841_v9 }
0x1069   :  { %8044 = vmatpush3.bf16.msra.mxu1 %v8842_v10  ;;  %8066 = vmatpush3.bf16.msra.mxu0 %v8843_v12 }
0x106a   :  { %8045 = vmatprep.subr.bf16.mxu1 %v8844_v13  ;;  %8067 = vmatprep.subr.bf16.mxu0 %v8845_v15 }
0x106d   :  { %8046 = vmatpush3.bf16.msra.mxu1 %v8846_v16  ;;  %8068 = vmatpush3.bf16.msra.mxu0 %v8847_v3 }
0x106e   :  { %8047 = vmatprep.subr.bf16.mxu1 %v8848_v4  ;;  %8069 = vmatprep.subr.bf16.mxu0 %v8849_v17 }
0x1071   :  { %8048 = vmatpush3.bf16.msra.mxu1 %v8850_v25  ;;  %8070 = vmatpush3.bf16.msra.mxu0 %v8851_v29 }
0x1072   :  { %8459 = vmatprep.subr.bf16.mxu1 %v9062_v0  ;;  %8467 = vmatprep.subr.bf16.mxu0 %v9062_v0 }
0x111f   :  { %v8005_v30 = vpop.f32.mrb[60].mxu1  ;;  %v8027_v19 = vpop.f32.mrb[64].mxu0 }
0x1120   :  { %v8006_v31 = vpop.f32.mrb[61].mxu1  ;;  %v8028_v32 = vpop.f32.mrb[65].mxu0 }
0x1121   :  { %v8007_v33 = vadd.f32 %v8006_v31, %v8005_v30  ;;  %v8029_v22 = vadd.f32 %v8028_v32, %v8027_v19  ;;  %v8008_v34 = vpop.f32.mrb[62].mxu1  ;;  %v8030_v36 = vpop.f32.mrb[66].mxu0 }
0x1122   :  { %v8009_v37 = vpop.f32.mrb[63].mxu1  ;;  %v8031_v38 = vpop.f32.mrb[67].mxu0 }
0x1123   :  { %v2807_v41 = vadd.f32 %v8029_v22, %v8007_v33  ;;  %v8010_v44 = vadd.f32 %v8009_v37, %v8008_v34  ;;  %v8032_v45 = vadd.f32 %v8031_v38, %v8030_v36  ;;  %v7341_v34 = vld [vmem:[%s10995_s11] ss:$0 sm:$0xff] }
0x1125   :  { %v2813_v20 = vadd.f32 %v2807_v41, %v9873_v62  ;;  %v2810_v14 = vadd.f32 %v8032_v45, %v8010_v44 }
0x1127   :  { %v2814_v49 = vadd.f32 %v2810_v14, %v9877_v5  ;;  %v2919_v50 = vpop.f32.mrb[64].mxu1  ;;  %v2962_v51 = vpop.f32.mrb[68].mxu0 }
0x1128   :  { %v2920_v52 = vadd.f32 %v2919_v50, %v2828_v46  ;;  %v2963_v21 = vadd.f32 %v2962_v51, %v2836_v18  ;;  %v2921_v23 = vpop.f32.mrb[65].mxu1  ;;  %v2964_v24 = vpop.f32.mrb[69].mxu0 }
0x1129   :  { %v2922_v26 = vadd.f32 %v2921_v23, %v2832_v47  ;;  %v2965_v27 = vadd.f32 %v2964_v24, %v2840_v48  ;;  %v2923_v28 = vpop.f32.mrb[66].mxu1  ;;  %v2966_v53 = vpop.f32.mrb[70].mxu0  ;;  %v8853_v23 = vld [vmem:[%s11047_s29 + $0x18] sm:$0xff]  }
0x112a   :  { %v2924_v59 = vadd.f32 %v2923_v28, %v2828_v46  ;;  %v2967_v54 = vadd.f32 %v2966_v53, %v2836_v18  ;;  %v2925_v62 = vpop.f32.mrb[67].mxu1  ;;  %v2968_v55 = vpop.f32.mrb[71].mxu0  ;;  %v2971_v61 = vmax.f32 %v2920_v52, 0.0  ;;  %v2973_v63 = vmax.f32 %v2963_v21, 0.0 }
0x112b   :  { %v2926_v56 = vadd.f32 %v2925_v62, %v2832_v47  ;;  %v2969_v60 = vadd.f32 %v2968_v55, %v2840_v48  ;;  %v2972_v2 = vmax.f32 %v2922_v26, 0.0  ;;  %v2974_v6 = vmax.f32 %v2965_v27, 0.0  ;;  %v7342_v62 = vld [vmem:[%s10996_s12] ss:$0 sm:$0xff] }
0x112c   :  { %v2975_v1 = vmax.f32 %v2924_v59, 0.0  ;;  %v2977_v5 = vmax.f32 %v2967_v54, 0.0 }
0x112d   :  { %v2976_v7 = vmax.f32 %v2926_v56, 0.0  ;;  %v2978_v8 = vmax.f32 %v2969_v60, 0.0 }
0x112e   :  { %v2979_v9 = vpack.c.bf16 %v2975_v1, %v2971_v61  ;;  %v2981_v10 = vpack.c.bf16 %v2977_v5, %v2973_v63  ;;  %v7343_v63 = vld [vmem:[%s10997_s13] ss:$0 sm:$0xff] }
0x112f   :  { %v2980_v12 = vpack.c.bf16 %v2976_v7, %v2972_v2  ;;  %v2982_v13 = vpack.c.bf16 %v2978_v8, %v2974_v6  ;;  %v7349_v7 = vld [vmem:[%s11049_s26 + $0x1] ss:$0 sm:$0xff]  ;;  %s11055_s26 = smov 64  }
0x1131   :  { %3271 = vmatprep.mubr.bf16.mxu1 %v2980_v12  ;;  %3312 = vmatprep.mubr.bf16.mxu0 %v2982_v13 }
0x1132   :  { %3272 = vmatmul.mubr.bf16.vlgmr.msra.gmra.mrb[68].mxu1 %v2979_v9  ;;  %3313 = vmatmul.mubr.bf16.vlgmr.msra.gmra.mrb[72].mxu0 %v2981_v10 }
0x1133   :  { %8463 = vmatprep.mubr.msk.bf16.mxu1 %vm9063_vm0, %v9062_v0  ;;  %8469 = vmatprep.mubr.msk.bf16.mxu0 %vm9063_vm0, %v9062_v0 }
0x1205   :  { %v8049_v15 = vpop.f32.mrb[68].mxu1  ;;  %v8071_v16 = vpop.f32.mrb[72].mxu0 }
0x1206   :  { %v8050_v3 = vpop.f32.mrb[69].mxu1  ;;  %v8072_v4 = vpop.f32.mrb[73].mxu0 }
0x1207   :  { %v8051_v17 = vadd.f32 %v8050_v3, %v8049_v15  ;;  %v8073_v25 = vadd.f32 %v8072_v4, %v8071_v16  ;;  %v8052_v29 = vpop.f32.mrb[70].mxu1  ;;  %v8074_v30 = vpop.f32.mrb[74].mxu0 }
0x1208   :  { %v8053_v19 = vpop.f32.mrb[71].mxu1  ;;  %v8075_v31 = vpop.f32.mrb[75].mxu0 }
0x1209   :  { %v3315_v32 = vadd.f32 %v8073_v25, %v8051_v17  ;;  %v8054_v33 = vadd.f32 %v8053_v19, %v8052_v29  ;;  %v8076_v22 = vadd.f32 %v8075_v31, %v8074_v30 }
0x120b   :  { %v3321_v36 = vadd.f32 %v3315_v32, %v2813_v20  ;;  %v3318_v11 = vadd.f32 %v8076_v22, %v8054_v33 }
0x120d   :  { %v3322_v37 = vadd.f32 %v3318_v11, %v2814_v49  ;;  %v3330_v38 = vadd.f32 %v7341_v34, %v3321_v36 }
0x120f   :  { %v3332_v41 = vadd.f32 %v3330_v38, %v9476_v57  ;;  %v3331_v44 = vadd.f32 %v7341_v34, %v3322_v37 }
0x1211   :  { %v3336_v45 = vsel %vm100_vm1, %v3332_v41, 0.0  ;;  %v3333_v46 = vadd.f32 %v3331_v44, %v9478_v58  ;;  %v8852_v58 = vld [vmem:[%s11047_s29 + $0x10] sm:$0xff]  }
0x1212   :  { %3337 = vadd.xlane.f32.xlu1 %v3336_v45  ;;  %8460 = vmatpush3.bf16.msra.mxu1 %v8852_v58 }
0x1213   :  { %v3339_v18 = vsel %vm100_vm1, %v3333_v46, 0.0  ;;  %8461 = vmatprep.subr.bf16.mxu1 %v9062_v0 }
0x1214   :  { %3340 = vadd.xlane.f32.xlu0 %v3339_v18 }
0x1216   :  { %8462 = vmatpush3.bf16.msra.mxu1 %v8853_v23 }
0x1217   :  { %8473 = vmatprep.subr.bf16.mxu1 %v9062_v0 }
0x129f   :  { %v3338_v14 = vpop.xlane.xlu1 %3337 }
0x12a0   :  { %v3342_v47 = vmul.f32 0.03125, %v3338_v14 }
0x12a1   :  { %v3341_v48 = vpop.xlane.xlu0 %3340 }
0x12a2   :  { %v3344_v50 = vsub.f32 %v3332_v41, %v3342_v47  ;;  %v3343_v51 = vmul.f32 0.03125, %v3341_v48 }
0x12a4   :  { %v3345_v20 = vsub.f32 %v3333_v46, %v3343_v51  ;;  %v3346_v52 = vmul.f32 %v3344_v50, %v3344_v50 }
0x12a6   :  { %v3348_v49 = vsel %vm100_vm1, %v3346_v52, 0.0  ;;  %v3347_v21 = vmul.f32 %v3345_v20, %v3345_v20 }
0x12a7   :  { %3349 = vadd.xlane.f32.xlu1 %v3348_v49 }
0x12a8   :  { %v3351_v57 = vsel %vm100_vm1, %v3347_v21, 0.0 }
0x12a9   :  { %3352 = vadd.xlane.f32.xlu0 %v3351_v57 }
0x1334   :  { %v3350_v24 = vpop.xlane.xlu1 %3349 }
0x1335   :  { %v3354_v26 = vmul.f32 0.03125, %v3350_v24 }
0x1336   :  { %v3353_v27 = vpop.xlane.xlu0 %3352 }
0x1337   :  { %v3356_v28 = vadd.f32 1e-05, %v3354_v26  ;;  %v3355_v53 = vmul.f32 0.03125, %v3353_v27 }
0x1339   :  { %9018 = vrsqrt.f32 %v3356_v28  ;;  %v3357_v59 = vadd.f32 1e-05, %v3355_v53 }
0x133b   :  { %9020 = vrsqrt.f32 %v3357_v59 }
0x1343   :  { %v9019_v54 = vpop.eup %9018 }
0x1344   :  { %v3360_v55 = vmul.f32 %v9019_v54, %v3344_v50 }
0x1345   :  { %v9021_v56 = vpop.eup %9020 }
0x1346   :  { %v3368_v60 = vmul.f32 %v7342_v62, %v3360_v55  ;;  %v3361_v61 = vmul.f32 %v9021_v56, %v3345_v20 }
0x1348   :  { %v3369_v1 = vmul.f32 %v7342_v62, %v3361_v61  ;;  %v10037_v5 = vadd.f32 %v7343_v63, %v3368_v60 }
0x134a   :  { %v10039_v2 = vadd.f32 %v7343_v63, %v3369_v1 }
0x134c   :  { %v3378_v6 = vpack.c.bf16 %v10039_v2, %v10037_v5 }
0x134e   :  { %8464 = vmatmul.mubr.msk.bf16.vlgmr.msra.gmra.mrb[72].mxu1 %vm100_vm1, %v3378_v6 }
0x134f   :  { %8475 = vmatprep.mubr.msk.bf16.mxu1 %vm9063_vm0, %v9062_v0 }
0x1421   :  { %v3441_v8 = vpop.f32.mrb[72].mxu1 }
0x1422   :  { %v3442_v9 = vadd.f32 %v7349_v7, %v3441_v8  ;;  %v8465_v10 = vpop.f32.mrb[73].mxu1 }
0x1423   :  { %v3444_v12 = vpop.f32.mrb[74].mxu1 }
0x1424   :  { %v10049_v13 = vpack.c.bf16 %v3442_v9, %v3442_v9  ;;  %v3445_v15 = vadd.f32 %v7349_v7, %v3444_v12  ;;  %v8466_v16 = vpop.f32.mrb[75].mxu1 }
0x1426   :  { %v10051_v3 = vpack.c.bf16 %v3445_v15, %v3445_v15  ;;  %3451 = vrot.lane.b32.xlu1 %v10049_v13, %s11054_s0 }
0x1428   :  { %3500 = vrot.lane.b32.xlu0 %v10051_v3, %s11054_s0 }
0x1498   :  { %v3452_v4 = vpop.permute.xlu1 %3451 }
0x1499   :  { %v3457_v17 = vsel %vm150_vm2, %v3452_v4, 0 }
0x149a   :  { %8468 = vmatpush3.bf16.xpose.msra.mxu0 %v3457_v17  ;;  %v3501_v25 = vpop.permute.xlu0 %3500 }
0x149b   :  { %v3506_v29 = vsel %vm150_vm2, %v3501_v25, 0  ;;  %8479 = vmatprep.subr.bf16.mxu0 %v9062_v0 }
0x149c   :  { %8474 = vmatpush3.bf16.xpose.msra.mxu1 %v3506_v29 }
0x149d   :  { %8485 = vmatprep.subr.bf16.mxu1 %v9062_v0 }
0x14a1   :  { %8470 = vmatmul.mubr.msk.bf16.vlgmr.msra.gmra.mrb[76].mxu0 %vm150_vm2, %v10049_v13 }
0x14a2   :  { %8481 = vmatprep.mubr.msk.bf16.mxu0 %vm9063_vm0, %v9062_v0 }
0x14a3   :  { %8476 = vmatmul.mubr.msk.bf16.vlgmr.msra.gmra.mrb[76].mxu1 %vm150_vm2, %v10051_v3 }
0x14a4   :  { %8487 = vmatprep.mubr.msk.bf16.mxu1 %vm9063_vm0, %v9062_v0 }
0x1574   :  { %v3493_v30 = vpop.f32.mrb[76].mxu0 }
0x1575   :  { %v3548_v19 = vmul.f32 0.35355338, %v3493_v30  ;;  %v8471_v31 = vpop.f32.mrb[77].mxu0 }
0x1576   :  { %v3496_v32 = vpop.f32.mrb[78].mxu0  ;;  %v3542_v33 = vpop.f32.mrb[76].mxu1 }
0x1577   :  { %v3549_v22 = vmul.f32 0.35355338, %v3542_v33  ;;  %v8472_v34 = vpop.f32.mrb[79].mxu0  ;;  %v8477_v36 = vpop.f32.mrb[77].mxu1  ;;  %v3550_v11 = vsel %vm150_vm2, %v3548_v19, -inf }
0x1578   :  { %3551 = vmax.xlane.f32.xlu1 %v3550_v11  ;;  %v3545_v37 = vpop.f32.mrb[78].mxu1 }
0x1579   :  { %v8478_v38 = vpop.f32.mrb[79].mxu1  ;;  %v3553_v41 = vsel %vm150_vm2, %v3549_v22, -inf }
0x157a   :  { %3554 = vmax.xlane.f32.xlu0 %v3553_v41 }
0x1589   :  { %3574 = vrot.lane.b32.xlu1 %v10049_v13, %s11055_s26 }
0x1605   :  { %v3552_v44 = vpop.xlane.xlu1 %3551 }
0x1606   :  { %v3556_v45 = vsub.f32 %v3548_v19, %v3552_v44 }
0x1607   :  { %v3555_v46 = vpop.xlane.xlu0 %3554 }
0x1608   :  { %v3558_v18 = vmul.f32 1.442695, %v3556_v45  ;;  %v3557_v14 = vsub.f32 %v3549_v22, %v3555_v46 }
0x1609   :  { %v3575_v47 = vpop.permute.xlu1 %3574 }
0x160a   :  { %9022 = vpow2.f32 %v3558_v18  ;;  %v3560_v48 = vmul.f32 1.442695, %v3557_v14  ;;  %v3580_v50 = vsel %vm277_vm3, %v3575_v47, 0 }
0x160b   :  { %8480 = vmatpush3.bf16.msra.mxu0 %v3580_v50 }
0x160c   :  { %9024 = vpow2.f32 %v3560_v48  ;;  %8491 = vmatprep.subr.bf16.mxu0 %v9062_v0 }
0x1614   :  { %v9023_v51 = vpop.eup %9022 }
0x1615   :  { %v3562_v20 = vsel %vm150_vm2, %v9023_v51, 0.0 }
0x1616   :  { %v9025_v52 = vpop.eup %9024  ;;  %3563 = vadd.xlane.f32.xlu1 %v3562_v20 }
0x1617   :  { %v3565_v49 = vsel %vm150_vm2, %v9025_v52, 0.0 }
0x1618   :  { %3566 = vadd.xlane.f32.xlu0 %v3565_v49 }
0x1627   :  { %3675 = vrot.lane.b32.xlu1 %v10049_v13, %s11056_s10 }
0x162b   :  { %3725 = vrot.lane.b32.xlu1 %v10051_v3, %s11056_s10  ;;  %s11064_s10 = smov 40  }
0x162e   :  { %3622 = vrot.lane.b32.xlu0 %v10051_v3, %s11055_s26 }
0x162f   :  { %3723 = vrot.lane.b32.xlu1 %v10051_v3, %s11057_s27 }
0x1632   :  { %3673 = vrot.lane.b32.xlu0 %v10049_v13, %s11057_s27 }
0x16a3   :  { %v3564_v21 = vpop.xlane.xlu1 %3563 }
0x16a4   :  { %9026 = vrcp.f32 %v3564_v21  ;;  %v7362_v21 = vld [vmem:[%s11050_s8 + $0x14] sm:$0xf] }
0x16a5   :  { %v3567_v57 = vpop.xlane.xlu0 %3566 }
0x16a6   :  { %9028 = vrcp.f32 %v3567_v57 }
0x16a7   :  { %v3676_v24 = vpop.permute.xlu1 %3675 }
0x16a8   :  { %v3681_v62 = vsel %vm150_vm2, %v3676_v24, 0 }
0x16a9   :  { %v3623_v58 = vpop.permute.xlu0 %3622 }
0x16aa   :  { %v3628_v23 = vsel %vm277_vm3, %v3623_v58, 0 }
0x16ab   :  { %8486 = vmatpush3.bf16.msra.mxu1 %v3628_v23  ;;  %v3726_v54 = vpop.permute.xlu1 %3725  ;;  %v3901_v23 = vsel %vm277_vm3, %v7362_v21, 0 }
0x16ac   :  { %8497 = vmatprep.subr.bf16.mxu1 %v9062_v0  ;;  %v3731_v56 = vsel %vm150_vm2, %v3726_v54, 0 }
0x16ad   :  { %v3674_v60 = vpop.permute.xlu0 %3673 }
0x16ae   :  { %v9027_v26 = vpop.eup %9026 }
0x16af   :  { %v3570_v27 = vmul.f32 %v9027_v26, %v9023_v51  ;;  %v3724_v61 = vpop.permute.xlu1 %3723  ;;  %v7357_v26 = vld [vmem:[%s11050_s8 + $0x10] sm:$0xf] }
0x16b0   :  { %v9029_v28 = vpop.eup %9028 }
0x16b1   :  { %v3571_v53 = vmul.f32 %v9029_v28, %v9025_v52  ;;  %v3572_v59 = vpack.c.bf16 %v3570_v27, %v3570_v27 }
0x16b3   :  { %8482 = vmatmul.mubr.msk.bf16.vlgmr.msra.gmra.mrb[80].mxu0 %vm150_vm2, %v3572_v59  ;;  %v3573_v55 = vpack.c.bf16 %v3571_v53, %v3571_v53  ;;  %v3948_v53 = vsel %vm277_vm3, %v7357_v26, 0 }
0x16b4   :  { %8492 = vmatpush3.bf16.xpose.msra.mxu0 %v3681_v62  ;;  %8493 = vmatprep.mubr.msk.bf16.mxu0 %vm9063_vm0, %v9062_v0 }
0x16b5   :  { %8488 = vmatmul.mubr.msk.bf16.vlgmr.msra.gmra.mrb[80].mxu1 %vm150_vm2, %v3573_v55  ;;  %8503 = vmatprep.subr.bf16.mxu0 %v9062_v0 }
0x16b6   :  { %8498 = vmatpush3.bf16.xpose.msra.mxu1 %v3731_v56  ;;  %8499 = vmatprep.mubr.msk.bf16.mxu1 %vm9063_vm0, %v9062_v0 }
0x16b7   :  { %8509 = vmatprep.subr.bf16.mxu1 %v9062_v0 }
0x16bb   :  { %8494 = vmatmul.mubr.msk.bf16.vlgmr.msra.gmra.mrb[84].mxu0 %vm150_vm2, %v3674_v60 }
0x16bc   :  { %8505 = vmatprep.mubr.msk.bf16.mxu0 %vm9063_vm0, %v9062_v0 }
0x16bd   :  { %8500 = vmatmul.mubr.msk.bf16.vlgmr.msra.gmra.mrb[84].mxu1 %vm150_vm2, %v3724_v61 }
0x16be   :  { %8511 = vmatprep.mubr.msk.bf16.mxu1 %vm9063_vm0, %v9062_v0 }
0x1786   :  { %v10105_v63 = vpop.f32.mrb[80].mxu0 }
0x1787   :  { %v8483_v1 = vpop.f32.mrb[81].mxu0 }
0x1788   :  { %v3619_v6 = vpop.f32.mrb[82].mxu0  ;;  %v10107_v7 = vpop.f32.mrb[80].mxu1 }
0x1789   :  { %v3670_v8 = vpack.c.bf16 %v10107_v7, %v10105_v63  ;;  %v8484_v9 = vpop.f32.mrb[83].mxu0  ;;  %v8489_v10 = vpop.f32.mrb[81].mxu1 }
0x178a   :  { %v3667_v12 = vpop.f32.mrb[82].mxu1 }
0x178b   :  { %v8490_v15 = vpop.f32.mrb[83].mxu1 }
0x178e   :  { %v3717_v16 = vpop.f32.mrb[84].mxu0 }
0x178f   :  { %v3773_v4 = vmul.f32 0.35355338, %v3717_v16  ;;  %v8495_v17 = vpop.f32.mrb[85].mxu0 }
0x1790   :  { %v3720_v25 = vpop.f32.mrb[86].mxu0  ;;  %v3767_v29 = vpop.f32.mrb[84].mxu1 }
0x1791   :  { %v3774_v30 = vmul.f32 0.35355338, %v3767_v29  ;;  %v8496_v19 = vpop.f32.mrb[87].mxu0  ;;  %v8501_v31 = vpop.f32.mrb[85].mxu1  ;;  %v3775_v32 = vsel %vm150_vm2, %v3773_v4, -inf }
0x1792   :  { %3776 = vmax.xlane.f32.xlu0 %v3775_v32  ;;  %v3770_v33 = vpop.f32.mrb[86].mxu1 }
0x1793   :  { %v8502_v22 = vpop.f32.mrb[87].mxu1  ;;  %v3778_v34 = vsel %vm150_vm2, %v3774_v30, -inf }
0x1794   :  { %3779 = vmax.xlane.f32.xlu1 %v3778_v34 }
0x17a5   :  { %3799 = vrot.lane.b32.xlu1 %v10049_v13, %s11058_s19 }
0x17a9   :  { %3993 = vrot.lane.b32.xlu1 %v10049_v13, %s11059_s21 }
0x17ad   :  { %4043 = vrot.lane.b32.xlu1 %v10051_v3, %s11059_s21 }
0x17b1   :  { %4041 = vrot.lane.b32.xlu1 %v10051_v3, %s11060_s22 }
0x181f   :  { %v3777_v36 = vpop.xlane.xlu0 %3776 }
0x1820   :  { %v3781_v11 = vsub.f32 %v3773_v4, %v3777_v36 }
0x1821   :  { %v3780_v37 = vpop.xlane.xlu1 %3779 }
0x1822   :  { %v3783_v38 = vmul.f32 1.442695, %v3781_v11  ;;  %v3782_v41 = vsub.f32 %v3774_v30, %v3780_v37 }
0x1824   :  { %9030 = vpow2.f32 %v3783_v38  ;;  %v3785_v44 = vmul.f32 1.442695, %v3782_v41 }
0x1825   :  { %v3800_v45 = vpop.permute.xlu1 %3799 }
0x1826   :  { %9032 = vpow2.f32 %v3785_v44  ;;  %v3805_v46 = vsel %vm277_vm3, %v3800_v45, 0 }
0x1827   :  { %8504 = vmatpush3.bf16.msra.mxu0 %v3805_v46 }
0x1828   :  { %8515 = vmatprep.subr.bf16.mxu0 %v9062_v0 }
0x1829   :  { %v3994_v59 = vpop.permute.xlu1 %3993 }
0x182a   :  { %v3999_v9 = vsel %vm150_vm2, %v3994_v59, 0 }
0x182d   :  { %v4044_v54 = vpop.permute.xlu1 %4043 }
0x182e   :  { %v9031_v18 = vpop.eup %9030  ;;  %v4049_v62 = vsel %vm150_vm2, %v4044_v54, 0 }
0x182f   :  { %v3787_v14 = vsel %vm150_vm2, %v9031_v18, 0.0 }
0x1830   :  { %v9033_v47 = vpop.eup %9032  ;;  %3788 = vadd.xlane.f32.xlu0 %v3787_v14 }
0x1831   :  { %v3790_v48 = vsel %vm150_vm2, %v9033_v47, 0.0  ;;  %v4042_v55 = vpop.permute.xlu1 %4041 }
0x1834   :  { %3791 = vadd.xlane.f32.xlu0 %v3790_v48 }
0x184a   :  { %3847 = vrot.lane.b32.xlu0 %v10051_v3, %s11058_s19 }
0x184e   :  { %3991 = vrot.lane.b32.xlu0 %v10049_v13, %s11060_s22  ;;  %s11065_s22 = sld [smem:[#allocation10_spill]] }
0x18bd   :  { %v3789_v50 = vpop.xlane.xlu0 %3788 }
0x18be   :  { %9034 = vrcp.f32 %v3789_v50 }
0x18c1   :  { %v3792_v51 = vpop.xlane.xlu0 %3791 }
0x18c2   :  { %9036 = vrcp.f32 %v3792_v51 }
0x18c5   :  { %v3848_v20 = vpop.permute.xlu0 %3847 }
0x18c6   :  { %v3853_v52 = vsel %vm277_vm3, %v3848_v20, 0 }
0x18c7   :  { %8510 = vmatpush3.bf16.msra.mxu1 %v3853_v52 }
0x18c8   :  { %v9035_v49 = vpop.eup %9034  ;;  %8521 = vmatprep.subr.bf16.mxu1 %v9062_v0 }
0x18c9   :  { %v3795_v57 = vmul.f32 %v9035_v49, %v9031_v18  ;;  %v3992_v16 = vpop.permute.xlu0 %3991 }
0x18cb   :  { %v3797_v58 = vpack.c.bf16 %v3795_v57, %v3795_v57 }
0x18cc   :  { %v9037_v24 = vpop.eup %9036 }
0x18cd   :  { %v3796_v27 = vmul.f32 %v9037_v24, %v9033_v47  ;;  %8506 = vmatmul.mubr.msk.bf16.vlgmr.msra.gmra.mrb[88].mxu0 %vm150_vm2, %v3797_v58 }
0x18ce   :  { %8516 = vmatpush3.bf16.msra.mxu0 %v3901_v23  ;;  %8517 = vmatprep.mubr.msk.bf16.mxu0 %vm9063_vm0, %v9062_v0 }
0x18cf   :  { %v3798_v28 = vpack.c.bf16 %v3796_v27, %v3796_v27  ;;  %8527 = vmatprep.subr.bf16.mxu0 %v9062_v0 }
0x18d1   :  { %8512 = vmatmul.mubr.msk.bf16.vlgmr.msra.gmra.mrb[88].mxu1 %vm150_vm2, %v3798_v28 }
0x18d2   :  { %8522 = vmatpush3.bf16.msra.mxu1 %v3948_v53  ;;  %8523 = vmatprep.mubr.msk.bf16.mxu1 %vm9063_vm0, %v9062_v0 }
0x18d3   :  { %8533 = vmatprep.subr.bf16.mxu1 %v9062_v0 }
0x18d9   :  { %8524 = vmatmul.mubr.msk.bf16.vlgmr.msra.gmra.mrb[92].mxu1 %vm150_vm2, %v3670_v8 }
0x18da   :  { %8535 = vmatprep.mubr.msk.bf16.mxu1 %vm9063_vm0, %v9062_v0 }
0x18db   :  { %8534 = vmatpush3.bf16.xpose.msra.mxu1 %v4049_v62 }
0x18dc   :  { %8545 = vmatprep.subr.bf16.mxu1 %v9062_v0 }
0x18e2   :  { %8536 = vmatmul.mubr.msk.bf16.vlgmr.msra.gmra.mrb[96].mxu1 %vm150_vm2, %v4042_v55 }
0x18e3   :  { %8547 = vmatprep.mubr.msk.bf16.mxu1 %vm9063_vm0, %v9062_v0 }
0x19a0   :  { %v3841_v56 = vpop.f32.mrb[88].mxu0 }
0x19a1   :  { %v8507_v60 = vpop.f32.mrb[89].mxu0 }
0x19a2   :  { %v3844_v61 = vpop.f32.mrb[90].mxu0 }
0x19a3   :  { %v8508_v63 = vpop.f32.mrb[91].mxu0 }
0x19a4   :  { %v3889_v1 = vpop.f32.mrb[88].mxu1 }
0x19a5   :  { %v3895_v6 = vpack.c.bf16 %v3889_v1, %v3841_v56  ;;  %v8513_v7 = vpop.f32.mrb[89].mxu1  ;;  %v7369_v1 = vld [vmem:[%s11050_s8 + $0x18] sm:$0xf] }
0x19a6   :  { %v3892_v8 = vpop.f32.mrb[90].mxu1 }
0x19a7   :  { %v8514_v10 = vpop.f32.mrb[91].mxu1  ;;  %8518 = vmatmul.mubr.msk.bf16.vlgmr.msra.gmra.mrb[92].mxu0 %vm150_vm2, %v3895_v6  ;;  %v4219_v6 = vsel %vm277_vm3, %v7369_v1, 0 }
0x19a8   :  { %8528 = vmatpush3.bf16.xpose.msra.mxu0 %v3999_v9  ;;  %8529 = vmatprep.mubr.msk.bf16.mxu0 %vm9063_vm0, %v9062_v0 }
0x19a9   :  { %8539 = vmatprep.subr.bf16.mxu0 %v9062_v0 }
0x19ac   :  { %v3984_v12 = vpop.f32.mrb[92].mxu1 }
0x19ad   :  { %v8525_v15 = vpop.f32.mrb[93].mxu1 }
0x19ae   :  { %v3987_v4 = vpop.f32.mrb[94].mxu1 }
0x19af   :  { %v8526_v17 = vpop.f32.mrb[95].mxu1  ;;  %8530 = vmatmul.mubr.msk.bf16.vlgmr.msra.gmra.mrb[96].mxu0 %vm150_vm2, %v3992_v16 }
0x19b0   :  { %8541 = vmatprep.mubr.msk.bf16.mxu0 %vm9063_vm0, %v9062_v0 }
0x19b5   :  { %v4085_v25 = vpop.f32.mrb[96].mxu1 }
0x19b6   :  { %v4092_v29 = vmul.f32 0.35355338, %v4085_v25  ;;  %v8537_v30 = vpop.f32.mrb[97].mxu1 }
0x19b7   :  { %v4088_v19 = vpop.f32.mrb[98].mxu1 }
0x19b8   :  { %v8538_v31 = vpop.f32.mrb[99].mxu1  ;;  %v4096_v32 = vsel %vm150_vm2, %v4092_v29, -inf }
0x19b9   :  { %4097 = vmax.xlane.f32.xlu1 %v4096_v32 }
0x19ca   :  { %4117 = vrot.lane.b32.xlu1 %v10049_v13, %s11061_s2 }
0x19ce   :  { %4266 = vrot.lane.b32.xlu1 %v10049_v13, %s11062_s4 }
0x19d2   :  { %4316 = vrot.lane.b32.xlu1 %v10051_v3, %s11062_s4 }
0x19d6   :  { %4314 = vrot.lane.b32.xlu1 %v10051_v3, %s11063_s28 }
0x1a46   :  { %v4098_v33 = vpop.xlane.xlu1 %4097 }
0x1a47   :  { %v4100_v36 = vsub.f32 %v4092_v29, %v4098_v33 }
0x1a49   :  { %v4103_v11 = vmul.f32 1.442695, %v4100_v36 }
0x1a4a   :  { %v4118_v22 = vpop.permute.xlu1 %4117 }
0x1a4b   :  { %v4123_v34 = vsel %vm277_vm3, %v4118_v22, 0  ;;  %9038 = vpow2.f32 %v4103_v11 }
0x1a4c   :  { %8540 = vmatpush3.bf16.msra.mxu0 %v4123_v34 }
0x1a4d   :  { %8551 = vmatprep.subr.bf16.mxu0 %v9062_v0 }
0x1a4e   :  { %v4267_v55 = vpop.permute.xlu1 %4266 }
0x1a4f   :  { %v4272_v60 = vsel %vm150_vm2, %v4267_v55, 0 }
0x1a55   :  { %v9039_v20 = vpop.eup %9038 }
0x1a56   :  { %v4108_v52 = vsel %vm150_vm2, %v9039_v20, 0.0 }
0x1a7a   :  { %v3937_v37 = vpop.f32.mrb[92].mxu0 }
0x1a7b   :  { %v10177_v38 = vadd.f32 %v3984_v12, %v3937_v37  ;;  %v8519_v41 = vpop.f32.mrb[93].mxu0  ;;  %v4317_v12 = vpop.permute.xlu1 %4316 }
0x1a7c   :  { %v3940_v44 = vpop.f32.mrb[94].mxu0  ;;  %v4322_v25 = vsel %vm150_vm2, %v4317_v12, 0 }
0x1a7d   :  { %v10179_v45 = vadd.f32 %v3987_v4, %v3940_v44  ;;  %v8520_v46 = vpop.f32.mrb[95].mxu0 }
0x1a7f   :  { %v4315_v34 = vpop.permute.xlu1 %4314 }
0x1a82   :  { %v4035_v18 = vpop.f32.mrb[96].mxu0 }
0x1a83   :  { %v4091_v14 = vmul.f32 0.35355338, %v4035_v18  ;;  %v8531_v47 = vpop.f32.mrb[97].mxu0 }
0x1a84   :  { %v4038_v48 = vpop.f32.mrb[98].mxu0 }
0x1a85   :  { %v8532_v50 = vpop.f32.mrb[99].mxu0  ;;  %v4093_v51 = vsel %vm150_vm2, %v4091_v14, -inf }
0x1a86   :  { %4094 = vmax.xlane.f32.xlu0 %v4093_v51 }
0x1a8a   :  { %4109 = vadd.xlane.f32.xlu0 %v4108_v52 }
0x1b13   :  { %v4095_v49 = vpop.xlane.xlu0 %4094 }
0x1b14   :  { %v4099_v21 = vsub.f32 %v4091_v14, %v4095_v49 }
0x1b16   :  { %v4101_v57 = vmul.f32 1.442695, %v4099_v21 }
0x1b17   :  { %v4110_v24 = vpop.xlane.xlu0 %4109 }
0x1b18   :  { %9040 = vpow2.f32 %v4101_v57 }
0x1b19   :  { %9042 = vrcp.f32 %v4110_v24 }
0x1b22   :  { %v9041_v58 = vpop.eup %9040 }
0x1b23   :  { %v4105_v23 = vsel %vm150_vm2, %v9041_v58, 0.0  ;;  %v9043_v26 = vpop.eup %9042 }
0x1b24   :  { %4106 = vadd.xlane.f32.xlu0 %v4105_v23  ;;  %v4114_v28 = vmul.f32 %v9043_v26, %v9039_v20 }
0x1b26   :  { %v4116_v54 = vpack.c.bf16 %v4114_v28, %v4114_v28 }
0x1b3a   :  { %4165 = vrot.lane.b32.xlu0 %v10051_v3, %s11061_s2 }
0x1b3e   :  { %4264 = vrot.lane.b32.xlu0 %v10049_v13, %s11063_s28 }
0x1bb1   :  { %v4107_v27 = vpop.xlane.xlu0 %4106 }
0x1bb2   :  { %9044 = vrcp.f32 %v4107_v27 }
0x1bb5   :  { %v4166_v53 = vpop.permute.xlu0 %4165 }
0x1bb6   :  { %v4171_v59 = vsel %vm277_vm3, %v4166_v53, 0 }
0x1bb7   :  { %8546 = vmatpush3.bf16.msra.mxu1 %v4171_v59 }
0x1bb8   :  { %8557 = vmatprep.subr.bf16.mxu1 %v9062_v0 }
0x1bb9   :  { %v4265_v63 = vpop.permute.xlu0 %4264 }
0x1bba   :  { %8548 = vmatmul.mubr.msk.bf16.vlgmr.msra.gmra.mrb[100].mxu1 %vm150_vm2, %v4116_v54  ;;  %v7375_v54 = vld [vmem:[%s11050_s8 + $0x1c] sm:$0xf] }
0x1bbb   :  { %8559 = vmatprep.mubr.msk.bf16.mxu1 %vm9063_vm0, %v9062_v0 }
0x1bbc   :  { %v9045_v62 = vpop.eup %9044 }
0x1bbd   :  { %v4113_v56 = vmul.f32 %v9045_v62, %v9041_v58  ;;  %v4492_v62 = vsel %vm277_vm3, %v7375_v54, 0  ;;  %v7467_v54 = vld [vmem:[%s11052_s23 + $0x118] sm:$0xff] }
0x1bbf   :  { %v4115_v61 = vpack.c.bf16 %v4113_v56, %v4113_v56 }
0x1bc0   :  { %8558 = vmatpush3.bf16.xpose.msra.mxu1 %v4272_v60 }
0x1bc1   :  { %8542 = vmatmul.mubr.msk.bf16.vlgmr.msra.gmra.mrb[100].mxu0 %vm150_vm2, %v4115_v61  ;;  %8569 = vmatprep.subr.bf16.mxu1 %v9062_v0 }
0x1bc2   :  { %8553 = vmatprep.mubr.msk.bf16.mxu0 %vm9063_vm0, %v9062_v0  ;;  %8552 = vmatpush3.bf16.msra.mxu0 %v4219_v6 }
0x1bc3   :  { %8563 = vmatprep.subr.bf16.mxu0 %v9062_v0 }
0x1bc7   :  { %8560 = vmatmul.mubr.msk.bf16.vlgmr.msra.gmra.mrb[104].mxu1 %vm150_vm2, %v4265_v63 }
0x1bc8   :  { %8571 = vmatprep.mubr.msk.bf16.mxu1 %vm9063_vm0, %v9062_v0 }
0x1c8d   :  { %v4207_v7 = vpop.f32.mrb[100].mxu1 }
0x1c8e   :  { %v8549_v8 = vpop.f32.mrb[101].mxu1 }
0x1c8f   :  { %v4210_v9 = vpop.f32.mrb[102].mxu1 }
0x1c90   :  { %v8550_v10 = vpop.f32.mrb[103].mxu1 }
0x1c94   :  { %v4159_v15 = vpop.f32.mrb[100].mxu0 }
0x1c95   :  { %v4213_v16 = vpack.c.bf16 %v4207_v7, %v4159_v15  ;;  %v8543_v4 = vpop.f32.mrb[101].mxu0 }
0x1c96   :  { %v4162_v17 = vpop.f32.mrb[102].mxu0 }
0x1c97   :  { %v8544_v29 = vpop.f32.mrb[103].mxu0  ;;  %8554 = vmatmul.mubr.msk.bf16.vlgmr.msra.gmra.mrb[104].mxu0 %vm150_vm2, %v4213_v16  ;;  %v7378_v17 = vld [vmem:[%s11051_s24 + $0x1] ss:$0 sm:$0xff] }
0x1c98   :  { %8564 = vmatpush3.bf16.xpose.msra.mxu0 %v4322_v25  ;;  %8565 = vmatprep.mubr.msk.bf16.mxu0 %vm9063_vm0, %v9062_v0 }
0x1c99   :  { %8575 = vmatprep.subr.bf16.mxu0 %v9062_v0 }
0x1c9a   :  { %v4308_v30 = vpop.f32.mrb[104].mxu1 }
0x1c9b   :  { %v4364_v19 = vmul.f32 0.35355338, %v4308_v30  ;;  %v8561_v31 = vpop.f32.mrb[105].mxu1 }
0x1c9c   :  { %v4311_v32 = vpop.f32.mrb[106].mxu1 }
0x1c9d   :  { %v8562_v33 = vpop.f32.mrb[107].mxu1  ;;  %v4366_v22 = vsel %vm150_vm2, %v4364_v19, -inf }
0x1c9e   :  { %4367 = vmax.xlane.f32.xlu0 %v4366_v22 }
0x1c9f   :  { %8566 = vmatmul.mubr.msk.bf16.vlgmr.msra.gmra.mrb[108].mxu0 %vm150_vm2, %v4315_v34 }
0x1ca0   :  { %8577 = vmatprep.mubr.msk.bf16.mxu0 %vm9063_vm0, %v9062_v0 }
0x1d2b   :  { %v4368_v36 = vpop.xlane.xlu0 %4367 }
0x1d2c   :  { %v4372_v11 = vsub.f32 %v4364_v19, %v4368_v36 }
0x1d2e   :  { %v4374_v37 = vmul.f32 1.442695, %v4372_v11 }
0x1d30   :  { %9046 = vpow2.f32 %v4374_v37 }
0x1d3a   :  { %v9047_v41 = vpop.eup %9046 }
0x1d3b   :  { %v4378_v44 = vsel %vm150_vm2, %v9047_v41, 0.0 }
0x1d3c   :  { %4379 = vadd.xlane.f32.xlu0 %v4378_v44 }
0x1d6a   :  { %v4255_v46 = vpop.f32.mrb[104].mxu0 }
0x1d6b   :  { %v4262_v18 = vadd.f32 %v4255_v46, %v10177_v38  ;;  %v8555_v14 = vpop.f32.mrb[105].mxu0 }
0x1d6c   :  { %v4258_v47 = vpop.f32.mrb[106].mxu0 }
0x1d6d   :  { %v4263_v48 = vadd.f32 %v4258_v47, %v10179_v45  ;;  %v8556_v50 = vpop.f32.mrb[107].mxu0 }
0x1d72   :  { %v4358_v51 = vpop.f32.mrb[108].mxu0 }
0x1d73   :  { %v4365_v20 = vmul.f32 0.35355338, %v4358_v51  ;;  %v8567_v52 = vpop.f32.mrb[109].mxu0  ;;  %v7385_v51 = vld [vmem:[%s11052_s23 + $0x140] sm:$0xff] }
0x1d74   :  { %v4361_v49 = vpop.f32.mrb[110].mxu0 }
0x1d75   :  { %v8568_v21 = vpop.f32.mrb[111].mxu0  ;;  %v4369_v57 = vsel %vm150_vm2, %v4365_v20, -inf  ;;  %v7386_v49 = vld [vmem:[%s11052_s23 + $0x148] sm:$0xff] }
0x1d76   :  { %4370 = vmax.xlane.f32.xlu1 %v4369_v57 }
0x1d87   :  { %4390 = vrot.lane.b32.xlu1 %v10049_v13, %s11064_s10 }
0x1dc9   :  { %v4380_v58 = vpop.xlane.xlu0 %4379 }
0x1dca   :  { %9048 = vrcp.f32 %v4380_v58 }
0x1dd4   :  { %v9049_v23 = vpop.eup %9048 }
0x1dd5   :  { %v4386_v26 = vmul.f32 %v9049_v23, %v9047_v41  ;;  %v7387_v23 = vld [vmem:[%s11052_s23 + $0x180] sm:$0xff] }
0x1dd7   :  { %v4388_v53 = vpack.c.bf16 %v4386_v26, %v4386_v26 }
0x1e03   :  { %v4371_v38 = vpop.xlane.xlu1 %4370 }
0x1e04   :  { %v4373_v24 = vsub.f32 %v4365_v20, %v4371_v38  ;;  %v7384_v20 = vld [vmem:[%s11052_s23 + $0x108] sm:$0xff]  ;;  %v7389_v38 = vld [vmem:[%s11052_s23 + $0x1c0] sm:$0xff] }
0x1e05   :  { %v7394_v57 = vcombine.low %v7384_v20, %v7386_v49  ;;  %v7395_v58 = vcombine.high %v7384_v20, %v7386_v49  ;;  %v7397_v26 = vcombine.high %v7387_v23, %v7389_v38  ;;  %v8865_v20 = vld [vmem:[%s11053_s5 + $0x590] sm:$0xff]   ;;  %v8867_v49 = vld [vmem:[%s11053_s5 + $0x5d8] sm:$0xff]  }
0x1e06   :  { %v4376_v27 = vmul.f32 1.442695, %v4373_v24  ;;  %v7388_v24 = vld [vmem:[%s11052_s23 + $0x188] sm:$0xff] }
0x1e07   :  { %v4391_v45 = vpop.permute.xlu1 %4390 }
0x1e08   :  { %9050 = vpow2.f32 %v4376_v27  ;;  %v4396_v28 = vsel %vm277_vm3, %v4391_v45, 0  ;;  %v7390_v27 = vld [vmem:[%s11052_s23 + $0x1c8] sm:$0xff]  ;;  %v7396_v45 = vcombine.low %v7387_v23, %v7389_v38  ;;  %v8871_v23 = vld [vmem:[%s11053_s5 + $0x5e0] sm:$0xff]  }
0x1e09   :  { %8570 = vmatpush3.bf16.msra.mxu1 %v4396_v28  ;;  %v7398_v28 = vcombine.low %v7388_v24, %v7390_v27  ;;  %v8872_v38 = vld [vmem:[%s11053_s5 + $0x520] sm:$0xff]  }
0x1e0a   :  { %8581 = vmatprep.subr.bf16.mxu1 %v9062_v0 }
0x1e0c   :  { %8572 = vmatmul.mubr.msk.bf16.vlgmr.msra.gmra.mrb[108].mxu1 %vm150_vm2, %v4388_v53  ;;  %v7399_v53 = vcombine.high %v7388_v24, %v7390_v27  ;;  %v8873_v24 = vld [vmem:[%s11053_s5 + $0x5a0] sm:$0xff]   ;;  %v8875_v27 = vld [vmem:[%s11053_s5 + $0x5e8] sm:$0xff]  }
0x1e0d   :  { %8583 = vmatprep.mubr.msk.bf16.mxu1 %vm9063_vm0, %v9062_v0  ;;  %8582 = vmatpush3.bf16.msra.mxu1 %v4492_v62 }
0x1e0e   :  { %4714 = vmatprep.subr.bf16.mxu1 %v7395_v58  ;;  %v8870_v58 = vld [vmem:[%s11053_s5 + $0x560] sm:$0xff]  }
0x1e12   :  { %v9051_v13 = vpop.eup %9050 }
0x1e13   :  { %v4381_v59 = vsel %vm150_vm2, %v9051_v13, 0.0 }
0x1e14   :  { %4382 = vadd.xlane.f32.xlu0 %v4381_v59  ;;  %v7468_v59 = vld [vmem:[%s11052_s23 + $0x150] sm:$0xff] }
0x1e2a   :  { %4438 = vrot.lane.b32.xlu0 %v10051_v3, %s11064_s10 }
0x1ea1   :  { %v4383_v55 = vpop.xlane.xlu0 %4382 }
0x1ea2   :  { %9052 = vrcp.f32 %v4383_v55  ;;  %v7469_v55 = vld [vmem:[%s11052_s23 + $0x158] sm:$0xff] }
0x1ea5   :  { %v4439_v56 = vpop.permute.xlu0 %4438 }
0x1ea6   :  { %v4444_v60 = vsel %vm277_vm3, %v4439_v56, 0 }
0x1ea7   :  { %8576 = vmatpush3.bf16.msra.mxu0 %v4444_v60  ;;  %v7477_v60 = vcombine.low %v7467_v54, %v7469_v55 }
0x1eac   :  { %v9053_v61 = vpop.eup %9052 }
0x1ead   :  { %v4387_v63 = vmul.f32 %v9053_v61, %v9051_v13  ;;  %v7466_v13 = vld [vmem:[%s11052_s23 + $0x110] sm:$0xff]  ;;  %v7478_v61 = vcombine.high %v7467_v54, %v7469_v55  ;;  %v8883_v55 = vld [vmem:[%s11053_s5 + $0x5f8] sm:$0xff]  }
0x1eae   :  { %v7476_v62 = vcombine.high %v7466_v13, %v7468_v59  ;;  %v7475_v56 = vcombine.low %v7466_v13, %v7468_v59  ;;  %v8879_v13 = vld [vmem:[%s11053_s5 + $0x5f0] sm:$0xff]  }
0x1eaf   :  { %v4389_v1 = vpack.c.bf16 %v4387_v63, %v4387_v63  ;;  %v8880_v59 = vld [vmem:[%s11053_s5 + $0x530] sm:$0xff]  }
0x1eb0   :  { %v8881_v54 = vld [vmem:[%s11053_s5 + $0x5b0] sm:$0xff]  }
0x1eb1   :  { %8578 = vmatmul.mubr.msk.bf16.vlgmr.msra.gmra.mrb[112].mxu0 %vm150_vm2, %v4389_v1 }
0x1eb2   :  { %4703 = vmatprep.mubr.bf16.mxu0 %v9075_v35 }
0x1edf   :  { %v4432_v3 = vpop.f32.mrb[108].mxu1 }
0x1ee0   :  { %v8573_v6 = vpop.f32.mrb[109].mxu1 }
0x1ee1   :  { %v4435_v7 = vpop.f32.mrb[110].mxu1 }
0x1ee2   :  { %v8574_v8 = vpop.f32.mrb[111].mxu1 }
0x1f84   :  { %v4480_v9 = vpop.f32.mrb[112].mxu0 }
0x1f85   :  { %v4486_v10 = vpack.c.bf16 %v4480_v9, %v4432_v3  ;;  %v8579_v12 = vpop.f32.mrb[113].mxu0 }
0x1f86   :  { %v4483_v15 = vpop.f32.mrb[114].mxu0 }
0x1f87   :  { %v8580_v16 = vpop.f32.mrb[115].mxu0  ;;  %8584 = vmatmul.mubr.msk.bf16.vlgmr.msra.gmra.mrb[112].mxu1 %vm150_vm2, %v4486_v10  ;;  %v7381_v10 = vld [vmem:[%s10992_s6 + $0x1] ss:$0 sm:$0xff] }
0x1f88   :  { %4746 = vmatprep.mubr.bf16.mxu1 %v9075_v35  ;;  %4715 = vmatpush1.bf16.msra.mxu1 %v7394_v57  ;;  %v8869_v57 = vld [vmem:[%s11053_s5 + $0x598] sm:$0xff]  }
0x1f89   :  { %4716 = vmatprep.subr.bf16.mxu1 %v7399_v53  ;;  %v8878_v53 = vld [vmem:[%s11053_s5 + $0x570] sm:$0xff]  }
0x1f8c   :  { %4717 = vmatpush1.bf16.msra.mxu1 %v7398_v28  ;;  %v8877_v28 = vld [vmem:[%s11053_s5 + $0x5a8] sm:$0xff]  }
0x1f8d   :  { %4947 = vmatprep.subr.bf16.mxu1 %v7478_v61  ;;  %v8886_v61 = vld [vmem:[%s11053_s5 + $0x440] sm:$0xff]  }
0x205a   :  { %v4528_v4 = vpop.f32.mrb[112].mxu1 }
0x205b   :  { %v4535_v25 = vadd.f32 %v4528_v4, %v4262_v18  ;;  %v8585_v29 = vpop.f32.mrb[113].mxu1 }
0x205c   :  { %v4531_v30 = vpop.f32.mrb[114].mxu1  ;;  %v7470_v29 = vld [vmem:[%s11052_s23 + $0x190] sm:$0xff] }
0x205d   :  { %v4545_v19 = vadd.f32 %v7378_v17, %v4535_v25  ;;  %v4536_v31 = vadd.f32 %v4531_v30, %v4263_v48  ;;  %v8586_v32 = vpop.f32.mrb[115].mxu1  ;;  %v7472_v30 = vld [vmem:[%s11052_s23 + $0x1d0] sm:$0xff] }
0x205f   :  { %v4546_v33 = vadd.f32 %v7378_v17, %v4536_v31  ;;  %v4547_v22 = vadd.f32 %v4545_v19, %v10037_v5  ;;  %v7382_v17 = vld [vmem:[%s10993_s7 + $0x1] ss:$0 sm:$0xff]  ;;  %v7471_v19 = vld [vmem:[%s11052_s23 + $0x198] sm:$0xff] }
0x2060   :  { %v7473_v31 = vld [vmem:[%s11052_s23 + $0x1d8] sm:$0xff] }
0x2061   :  { %v4553_v34 = vsel %vm100_vm1, %v4547_v22, 0.0  ;;  %v4548_v36 = vadd.f32 %v4546_v33, %v10039_v2  ;;  %v7383_v2 = vld [vmem:[%s11052_s23 + $0x100] sm:$0xff] }
0x2062   :  { %4554 = vadd.xlane.f32.xlu1 %v4553_v34  ;;  %v7393_v52 = vcombine.high %v7383_v2, %v7385_v51  ;;  %v7392_v21 = vcombine.low %v7383_v2, %v7385_v51  ;;  %v7480_v34 = vcombine.high %v7470_v29, %v7472_v30  ;;  %v8863_v2 = vld [vmem:[%s11053_s5 + $0x5d0] sm:$0xff]  }
0x2063   :  { %v4556_v11 = vsel %vm100_vm1, %v4548_v36, 0.0  ;;  %v8864_v51 = vld [vmem:[%s11053_s5 + $0x510] sm:$0xff]  }
0x2064   :  { %4557 = vadd.xlane.f32.xlu0 %v4556_v11  ;;  %4671 = vmatprep.subr.bf16.mxu0 %v7393_v52  ;;  %v7479_v11 = vcombine.low %v7470_v29, %v7472_v30  ;;  %v8866_v52 = vld [vmem:[%s11053_s5 + $0x558] sm:$0xff]  }
0x2065   :  { %4672 = vmatpush1.bf16.msra.mxu0 %v7392_v21  ;;  %v8868_v21 = vld [vmem:[%s11053_s5 + $0x518] sm:$0xff]  }
0x2066   :  { %4673 = vmatprep.subr.bf16.mxu0 %v7397_v26  ;;  %v8874_v26 = vld [vmem:[%s11053_s5 + $0x568] sm:$0xff]  }
0x2069   :  { %4674 = vmatpush1.bf16.msra.mxu0 %v7396_v45  ;;  %v8876_v45 = vld [vmem:[%s11053_s5 + $0x528] sm:$0xff]  }
0x206a   :  { %4904 = vmatprep.subr.bf16.mxu0 %v7476_v62  ;;  %v8882_v62 = vld [vmem:[%s11053_s5 + $0x578] sm:$0xff]  }
0x20ef   :  { %v4555_v37 = vpop.xlane.xlu1 %4554 }
0x20f0   :  { %v4559_v41 = vmul.f32 0.03125, %v4555_v37  ;;  %v7481_v37 = vcombine.low %v7471_v19, %v7473_v31 }
0x20f1   :  { %v4558_v44 = vpop.xlane.xlu0 %4557 }
0x20f2   :  { %v4561_v46 = vsub.f32 %v4547_v22, %v4559_v41  ;;  %v4560_v18 = vmul.f32 0.03125, %v4558_v44  ;;  %v8854_v41 = vld [vmem:[%s11053_s5 + $0x540] sm:$0xff]  }
0x20f3   :  { %v8855_v44 = vld [vmem:[%s11053_s5 + $0x5c0] sm:$0xff]  }
0x20f4   :  { %v4562_v14 = vsub.f32 %v4548_v36, %v4560_v18  ;;  %v4563_v47 = vmul.f32 %v4561_v46, %v4561_v46  ;;  %v7482_v36 = vcombine.high %v7471_v19, %v7473_v31  ;;  %v8857_v18 = vld [vmem:[%s11053_s5 + $0x580] sm:$0xff]  }
0x20f6   :  { %v4565_v48 = vsel %vm100_vm1, %v4563_v47, 0.0  ;;  %v4564_v50 = vmul.f32 %v4562_v14, %v4562_v14  ;;  %v8859_v47 = vld [vmem:[%s11053_s5 + $0x5c8] sm:$0xff]  }
0x20f7   :  { %4566 = vadd.xlane.f32.xlu1 %v4565_v48  ;;  %v8860_v48 = vld [vmem:[%s11053_s5 + $0x508] sm:$0xff]  }
0x20f8   :  { %v4568_v5 = vsel %vm100_vm1, %v4564_v50, 0.0  ;;  %v8861_v50 = vld [vmem:[%s11053_s5 + $0x588] sm:$0xff]  }
0x20f9   :  { %4569 = vadd.xlane.f32.xlu0 %v4568_v5  ;;  %v8862_v5 = vld [vmem:[%s11053_s5 + $0x550] sm:$0xff]  }
0x2184   :  { %v4567_v63 = vpop.xlane.xlu1 %4566 }
0x2185   :  { %v4571_v1 = vmul.f32 0.03125, %v4567_v63  ;;  %v8887_v63 = vld [vmem:[%s11053_s5 + $0x4c0] sm:$0xff]  }
0x2186   :  { %v4570_v3 = vpop.xlane.xlu0 %4569 }
0x2187   :  { %v4573_v6 = vadd.f32 1e-05, %v4571_v1  ;;  %v4572_v7 = vmul.f32 0.03125, %v4570_v3  ;;  %v7391_v1 = vld [vmem:[%s10994_s9 + $0x10] sm:$0xf] }
0x2188   :  { %v4611_v3 = vrot.slane %v7391_v1, %v9596_v39 }
0x2189   :  { %9054 = vrsqrt.f32 %v4573_v6  ;;  %v4574_v8 = vadd.f32 1e-05, %v4572_v7  ;;  %v4619_v6 = vrot.slane %v7391_v1, %v9598_v40  ;;  %v4615_v7 = vrot.slane %v7391_v1, %v9603_v42 }
0x218b   :  { %9056 = vrsqrt.f32 %v4574_v8  ;;  %v4623_v8 = vrot.slane %v7391_v1, %v9605_v43 }
0x2193   :  { %v9055_v9 = vpop.eup %9054 }
0x2194   :  { %v4577_v12 = vmul.f32 %v9055_v9, %v4561_v46  ;;  %v8856_v46 = vld [vmem:[%s11053_s5 + $0x500] sm:$0xff]  }
0x2195   :  { %v9057_v15 = vpop.eup %9056 }
0x2196   :  { %v4585_v16 = vmul.f32 %v7381_v10, %v4577_v12  ;;  %v4578_v4 = vmul.f32 %v9057_v15, %v4562_v14  ;;  %v8858_v14 = vld [vmem:[%s11053_s5 + $0x548] sm:$0xff]   ;;  %v7474_v12 = vld [vmem:[%s10994_s9 + $0x14] sm:$0xf] }
0x2198   :  { %v4586_v25 = vmul.f32 %v7381_v10, %v4578_v4  ;;  %v10301_v32 = vadd.f32 %v7382_v17, %v4585_v16 }
0x219a   :  { %v10303_v33 = vadd.f32 %v7382_v17, %v4586_v25 }
0x219c   :  { %v10307_v22 = vpack.c.bf16 %v10303_v33, %v10301_v32 }
0x219e   :  { %7400 = vmatmul.mubr.msk.bf16.vlgmr.msra.gmra.mrb[116].mxu0 %vm100_vm1, %v10307_v22  ;;  %7401 = vmatmul.mubr.msk.bf16.vlgmr.msra.gmra.mrb[116].mxu1 %vm100_vm1, %v10307_v22 }
0x219f   :  { %4905 = vmatpush1.bf16.msra.mxu0 %v7475_v56  ;;  %4948 = vmatpush1.bf16.msra.mxu1 %v7477_v60  ;;  %v8884_v56 = vld [vmem:[%s11053_s5 + $0x538] sm:$0xff]  }
0x21a0   :  { %4906 = vmatprep.subr.bf16.mxu0 %v7480_v34  ;;  %4949 = vmatprep.subr.bf16.mxu1 %v7482_v36  ;;  %v8885_v60 = vld [vmem:[%s11053_s5 + $0x5b8] sm:$0xff]  }
0x21a1   :  { %4936 = vmatprep.mubr.bf16.mxu0 %v9075_v35  ;;  %4979 = vmatprep.mubr.bf16.mxu1 %v9075_v35 }
0x21a3   :  { %4907 = vmatpush1.bf16.msra.mxu0 %v7479_v11  ;;  %4950 = vmatpush1.bf16.msra.mxu1 %v7481_v37  ;;  %v4847_v37 = vrot.slane %v7474_v12, %v9596_v39 }
0x21a4   :  { %8120 = vmatprep.subr.bf16.mxu0 %v8854_v41  ;;  %8142 = vmatprep.subr.bf16.mxu1 %v8855_v44  ;;  %v4855_v41 = vrot.slane %v7474_v12, %v9598_v40 }
0x21a6   :  { %7483 = vmatmul.mubr.msk.bf16.vlgmr.msra.gmra.mrb[120].mxu0 %vm100_vm1, %v10307_v22  ;;  %7484 = vmatmul.mubr.msk.bf16.vlgmr.msra.gmra.mrb[120].mxu1 %vm100_vm1, %v10307_v22 }
0x21a7   :  { %8121 = vmatpush3.bf16.msra.mxu0 %v8856_v46  ;;  %8143 = vmatpush3.bf16.msra.mxu1 %v8857_v18  ;;  %v4851_v18 = vrot.slane %v7474_v12, %v9603_v42 }
0x21a8   :  { %8122 = vmatprep.subr.bf16.mxu0 %v8858_v14  ;;  %8144 = vmatprep.subr.bf16.mxu1 %v8859_v47  ;;  %v4859_v14 = vrot.slane %v7474_v12, %v9605_v43 }
0x21ab   :  { %8123 = vmatpush3.bf16.msra.mxu0 %v8860_v48  ;;  %8145 = vmatpush3.bf16.msra.mxu1 %v8861_v50 }
0x21ac   :  { %8124 = vmatprep.subr.bf16.mxu0 %v8862_v5  ;;  %8146 = vmatprep.subr.bf16.mxu1 %v8863_v2 }
0x21af   :  { %8125 = vmatpush3.bf16.msra.mxu0 %v8864_v51  ;;  %8147 = vmatpush3.bf16.msra.mxu1 %v8865_v20 }
0x21b0   :  { %8126 = vmatprep.subr.bf16.mxu0 %v8866_v52  ;;  %8148 = vmatprep.subr.bf16.mxu1 %v8867_v49 }
0x21b3   :  { %8127 = vmatpush3.bf16.msra.mxu0 %v8868_v21  ;;  %8149 = vmatpush3.bf16.msra.mxu1 %v8869_v57 }
0x21b4   :  { %8128 = vmatprep.subr.bf16.mxu0 %v8870_v58  ;;  %8150 = vmatprep.subr.bf16.mxu1 %v8871_v23 }
0x21b7   :  { %8129 = vmatpush3.bf16.msra.mxu0 %v8872_v38  ;;  %8151 = vmatpush3.bf16.msra.mxu1 %v8873_v24 }
0x21b8   :  { %8130 = vmatprep.subr.bf16.mxu0 %v8874_v26  ;;  %8152 = vmatprep.subr.bf16.mxu1 %v8875_v27 }
0x21bb   :  { %8131 = vmatpush3.bf16.msra.mxu0 %v8876_v45  ;;  %8153 = vmatpush3.bf16.msra.mxu1 %v8877_v28 }
0x21bc   :  { %8132 = vmatprep.subr.bf16.mxu0 %v8878_v53  ;;  %8154 = vmatprep.subr.bf16.mxu1 %v8879_v13 }
0x21bf   :  { %8133 = vmatpush3.bf16.msra.mxu0 %v8880_v59  ;;  %8155 = vmatpush3.bf16.msra.mxu1 %v8881_v54 }
0x21c0   :  { %8134 = vmatprep.subr.bf16.mxu0 %v8882_v62  ;;  %8156 = vmatprep.subr.bf16.mxu1 %v8883_v55 }
0x21c3   :  { %8135 = vmatpush3.bf16.msra.mxu0 %v8884_v56  ;;  %8157 = vmatpush3.bf16.msra.mxu1 %v8885_v60 }
0x21c4   :  { %8164 = vmatprep.subr.bf16.mxu0 %v8886_v61  ;;  %8186 = vmatprep.subr.bf16.mxu1 %v8887_v63 }
0x2271   :  { %v4705_v9 = vpop.f32.mrb[116].mxu0  ;;  %v4748_v10 = vpop.f32.mrb[116].mxu1 }
0x2272   :  { %v4706_v15 = vadd.f32 %v4705_v9, %v4611_v3  ;;  %v4749_v16 = vadd.f32 %v4748_v10, %v4619_v6  ;;  %v4707_v4 = vpop.f32.mrb[117].mxu0  ;;  %v4750_v17 = vpop.f32.mrb[117].mxu1 }
0x2273   :  { %v4708_v25 = vadd.f32 %v4707_v4, %v4615_v7  ;;  %v4751_v29 = vadd.f32 %v4750_v17, %v4623_v8  ;;  %v4709_v30 = vpop.f32.mrb[118].mxu0  ;;  %v4752_v19 = vpop.f32.mrb[118].mxu1  ;;  %v8888_v17 = vld [vmem:[%s11053_s5 + $0x400] sm:$0xff]  }
0x2274   :  { %v4710_v31 = vadd.f32 %v4709_v30, %v4611_v3  ;;  %v4753_v34 = vadd.f32 %v4752_v19, %v4619_v6  ;;  %v4711_v36 = vpop.f32.mrb[119].mxu0  ;;  %v4754_v11 = vpop.f32.mrb[119].mxu1  ;;  %v4757_v47 = vmax.f32 %v4706_v15, 0.0  ;;  %v4759_v48 = vmax.f32 %v4749_v16, 0.0  ;;  %v8891_v30 = vld [vmem:[%s11053_s5 + $0x4c8] sm:$0xff]  }
0x2275   :  { %v4712_v44 = vadd.f32 %v4711_v36, %v4615_v7  ;;  %v4755_v46 = vadd.f32 %v4754_v11, %v4623_v8  ;;  %v4758_v2 = vmax.f32 %v4708_v25, 0.0  ;;  %v4760_v51 = vmax.f32 %v4751_v29, 0.0  ;;  %v8889_v25 = vld [vmem:[%s11053_s5 + $0x480] sm:$0xff]   ;;  %v8890_v29 = vld [vmem:[%s11053_s5 + $0x448] sm:$0xff]   ;;  %v8895_v36 = vld [vmem:[%s11053_s5 + $0x4d0] sm:$0xff]  }
0x2276   :  { %v4761_v50 = vmax.f32 %v4710_v31, 0.0  ;;  %v4763_v5 = vmax.f32 %v4753_v34, 0.0  ;;  %v8892_v19 = vld [vmem:[%s11053_s5 + $0x408] sm:$0xff]   ;;  %v8894_v34 = vld [vmem:[%s11053_s5 + $0x450] sm:$0xff]  }
0x2277   :  { %v4762_v20 = vmax.f32 %v4712_v44, 0.0  ;;  %v4764_v52 = vmax.f32 %v4755_v46, 0.0  ;;  %v8893_v31 = vld [vmem:[%s11053_s5 + $0x488] sm:$0xff]   ;;  %v8896_v11 = vld [vmem:[%s11053_s5 + $0x410] sm:$0xff]   ;;  %v8899_v44 = vld [vmem:[%s11053_s5 + $0x4d8] sm:$0xff]  }
0x2278   :  { %v10435_v49 = vpack.c.bf16 %v4761_v50, %v4757_v47  ;;  %v10437_v21 = vpack.c.bf16 %v4763_v5, %v4759_v48  ;;  %v8900_v46 = vld [vmem:[%s11053_s5 + $0x418] sm:$0xff]   ;;  %v8903_v47 = vld [vmem:[%s11053_s5 + $0x4e0] sm:$0xff]   ;;  %v8906_v5 = vld [vmem:[%s11053_s5 + $0x468] sm:$0xff]  }
0x2279   :  { %v4766_v57 = vpack.c.bf16 %v4762_v20, %v4758_v2  ;;  %v4768_v58 = vpack.c.bf16 %v4764_v52, %v4760_v51  ;;  %v4938_v23 = vpop.f32.mrb[120].mxu0  ;;  %v4981_v38 = vpop.f32.mrb[120].mxu1  ;;  %v8904_v48 = vld [vmem:[%s11053_s5 + $0x420] sm:$0xff]   ;;  %v8907_v2 = vld [vmem:[%s11053_s5 + $0x4e8] sm:$0xff]   ;;  %v8910_v52 = vld [vmem:[%s11053_s5 + $0x470] sm:$0xff]  }
0x227a   :  { %v4939_v24 = vadd.f32 %v4938_v23, %v4847_v37  ;;  %v4982_v26 = vadd.f32 %v4981_v38, %v4855_v41  ;;  %v4940_v27 = vpop.f32.mrb[121].mxu0  ;;  %v4983_v45 = vpop.f32.mrb[121].mxu1  ;;  %v8905_v50 = vld [vmem:[%s11053_s5 + $0x4a0] sm:$0xff]   ;;  %v8908_v51 = vld [vmem:[%s11053_s5 + $0x428] sm:$0xff]   ;;  %v8913_v23 = vld [vmem:[%s11053_s5 + $0x4b0] sm:$0xff]  }
0x227b   :  { %v4941_v28 = vadd.f32 %v4940_v27, %v4851_v18  ;;  %v4984_v53 = vadd.f32 %v4983_v45, %v4859_v14  ;;  %v4942_v13 = vpop.f32.mrb[122].mxu0  ;;  %v4985_v59 = vpop.f32.mrb[122].mxu1  ;;  %v8909_v20 = vld [vmem:[%s11053_s5 + $0x4a8] sm:$0xff]   ;;  %v8914_v38 = vld [vmem:[%s11053_s5 + $0x478] sm:$0xff]   ;;  %v7615_v27 = vld [vmem:[%s11052_s23 + $0x160] sm:$0xff] }
0x227c   :  { %v4943_v54 = vadd.f32 %v4942_v13, %v4847_v37  ;;  %v4986_v62 = vadd.f32 %v4985_v59, %v4855_v41  ;;  %v4944_v55 = vpop.f32.mrb[123].mxu0  ;;  %v4987_v56 = vpop.f32.mrb[123].mxu1  ;;  %v4990_v63 = vmax.f32 %v4939_v24, 0.0  ;;  %v4992_v1 = vmax.f32 %v4982_v26, 0.0  ;;  %v8897_v37 = vld [vmem:[%s11053_s5 + $0x490] sm:$0xff]   ;;  %v8898_v41 = vld [vmem:[%s11053_s5 + $0x458] sm:$0xff]  }
0x227d   :  { %v4945_v60 = vadd.f32 %v4944_v55, %v4851_v18  ;;  %v4988_v61 = vadd.f32 %v4987_v56, %v4859_v14  ;;  %v4991_v7 = vmax.f32 %v4941_v28, 0.0  ;;  %v4993_v8 = vmax.f32 %v4984_v53, 0.0  ;;  %v8901_v18 = vld [vmem:[%s11053_s5 + $0x498] sm:$0xff]   ;;  %v8902_v14 = vld [vmem:[%s11053_s5 + $0x460] sm:$0xff]   ;;  %v7614_v45 = vld [vmem:[%s11052_s23 + $0x128] sm:$0xff] }
0x227e   :  { %v4994_v3 = vmax.f32 %v4943_v54, 0.0  ;;  %v4996_v6 = vmax.f32 %v4986_v62, 0.0  ;;  %v8915_v24 = vld [vmem:[%s11053_s5 + $0x4f8] sm:$0xff]   ;;  %v7613_v26 = vld [vmem:[%s11052_s23 + $0x120] sm:$0xff]  ;;  %v7616_v28 = vld [vmem:[%s11052_s23 + $0x168] sm:$0xff] }
0x227f   :  { %v4995_v9 = vmax.f32 %v4945_v60, 0.0  ;;  %v4997_v10 = vmax.f32 %v4988_v61, 0.0  ;;  %v8916_v53 = vld [vmem:[%s11053_s5 + $0x438] sm:$0xff]   ;;  %v7623_v59 = vcombine.high %v7613_v26, %v7615_v27  ;;  %v7625_v54 = vcombine.high %v7614_v45, %v7616_v28  ;;  %v7617_v62 = vld [vmem:[%s11052_s23 + $0x1a0] sm:$0xff]  ;;  %v7618_v56 = vld [vmem:[%s11052_s23 + $0x1a8] sm:$0xff] }
0x2280   :  { %v4998_v12 = vpack.c.bf16 %v4994_v3, %v4990_v63  ;;  %v5000_v15 = vpack.c.bf16 %v4996_v6, %v4992_v1  ;;  %v8917_v13 = vld [vmem:[%s11053_s5 + $0x4b8] sm:$0xff]   ;;  %v7619_v55 = vld [vmem:[%s11052_s23 + $0x1e0] sm:$0xff]  ;;  %v7620_v60 = vld [vmem:[%s11052_s23 + $0x1e8] sm:$0xff]  ;;  %v7622_v61 = vcombine.low %v7613_v26, %v7615_v27  ;;  %v7624_v63 = vcombine.low %v7614_v45, %v7616_v28 }
0x2281   :  { %v4999_v16 = vpack.c.bf16 %v4995_v9, %v4991_v7  ;;  %v5001_v4 = vpack.c.bf16 %v4997_v10, %v4993_v8  ;;  %v7627_v1 = vcombine.high %v7617_v62, %v7619_v55  ;;  %v7629_v3 = vcombine.high %v7618_v56, %v7620_v60  ;;  %v8920_v8 = vld [vmem:[%s11053_s5 + $0x600] sm:$0xff]   ;;  %v8922_v10 = vld [vmem:[%s11053_s5 + $0x648] sm:$0xff]  }
0x2282   :  { %v7626_v6 = vcombine.low %v7617_v62, %v7619_v55  ;;  %v7628_v7 = vcombine.low %v7618_v56, %v7620_v60  ;;  %v8921_v9 = vld [vmem:[%s11053_s5 + $0x680] sm:$0xff]  }
0x2283   :  { %5290 = vmatprep.mubr.bf16.mxu0 %v4999_v16  ;;  %5331 = vmatprep.mubr.bf16.mxu1 %v5001_v4  ;;  %v8925_v16 = vld [vmem:[%s11053_s5 + $0x688] sm:$0xff]   ;;  %v8926_v4 = vld [vmem:[%s11053_s5 + $0x650] sm:$0xff]  }
0x2284   :  { %5291 = vmatmul.mubr.bf16.vlgmr.msra.gmra.mrb[124].mxu0 %v4998_v12  ;;  %5332 = vmatmul.mubr.bf16.vlgmr.msra.gmra.mrb[124].mxu1 %v5000_v15  ;;  %v8923_v12 = vld [vmem:[%s11053_s5 + $0x6c8] sm:$0xff]  }
0x2285   :  { %8165 = vmatpush3.bf16.msra.mxu0 %v8888_v17  ;;  %8187 = vmatpush3.bf16.msra.mxu1 %v8889_v25  ;;  %v8924_v15 = vld [vmem:[%s11053_s5 + $0x608] sm:$0xff]   ;;  %v8927_v17 = vld [vmem:[%s11053_s5 + $0x6d0] sm:$0xff]  }
0x2286   :  { %5564 = vmatprep.mubr.bf16.mxu0 %v4766_v57  ;;  %5605 = vmatprep.mubr.bf16.mxu1 %v4768_v58  ;;  %v8911_v57 = vld [vmem:[%s11053_s5 + $0x4f0] sm:$0xff]  }
0x2287   :  { %8166 = vmatprep.subr.bf16.mxu0 %v8890_v29  ;;  %8188 = vmatprep.subr.bf16.mxu1 %v8891_v30  ;;  %v8912_v58 = vld [vmem:[%s11053_s5 + $0x430] sm:$0xff]   ;;  %v8930_v30 = vld [vmem:[%s11053_s5 + $0x658] sm:$0xff]  }
0x2288   :  { %v8928_v25 = vld [vmem:[%s11053_s5 + $0x610] sm:$0xff]  }
0x2289   :  { %8167 = vmatpush3.bf16.msra.mxu0 %v8892_v19  ;;  %8189 = vmatpush3.bf16.msra.mxu1 %v8893_v31  ;;  %v8929_v29 = vld [vmem:[%s11053_s5 + $0x690] sm:$0xff]   ;;  %v8931_v19 = vld [vmem:[%s11053_s5 + $0x6d8] sm:$0xff]  }
0x228a   :  { %8168 = vmatprep.subr.bf16.mxu0 %v8894_v34  ;;  %8190 = vmatprep.subr.bf16.mxu1 %v8895_v36  ;;  %v8932_v31 = vld [vmem:[%s11053_s5 + $0x618] sm:$0xff]   ;;  %v8934_v36 = vld [vmem:[%s11053_s5 + $0x660] sm:$0xff]  }
0x228b   :  { %v8933_v34 = vld [vmem:[%s11053_s5 + $0x698] sm:$0xff]  }
0x228d   :  { %8169 = vmatpush3.bf16.msra.mxu0 %v8896_v11  ;;  %8191 = vmatpush3.bf16.msra.mxu1 %v8897_v37  ;;  %v8935_v11 = vld [vmem:[%s11053_s5 + $0x6e0] sm:$0xff]  }
0x228e   :  { %8170 = vmatprep.subr.bf16.mxu0 %v8898_v41  ;;  %8192 = vmatprep.subr.bf16.mxu1 %v8899_v44  ;;  %v8936_v37 = vld [vmem:[%s11053_s5 + $0x620] sm:$0xff]   ;;  %v8938_v44 = vld [vmem:[%s11053_s5 + $0x668] sm:$0xff]  }
0x228f   :  { %v8937_v41 = vld [vmem:[%s11053_s5 + $0x6a0] sm:$0xff]  }
0x2291   :  { %8171 = vmatpush3.bf16.msra.mxu0 %v8900_v46  ;;  %8193 = vmatpush3.bf16.msra.mxu1 %v8901_v18  ;;  %v8939_v46 = vld [vmem:[%s11053_s5 + $0x6e8] sm:$0xff]  }
0x2292   :  { %8172 = vmatprep.subr.bf16.mxu0 %v8902_v14  ;;  %8194 = vmatprep.subr.bf16.mxu1 %v8903_v47  ;;  %v8940_v18 = vld [vmem:[%s11053_s5 + $0x628] sm:$0xff]   ;;  %v8942_v47 = vld [vmem:[%s11053_s5 + $0x670] sm:$0xff]  }
0x2293   :  { %v8941_v14 = vld [vmem:[%s11053_s5 + $0x6a8] sm:$0xff]  }
0x2295   :  { %8173 = vmatpush3.bf16.msra.mxu0 %v8904_v48  ;;  %8195 = vmatpush3.bf16.msra.mxu1 %v8905_v50  ;;  %v8943_v48 = vld [vmem:[%s11053_s5 + $0x6f0] sm:$0xff]  }
0x2296   :  { %8174 = vmatprep.subr.bf16.mxu0 %v8906_v5  ;;  %8196 = vmatprep.subr.bf16.mxu1 %v8907_v2  ;;  %v8944_v50 = vld [vmem:[%s11053_s5 + $0x630] sm:$0xff]   ;;  %v8946_v2 = vld [vmem:[%s11053_s5 + $0x678] sm:$0xff]  }
0x2297   :  { %v8945_v5 = vld [vmem:[%s11053_s5 + $0x6b0] sm:$0xff]  }
0x2299   :  { %8175 = vmatpush3.bf16.msra.mxu0 %v8908_v51  ;;  %8197 = vmatpush3.bf16.msra.mxu1 %v8909_v20  ;;  %v8947_v51 = vld [vmem:[%s11053_s5 + $0x6f8] sm:$0xff]  }
0x229a   :  { %8176 = vmatprep.subr.bf16.mxu0 %v8910_v52  ;;  %8198 = vmatprep.subr.bf16.mxu1 %v8911_v57  ;;  %v8948_v20 = vld [vmem:[%s11053_s5 + $0x638] sm:$0xff]   ;;  %v10660_v57 = vld [vmem:[%s11052_s23 + $0x130] sm:$0xff] }
0x229b   :  { %v8949_v52 = vld [vmem:[%s11053_s5 + $0x6b8] sm:$0xff]  }
0x229d   :  { %8177 = vmatpush3.bf16.msra.mxu0 %v8912_v58  ;;  %8199 = vmatpush3.bf16.msra.mxu1 %v8913_v23  ;;  %v10665_v58 = vld [vmem:[%s11052_s23 + $0x170] sm:$0xff]  ;;  %v10670_v23 = vld [vmem:[%s11052_s23 + $0x138] sm:$0xff] }
0x229e   :  { %8178 = vmatprep.subr.bf16.mxu0 %v8914_v38  ;;  %8200 = vmatprep.subr.bf16.mxu1 %v8915_v24  ;;  %v7738_v38 = vcombine.high %v10660_v57, %v10665_v58  ;;  %v10677_v24 = vld [vmem:[%s11052_s23 + $0x178] sm:$0xff]  ;;  %v7737_v26 = vcombine.low %v10660_v57, %v10665_v58  ;;  %v8952_v57 = vld [vmem:[%s11053_s5 + $0x700] sm:$0xff]  }
0x229f   :  { %v7739_v27 = vcombine.low %v10670_v23, %v10677_v24  ;;  %v7740_v45 = vcombine.high %v10670_v23, %v10677_v24  ;;  %v8953_v58 = vld [vmem:[%s11053_s5 + $0x780] sm:$0xff]   ;;  %v8954_v23 = vld [vmem:[%s11053_s5 + $0x748] sm:$0xff]  }
0x22a0   :  { %v8956_v24 = vld [vmem:[%s11053_s5 + $0x708] sm:$0xff]  }
0x22a1   :  { %8179 = vmatpush3.bf16.msra.mxu0 %v8916_v53  ;;  %8201 = vmatpush3.bf16.msra.mxu1 %v8917_v13 }
0x22a2   :  { %5684 = vmatprep.subr.bf16.mxu0 %v7623_v59  ;;  %5727 = vmatprep.subr.bf16.mxu1 %v7625_v54 }
0x22a4   :  { %5565 = vmatmul.mubr.bf16.vlgmr.msra.gmra.mrb[128].mxu0 %v10435_v49  ;;  %5606 = vmatmul.mubr.bf16.vlgmr.msra.gmra.mrb[128].mxu1 %v10437_v21  ;;  %v8918_v49 = vld [vmem:[%s11053_s5 + $0x640] sm:$0xff]  }
0x22a5   :  { %5685 = vmatpush1.bf16.msra.mxu0 %v7622_v61  ;;  %5728 = vmatpush1.bf16.msra.mxu1 %v7624_v63  ;;  %v8919_v21 = vld [vmem:[%s11053_s5 + $0x6c0] sm:$0xff]  }
0x22a6   :  { %5686 = vmatprep.subr.bf16.mxu0 %v7627_v1  ;;  %5729 = vmatprep.subr.bf16.mxu1 %v7629_v3 }
0x22a7   :  { %5716 = vmatprep.mubr.bf16.mxu0 %v9075_v35  ;;  %5759 = vmatprep.mubr.bf16.mxu1 %v9075_v35 }
0x22a9   :  { %5687 = vmatpush1.bf16.msra.mxu0 %v7626_v6  ;;  %5730 = vmatpush1.bf16.msra.mxu1 %v7628_v7 }
0x22aa   :  { %8208 = vmatprep.subr.bf16.mxu0 %v8918_v49  ;;  %8230 = vmatprep.subr.bf16.mxu1 %v8919_v21 }
0x22ac   :  { %7630 = vmatmul.mubr.msk.bf16.vlgmr.msra.gmra.mrb[132].mxu0 %vm100_vm1, %v10307_v22  ;;  %7631 = vmatmul.mubr.msk.bf16.vlgmr.msra.gmra.mrb[132].mxu1 %vm100_vm1, %v10307_v22 }
0x22ad   :  { %8209 = vmatpush3.bf16.msra.mxu0 %v8920_v8  ;;  %8231 = vmatpush3.bf16.msra.mxu1 %v8921_v9 }
0x22ae   :  { %8210 = vmatprep.subr.bf16.mxu0 %v8922_v10  ;;  %8232 = vmatprep.subr.bf16.mxu1 %v8923_v12 }
0x22b1   :  { %8211 = vmatpush3.bf16.msra.mxu0 %v8924_v15  ;;  %8233 = vmatpush3.bf16.msra.mxu1 %v8925_v16  ;;  %v7621_v16 = vld [vmem:[%s10994_s9 + $0x18] sm:$0xf] }
0x22b2   :  { %8212 = vmatprep.subr.bf16.mxu0 %v8926_v4  ;;  %8234 = vmatprep.subr.bf16.mxu1 %v8927_v17 }
0x22b5   :  { %8213 = vmatpush3.bf16.msra.mxu0 %v8928_v25  ;;  %8235 = vmatpush3.bf16.msra.mxu1 %v8929_v29 }
0x22b6   :  { %8214 = vmatprep.subr.bf16.mxu0 %v8930_v30  ;;  %8236 = vmatprep.subr.bf16.mxu1 %v8931_v19  ;;  %v5627_v19 = vrot.slane %v7621_v16, %v9596_v39 }
0x22b9   :  { %8215 = vmatpush3.bf16.msra.mxu0 %v8932_v31  ;;  %8237 = vmatpush3.bf16.msra.mxu1 %v8933_v34  ;;  %v5635_v31 = vrot.slane %v7621_v16, %v9598_v40 }
0x22ba   :  { %8216 = vmatprep.subr.bf16.mxu0 %v8934_v36  ;;  %8238 = vmatprep.subr.bf16.mxu1 %v8935_v11  ;;  %v5631_v11 = vrot.slane %v7621_v16, %v9603_v42 }
0x22bd   :  { %8217 = vmatpush3.bf16.msra.mxu0 %v8936_v37  ;;  %8239 = vmatpush3.bf16.msra.mxu1 %v8937_v41  ;;  %v5639_v37 = vrot.slane %v7621_v16, %v9605_v43  ;;  %v8950_v16 = vld [vmem:[%s11053_s5 + $0x740] sm:$0xff]  }
0x22be   :  { %8218 = vmatprep.subr.bf16.mxu0 %v8938_v44  ;;  %8240 = vmatprep.subr.bf16.mxu1 %v8939_v46 }
0x22c1   :  { %8219 = vmatpush3.bf16.msra.mxu0 %v8940_v18  ;;  %8241 = vmatpush3.bf16.msra.mxu1 %v8941_v14 }
0x22c2   :  { %8220 = vmatprep.subr.bf16.mxu0 %v8942_v47  ;;  %8242 = vmatprep.subr.bf16.mxu1 %v8943_v48 }
0x22c5   :  { %8221 = vmatpush3.bf16.msra.mxu0 %v8944_v50  ;;  %8243 = vmatpush3.bf16.msra.mxu1 %v8945_v5 }
0x22c6   :  { %8222 = vmatprep.subr.bf16.mxu0 %v8946_v2  ;;  %8244 = vmatprep.subr.bf16.mxu1 %v8947_v51 }
0x22c9   :  { %8223 = vmatpush3.bf16.msra.mxu0 %v8948_v20  ;;  %8245 = vmatpush3.bf16.msra.mxu1 %v8949_v52 }
0x22ca   :  { %6192 = vmatprep.subr.bf16.mxu0 %v7738_v38  ;;  %6235 = vmatprep.subr.bf16.mxu1 %v7740_v45 }
0x2357   :  { %v8136_v28 = vpop.f32.mrb[124].mxu0  ;;  %v8158_v53 = vpop.f32.mrb[124].mxu1 }
0x2358   :  { %v8137_v13 = vpop.f32.mrb[125].mxu0  ;;  %v8159_v59 = vpop.f32.mrb[125].mxu1 }
0x2359   :  { %v8138_v54 = vadd.f32 %v8137_v13, %v8136_v28  ;;  %v8160_v62 = vadd.f32 %v8159_v59, %v8158_v53  ;;  %v8139_v55 = vpop.f32.mrb[126].mxu0  ;;  %v8161_v56 = vpop.f32.mrb[126].mxu1 }
0x235a   :  { %v8140_v60 = vpop.f32.mrb[127].mxu0  ;;  %v8162_v61 = vpop.f32.mrb[127].mxu1 }
0x235b   :  { %v5334_v63 = vadd.f32 %v8160_v62, %v8138_v54  ;;  %v8141_v1 = vadd.f32 %v8140_v60, %v8139_v55  ;;  %v8163_v3 = vadd.f32 %v8162_v61, %v8161_v56  ;;  %v7732_v55 = vld [vmem:[%s11052_s23 + $0x1b0] sm:$0xff] }
0x235c   :  { %v7734_v56 = vld [vmem:[%s11052_s23 + $0x1f0] sm:$0xff] }
0x235d   :  { %v5337_v6 = vadd.f32 %v8163_v3, %v8141_v1  ;;  %v7733_v3 = vld [vmem:[%s11052_s23 + $0x1b8] sm:$0xff] }
0x2377   :  { %v8180_v7 = vpop.f32.mrb[128].mxu0  ;;  %v8202_v49 = vpop.f32.mrb[128].mxu1 }
0x2378   :  { %v8181_v21 = vpop.f32.mrb[129].mxu0  ;;  %v8203_v8 = vpop.f32.mrb[129].mxu1 }
0x2379   :  { %v8182_v9 = vadd.f32 %v8181_v21, %v8180_v7  ;;  %v8204_v10 = vadd.f32 %v8203_v8, %v8202_v49  ;;  %v8183_v12 = vpop.f32.mrb[130].mxu0  ;;  %v8205_v15 = vpop.f32.mrb[130].mxu1 }
0x237a   :  { %v8184_v4 = vpop.f32.mrb[131].mxu0  ;;  %v8206_v17 = vpop.f32.mrb[131].mxu1 }
0x237b   :  { %v5567_v25 = vadd.f32 %v8182_v9, %v5334_v63  ;;  %v8185_v29 = vadd.f32 %v8184_v4, %v8183_v12  ;;  %v8207_v30 = vadd.f32 %v8206_v17, %v8205_v15  ;;  %v7742_v9 = vcombine.high %v7732_v55, %v7734_v56  ;;  %v8951_v4 = vld [vmem:[%s11053_s5 + $0x7c0] sm:$0xff]   ;;  %v8960_v17 = vld [vmem:[%s11053_s5 + $0x710] sm:$0xff]  }
0x237c   :  { %v7741_v12 = vcombine.low %v7732_v55, %v7734_v56  ;;  %v7736_v56 = vld [vmem:[%s10994_s9 + $0x1c] sm:$0xf] }
0x237d   :  { %v10690_v34 = vadd.f32 %v8204_v10, %v5567_v25  ;;  %v5570_v36 = vadd.f32 %v8185_v29, %v5337_v6  ;;  %v7735_v6 = vld [vmem:[%s11052_s23 + $0x1f8] sm:$0xff]  ;;  %v8961_v25 = vld [vmem:[%s11053_s5 + $0x790] sm:$0xff]  }
0x237e   :  { %v7744_v10 = vcombine.high %v7733_v3, %v7735_v6  ;;  %v7743_v15 = vcombine.low %v7733_v3, %v7735_v6  ;;  %v8962_v29 = vld [vmem:[%s11053_s5 + $0x758] sm:$0xff]   ;;  %v6135_v6 = vrot.slane %v7736_v56, %v9596_v39 }
0x237f   :  { %v10694_v41 = vadd.f32 %v8207_v30, %v5570_v36  ;;  %v5718_v44 = vpop.f32.mrb[132].mxu0  ;;  %v5761_v46 = vpop.f32.mrb[132].mxu1  ;;  %v8963_v30 = vld [vmem:[%s11053_s5 + $0x7d8] sm:$0xff]   ;;  %v8966_v36 = vld [vmem:[%s11053_s5 + $0x760] sm:$0xff]  }
0x2380   :  { %v5719_v18 = vadd.f32 %v5718_v44, %v5627_v19  ;;  %v5762_v14 = vadd.f32 %v5761_v46, %v5635_v31  ;;  %v5720_v47 = vpop.f32.mrb[133].mxu0  ;;  %v5763_v48 = vpop.f32.mrb[133].mxu1  ;;  %v8969_v44 = vld [vmem:[%s11053_s5 + $0x7a0] sm:$0xff]   ;;  %v8970_v46 = vld [vmem:[%s11053_s5 + $0x768] sm:$0xff]  }
0x2381   :  { %v5721_v50 = vadd.f32 %v5720_v47, %v5631_v11  ;;  %v5764_v5 = vadd.f32 %v5763_v48, %v5639_v37  ;;  %v5722_v2 = vpop.f32.mrb[134].mxu0  ;;  %v5765_v51 = vpop.f32.mrb[134].mxu1  ;;  %v8973_v47 = vld [vmem:[%s11053_s5 + $0x7a8] sm:$0xff]   ;;  %v8974_v48 = vld [vmem:[%s11053_s5 + $0x770] sm:$0xff]  }
0x2382   :  { %v5723_v20 = vadd.f32 %v5722_v2, %v5627_v19  ;;  %v5766_v52 = vadd.f32 %v5765_v51, %v5635_v31  ;;  %v5724_v38 = vpop.f32.mrb[135].mxu0  ;;  %v5767_v45 = vpop.f32.mrb[135].mxu1  ;;  %v5770_v13 = vmax.f32 %v5719_v18, 0.0  ;;  %v5772_v59 = vmax.f32 %v5762_v14, 0.0  ;;  %v8964_v19 = vld [vmem:[%s11053_s5 + $0x718] sm:$0xff]   ;;  %v8971_v18 = vld [vmem:[%s11053_s5 + $0x7e8] sm:$0xff]  }
0x2383   :  { %v5725_v28 = vadd.f32 %v5724_v38, %v5631_v11  ;;  %v5768_v53 = vadd.f32 %v5767_v45, %v5639_v37  ;;  %v5771_v60 = vmax.f32 %v5721_v50, 0.0  ;;  %v5773_v61 = vmax.f32 %v5764_v5, 0.0  ;;  %v8965_v31 = vld [vmem:[%s11053_s5 + $0x798] sm:$0xff]   ;;  %v8967_v11 = vld [vmem:[%s11053_s5 + $0x7e0] sm:$0xff]   ;;  %v8972_v14 = vld [vmem:[%s11053_s5 + $0x728] sm:$0xff]  }
0x2384   :  { %v5774_v54 = vmax.f32 %v5723_v20, 0.0  ;;  %v5776_v62 = vmax.f32 %v5766_v52, 0.0  ;;  %v8968_v37 = vld [vmem:[%s11053_s5 + $0x720] sm:$0xff]   ;;  %v8975_v50 = vld [vmem:[%s11053_s5 + $0x7f0] sm:$0xff]   ;;  %v8978_v51 = vld [vmem:[%s11053_s5 + $0x778] sm:$0xff]  }
0x2385   :  { %v5775_v63 = vmax.f32 %v5725_v28, 0.0  ;;  %v5777_v1 = vmax.f32 %v5768_v53, 0.0  ;;  %v8976_v5 = vld [vmem:[%s11053_s5 + $0x730] sm:$0xff]   ;;  %v8979_v20 = vld [vmem:[%s11053_s5 + $0x7f8] sm:$0xff]  }
0x2386   :  { %v5778_v7 = vpack.c.bf16 %v5774_v54, %v5770_v13  ;;  %v5780_v49 = vpack.c.bf16 %v5776_v62, %v5772_v59  ;;  %v8977_v2 = vld [vmem:[%s11053_s5 + $0x7b0] sm:$0xff]   ;;  %v8980_v52 = vld [vmem:[%s11053_s5 + $0x738] sm:$0xff]  }
0x2387   :  { %v5779_v21 = vpack.c.bf16 %v5775_v63, %v5771_v60  ;;  %v5781_v8 = vpack.c.bf16 %v5777_v1, %v5773_v61  ;;  %v8981_v38 = vld [vmem:[%s11053_s5 + $0x7b8] sm:$0xff]  }
0x2389   :  { %6070 = vmatprep.mubr.bf16.mxu0 %v5779_v21  ;;  %6111 = vmatprep.mubr.bf16.mxu1 %v5781_v8  ;;  %v6139_v8 = vrot.slane %v7736_v56, %v9603_v42 }
0x238a   :  { %6071 = vmatmul.mubr.bf16.vlgmr.msra.gmra.mrb[136].mxu0 %v5778_v7  ;;  %6112 = vmatmul.mubr.bf16.vlgmr.msra.gmra.mrb[136].mxu1 %v5780_v49  ;;  %v6143_v7 = vrot.slane %v7736_v56, %v9598_v40 }
0x238b   :  { %6193 = vmatpush1.bf16.msra.mxu0 %v7737_v26  ;;  %6236 = vmatpush1.bf16.msra.mxu1 %v7739_v27  ;;  %v8957_v26 = vld [vmem:[%s11053_s5 + $0x788] sm:$0xff]   ;;  %v8958_v27 = vld [vmem:[%s11053_s5 + $0x750] sm:$0xff]  }
0x238c   :  { %6194 = vmatprep.subr.bf16.mxu0 %v7742_v9  ;;  %6237 = vmatprep.subr.bf16.mxu1 %v7744_v10  ;;  %v6147_v9 = vrot.slane %v7736_v56, %v9605_v43 }
0x238d   :  { %6224 = vmatprep.mubr.bf16.mxu0 %v9075_v35  ;;  %6267 = vmatprep.mubr.bf16.mxu1 %v9075_v35  ;;  %v8955_v35 = vld [vmem:[%s11053_s5 + $0x7c8] sm:$0xff]  }
0x238f   :  { %6195 = vmatpush1.bf16.msra.mxu0 %v7741_v12  ;;  %6238 = vmatpush1.bf16.msra.mxu1 %v7743_v15 }
0x2390   :  { %8252 = vmatprep.subr.bf16.mxu0 %v8950_v16  ;;  %8274 = vmatprep.subr.bf16.mxu1 %v8951_v4 }
0x2392   :  { %7745 = vmatmul.mubr.msk.bf16.vlgmr.msra.gmra.mrb[140].mxu0 %vm100_vm1, %v10307_v22  ;;  %7746 = vmatmul.mubr.msk.bf16.vlgmr.msra.gmra.mrb[140].mxu1 %vm100_vm1, %v10307_v22  ;;  %v8959_v22 = vld [vmem:[%s11053_s5 + $0x7d0] sm:$0xff]  }
0x2393   :  { %8253 = vmatpush3.bf16.msra.mxu0 %v8952_v57  ;;  %8275 = vmatpush3.bf16.msra.mxu1 %v8953_v58 }
0x2394   :  { %8254 = vmatprep.subr.bf16.mxu0 %v8954_v23  ;;  %8276 = vmatprep.subr.bf16.mxu1 %v8955_v35 }
0x2397   :  { %8255 = vmatpush3.bf16.msra.mxu0 %v8956_v24  ;;  %8277 = vmatpush3.bf16.msra.mxu1 %v8957_v26 }
0x2398   :  { %8256 = vmatprep.subr.bf16.mxu0 %v8958_v27  ;;  %8278 = vmatprep.subr.bf16.mxu1 %v8959_v22 }
0x239b   :  { %8257 = vmatpush3.bf16.msra.mxu0 %v8960_v17  ;;  %8279 = vmatpush3.bf16.msra.mxu1 %v8961_v25 }
0x239c   :  { %8258 = vmatprep.subr.bf16.mxu0 %v8962_v29  ;;  %8280 = vmatprep.subr.bf16.mxu1 %v8963_v30 }
0x239f   :  { %8259 = vmatpush3.bf16.msra.mxu0 %v8964_v19  ;;  %8281 = vmatpush3.bf16.msra.mxu1 %v8965_v31 }
0x23a0   :  { %8260 = vmatprep.subr.bf16.mxu0 %v8966_v36  ;;  %8282 = vmatprep.subr.bf16.mxu1 %v8967_v11 }
0x23a3   :  { %8261 = vmatpush3.bf16.msra.mxu0 %v8968_v37  ;;  %8283 = vmatpush3.bf16.msra.mxu1 %v8969_v44 }
0x23a4   :  { %8262 = vmatprep.subr.bf16.mxu0 %v8970_v46  ;;  %8284 = vmatprep.subr.bf16.mxu1 %v8971_v18  ;;  %v9076_v46 = vmov 0.0|0.0   ;;  %v6706_v18 = vld [vmem:[%s10998_s14] sm:$0xff] }
0x23a7   :  { %8263 = vmatpush3.bf16.msra.mxu0 %v8972_v14  ;;  %8285 = vmatpush3.bf16.msra.mxu1 %v8973_v47  ;;  %v6707_v14 = vld [vmem:[%s10998_s14 + $0x8] sm:$0xff] }
0x23a8   :  { %8264 = vmatprep.subr.bf16.mxu0 %v8974_v48  ;;  %8286 = vmatprep.subr.bf16.mxu1 %v8975_v50  ;;  %v8663_v47 = vpack.c.bf16 %v6707_v14, %v6706_v18  ;;  %v6705_v48 = vld [vmem:[%s10999_s1] sm:$0x3] }
0x23ab   :  { %8265 = vmatpush3.bf16.msra.mxu0 %v8976_v5  ;;  %8287 = vmatpush3.bf16.msra.mxu1 %v8977_v2 }
0x23ac   :  { %8266 = vmatprep.subr.bf16.mxu0 %v8978_v51  ;;  %8288 = vmatprep.subr.bf16.mxu1 %v8979_v20 }
0x23af   :  { %8267 = vmatpush3.bf16.msra.mxu0 %v8980_v52  ;;  %8289 = vmatpush3.bf16.msra.mxu1 %v8981_v38 }
0x23b0   :  { %8662 = vmatprep.subr.bf16.mxu0 %v9076_v46  ;;  %8665 = vmatprep.subr.bf16.mxu1 %v9076_v46 }
0x245d   :  { %v8224_v45 = vpop.f32.mrb[136].mxu0  ;;  %v8246_v28 = vpop.f32.mrb[136].mxu1 }
0x245e   :  { %v8225_v53 = vpop.f32.mrb[137].mxu0  ;;  %v8247_v13 = vpop.f32.mrb[137].mxu1 }
0x245f   :  { %v8226_v59 = vadd.f32 %v8225_v53, %v8224_v45  ;;  %v8248_v54 = vadd.f32 %v8247_v13, %v8246_v28  ;;  %v8227_v62 = vpop.f32.mrb[138].mxu0  ;;  %v8249_v55 = vpop.f32.mrb[138].mxu1 }
0x2460   :  { %v8228_v60 = vpop.f32.mrb[139].mxu0  ;;  %v8250_v61 = vpop.f32.mrb[139].mxu1 }
0x2461   :  { %v6114_v63 = vadd.f32 %v8248_v54, %v8226_v59  ;;  %v8229_v1 = vadd.f32 %v8228_v60, %v8227_v62  ;;  %v8251_v3 = vadd.f32 %v8250_v61, %v8249_v55  ;;  %v7844_v62 = vld [vmem:[%s10995_s11 + $0x1] ss:$0 sm:$0xff] }
0x2463   :  { %v10822_v49 = vadd.f32 %v6114_v63, %v10690_v34  ;;  %v6117_v21 = vadd.f32 %v8251_v3, %v8229_v1 }
0x2465   :  { %v10827_v10 = vadd.f32 %v6117_v21, %v10694_v41  ;;  %v6226_v12 = vpop.f32.mrb[140].mxu0  ;;  %v6269_v15 = vpop.f32.mrb[140].mxu1 }
0x2466   :  { %v6227_v16 = vadd.f32 %v6226_v12, %v6135_v6  ;;  %v6270_v4 = vadd.f32 %v6269_v15, %v6143_v7  ;;  %v6228_v57 = vpop.f32.mrb[141].mxu0  ;;  %v6271_v58 = vpop.f32.mrb[141].mxu1 }
0x2467   :  { %v6229_v39 = vadd.f32 %v6228_v57, %v6139_v8  ;;  %v6272_v23 = vadd.f32 %v6271_v58, %v6147_v9  ;;  %v6230_v40 = vpop.f32.mrb[142].mxu0  ;;  %v6273_v35 = vpop.f32.mrb[142].mxu1  ;;  %v6797_v58 = vld [vmem:[%s11000_s16 + $0x28] sm:$0xff] }
0x2468   :  { %v6231_v34 = vadd.f32 %v6230_v40, %v6135_v6  ;;  %v6274_v24 = vadd.f32 %v6273_v35, %v6143_v7  ;;  %v6232_v26 = vpop.f32.mrb[143].mxu0  ;;  %v6275_v27 = vpop.f32.mrb[143].mxu1  ;;  %v6278_v43 = vmax.f32 %v6227_v16, 0.0  ;;  %v6280_v17 = vmax.f32 %v6270_v4, 0.0  ;;  %v6799_v35 = vld [vmem:[%s11000_s16 + $0x38] sm:$0xff] }
0x2469   :  { %v6233_v42 = vadd.f32 %v6232_v26, %v6139_v8  ;;  %v6276_v22 = vadd.f32 %v6275_v27, %v6147_v9  ;;  %v6279_v29 = vmax.f32 %v6229_v39, 0.0  ;;  %v6281_v30 = vmax.f32 %v6272_v23, 0.0  ;;  %v6798_v39 = vld [vmem:[%s11000_s16 + $0x30] sm:$0xff] }
0x246a   :  { %v6282_v41 = vmax.f32 %v6231_v34, 0.0  ;;  %v6284_v25 = vmax.f32 %v6274_v24, 0.0  ;;  %v6792_v34 = vld [vmem:[%s11000_s16] sm:$0xff]  ;;  %v6793_v24 = vld [vmem:[%s11000_s16 + $0x8] sm:$0xff]  ;;  %v8669_v26 = vpack.c.bf16 %v6799_v35, %v6798_v39 }
0x246b   :  { %v6283_v19 = vmax.f32 %v6233_v42, 0.0  ;;  %v6285_v31 = vmax.f32 %v6276_v22, 0.0  ;;  %v8678_v27 = vpack.c.bf16 %v6793_v24, %v6792_v34  ;;  %v6794_v42 = vld [vmem:[%s11000_s16 + $0x10] sm:$0xff]  ;;  %v6800_v22 = vld [vmem:[%s11000_s16 + $0x40] sm:$0xff]  ;;  %v6968_v39 = vld [vmem:[%s11002_s18 + $0x28] sm:$0xff] }
0x246c   :  { %v6286_v36 = vpack.c.bf16 %v6282_v41, %v6278_v43  ;;  %v6288_v11 = vpack.c.bf16 %v6284_v25, %v6280_v17  ;;  %v6801_v43 = vld [vmem:[%s11000_s16 + $0x48] sm:$0xff]  ;;  %v6795_v17 = vld [vmem:[%s11000_s16 + $0x18] sm:$0xff] }
0x246d   :  { %v6287_v37 = vpack.c.bf16 %v6283_v19, %v6279_v29  ;;  %v6289_v44 = vpack.c.bf16 %v6285_v31, %v6281_v30  ;;  %v8681_v41 = vpack.c.bf16 %v6795_v17, %v6794_v42  ;;  %v8672_v25 = vpack.c.bf16 %v6801_v43, %v6800_v22  ;;  %v7849_v29 = vld [vmem:[%s11001_s15] ss:$0 sm:$0xff]  ;;  %v6802_v30 = vld [vmem:[%s11000_s16 + $0x50] sm:$0xff]  ;;  %v6803_v19 = vld [vmem:[%s11000_s16 + $0x58] sm:$0xff] }
0x246e   :  { %v6970_v34 = vld [vmem:[%s11002_s18 + $0x38] sm:$0xff]  ;;  %v7054_v42 = vld [vmem:[%s11003_s20 + $0x10] sm:$0xff] }
0x246f   :  { %6578 = vmatprep.mubr.bf16.mxu0 %v6287_v37  ;;  %6619 = vmatprep.mubr.bf16.mxu1 %v6289_v44  ;;  %v7055_v43 = vld [vmem:[%s11003_s20 + $0x18] sm:$0xff] }
0x2470   :  { %6579 = vmatmul.mubr.bf16.vlgmr.msra.gmra.mrb[144].mxu0 %v6286_v36  ;;  %6620 = vmatmul.mubr.bf16.vlgmr.msra.gmra.mrb[144].mxu1 %v6288_v11  ;;  %v8675_v36 = vpack.c.bf16 %v6803_v19, %v6802_v30  ;;  %v8699_v17 = vpack.c.bf16 %v7055_v43, %v7054_v42  ;;  %v7853_v19 = vld [vmem:[%s11004_s17] ss:$0 sm:$0xff] }
0x2471   :  { %8591 = vmatprep.mubr.msk.f32.mxu0 %vm9063_vm0, %v9062_v0  ;;  %8610 = vmatprep.mubr.msk.f32.mxu1 %vm9063_vm0, %v9062_v0 }
0x2472   :  { %8664 = vmatpush3.bf16.msra.mxu0 %v8663_v47 }
0x2473   :  { %8677 = vmatprep.subr.bf16.mxu0 %v9076_v46 }
0x2478   :  { %8592 = vmatmul.mubr.msk.f32.vlgmr.msra.gmra.mrb[148].mxu0 %vm6715_vm4, %v6705_v48 }
0x2479   :  { %8621 = vmatprep.mubr.msk.f32.mxu0 %vm9063_vm0, %v9062_v0  ;;  %8679 = vmatpush3.bf16.msra.mxu0 %v8678_v27  ;;  %v7053_v27 = vld [vmem:[%s11003_s20 + $0x8] sm:$0xff] }
0x247a   :  { %8680 = vmatprep.subr.bf16.mxu0 %v9076_v46 }
0x247d   :  { %8682 = vmatpush3.bf16.msra.mxu0 %v8681_v41  ;;  %v7056_v41 = vld [vmem:[%s11003_s20 + $0x20] sm:$0xff] }
0x247e   :  { %8683 = vmatprep.subr.bf16.mxu0 %v9076_v46 }
0x2543   :  { %v8268_v50 = vpop.f32.mrb[144].mxu0  ;;  %v8290_v5 = vpop.f32.mrb[144].mxu1 }
0x2544   :  { %v8269_v2 = vpop.f32.mrb[145].mxu0  ;;  %v8291_v51 = vpop.f32.mrb[145].mxu1 }
0x2545   :  { %v8270_v20 = vadd.f32 %v8269_v2, %v8268_v50  ;;  %v8292_v52 = vadd.f32 %v8291_v51, %v8290_v5  ;;  %v8271_v38 = vpop.f32.mrb[146].mxu0  ;;  %v8293_v45 = vpop.f32.mrb[146].mxu1  ;;  %v7847_v5 = vld [vmem:[%s10996_s12 + $0x1] ss:$0 sm:$0xff] }
0x2546   :  { %v8272_v28 = vpop.f32.mrb[147].mxu0  ;;  %v8294_v53 = vpop.f32.mrb[147].mxu1 }
0x2547   :  { %v6622_v13 = vadd.f32 %v8292_v52, %v8270_v20  ;;  %v8273_v59 = vadd.f32 %v8272_v28, %v8271_v38  ;;  %v8295_v54 = vadd.f32 %v8294_v53, %v8293_v45  ;;  %v7848_v20 = vld [vmem:[%s10997_s13 + $0x1] ss:$0 sm:$0xff] }
0x2549   :  { %v6628_v55 = vadd.f32 %v6622_v13, %v10822_v49  ;;  %v6625_v56 = vadd.f32 %v8295_v54, %v8273_v59 }
0x254b   :  { %v6629_v60 = vadd.f32 %v6625_v56, %v10827_v10  ;;  %v6638_v61 = vadd.f32 %v7844_v62, %v6628_v55  ;;  %v6785_v57 = vpop.f32.mrb[148].mxu0 }
0x254c   :  { %v8593_v23 = vpop.f32.mrb[149].mxu0  ;;  %v6786_v31 = vadd.f32 %v7849_v29, %v6785_v57 }
0x254d   :  { %v6640_v63 = vadd.f32 %v6638_v61, %v10301_v32  ;;  %v6639_v1 = vadd.f32 %v7844_v62, %v6629_v60 }
0x254e   :  { %v6791_v11 = vmax.f32 %v6786_v31, 0.0 }
0x254f   :  { %v6646_v3 = vsel %vm100_vm1, %v6640_v63, 0.0  ;;  %v6641_v6 = vadd.f32 %v6639_v1, %v10303_v33  ;;  %v6796_v33 = vld [vmem:[%s11000_s16 + $0x20] sm:$0xff] }
0x2550   :  { %6647 = vadd.xlane.f32.xlu1 %v6646_v3  ;;  %v8666_v40 = vpack.c.bf16 %v6797_v58, %v6796_v33  ;;  %v6967_v58 = vld [vmem:[%s11002_s18 + $0x20] sm:$0xff] }
0x2551   :  { %v6649_v7 = vsel %vm100_vm1, %v6641_v6, 0.0  ;;  %v8690_v23 = vpack.c.bf16 %v6968_v39, %v6967_v58 }
0x2552   :  { %6650 = vadd.xlane.f32.xlu0 %v6649_v7  ;;  %8667 = vmatpush3.bf16.msra.mxu1 %v8666_v40 }
0x2553   :  { %8668 = vmatprep.subr.bf16.mxu1 %v9076_v46 }
0x2556   :  { %8670 = vmatpush3.bf16.msra.mxu1 %v8669_v26  ;;  %v7052_v26 = vld [vmem:[%s11003_s20] sm:$0xff] }
0x2557   :  { %8671 = vmatprep.subr.bf16.mxu1 %v9076_v46  ;;  %v8696_v22 = vpack.c.bf16 %v7053_v27, %v7052_v26 }
0x255a   :  { %8673 = vmatpush3.bf16.msra.mxu1 %v8672_v25  ;;  %v7057_v25 = vld [vmem:[%s11003_s20 + $0x28] sm:$0xff] }
0x255b   :  { %8674 = vmatprep.subr.bf16.mxu1 %v9076_v46  ;;  %v8702_v29 = vpack.c.bf16 %v7057_v25, %v7056_v41 }
0x255e   :  { %8676 = vmatpush3.bf16.msra.mxu1 %v8675_v36 }
0x255f   :  { %8695 = vmatprep.subr.bf16.mxu1 %v9076_v46 }
0x2561   :  { %8611 = vmatmul.mubr.msk.f32.vlgmr.msra.gmra.mrb[148].mxu1 %vm6804_vm5, %v6791_v11 }
0x2562   :  { %8659 = vmatprep.mubr.msk.f32.mxu1 %vm9063_vm0, %v9062_v0  ;;  %8697 = vmatpush3.bf16.msra.mxu1 %v8696_v22 }
0x2563   :  { %8698 = vmatprep.subr.bf16.mxu1 %v9076_v46 }
0x2566   :  { %8700 = vmatpush3.bf16.msra.mxu1 %v8699_v17 }
0x2567   :  { %8701 = vmatprep.subr.bf16.mxu1 %v9076_v46 }
0x256a   :  { %8703 = vmatpush3.bf16.msra.mxu1 %v8702_v29 }
0x256b   :  { %8704 = vmatprep.subr.bf16.mxu1 %v9076_v46 }
0x25dd   :  { %v6648_v21 = vpop.xlane.xlu1 %6647 }
0x25de   :  { %v6652_v8 = vmul.f32 0.03125, %v6648_v21 }
0x25df   :  { %v6651_v9 = vpop.xlane.xlu0 %6650 }
0x25e0   :  { %v6654_v12 = vsub.f32 %v6640_v63, %v6652_v8  ;;  %v6653_v49 = vmul.f32 0.03125, %v6651_v9  ;;  %v6963_v9 = vld [vmem:[%s11002_s18] sm:$0xff] }
0x25e2   :  { %v6655_v15 = vsub.f32 %v6641_v6, %v6653_v49  ;;  %v6656_v16 = vmul.f32 %v6654_v12, %v6654_v12 }
0x25e4   :  { %v6658_v10 = vsel %vm100_vm1, %v6656_v16, 0.0  ;;  %v6657_v4 = vmul.f32 %v6655_v15, %v6655_v15 }
0x25e5   :  { %6659 = vadd.xlane.f32.xlu1 %v6658_v10 }
0x25e6   :  { %v6661_v32 = vsel %vm100_vm1, %v6657_v4, 0.0  ;;  %v6965_v4 = vld [vmem:[%s11002_s18 + $0x10] sm:$0xff] }
0x25e7   :  { %6662 = vadd.xlane.f32.xlu0 %v6661_v32  ;;  %v6966_v32 = vld [vmem:[%s11002_s18 + $0x18] sm:$0xff] }
0x25e8   :  { %v8687_v33 = vpack.c.bf16 %v6966_v32, %v6965_v4 }
0x2634   :  { %v6874_v40 = vpop.f32.mrb[148].mxu1 }
0x2635   :  { %v8612_v35 = vpop.f32.mrb[149].mxu1 }
0x2672   :  { %v6660_v37 = vpop.xlane.xlu1 %6659 }
0x2673   :  { %v6664_v44 = vmul.f32 0.03125, %v6660_v37 }
0x2674   :  { %v6663_v18 = vpop.xlane.xlu0 %6662 }
0x2675   :  { %v6666_v14 = vadd.f32 1e-05, %v6664_v44  ;;  %v6665_v47 = vmul.f32 0.03125, %v6663_v18  ;;  %v7058_v44 = vld [vmem:[%s11003_s20 + $0x30] sm:$0xff]  ;;  %v7059_v18 = vld [vmem:[%s11003_s20 + $0x38] sm:$0xff] }
0x2677   :  { %9058 = vrsqrt.f32 %v6666_v14  ;;  %v6667_v48 = vadd.f32 1e-05, %v6665_v47  ;;  %v27_v14 = vstv %s11065_s22  ;;  %v7854_v47 = vld [vmem:[%s11066_s3] ss:$0 sm:$0xff] }
0x2678   :  { %28 = vst [vmem:[#allocation2] sm:$0x1] %v27_v14 }
0x2679   :  { %9060 = vrsqrt.f32 %v6667_v48 }
0x2681   :  { %v9059_v50 = vpop.eup %9058 }
0x2682   :  { %v6670_v2 = vmul.f32 %v9059_v50, %v6654_v12  ;;  %v6964_v12 = vld [vmem:[%s11002_s18 + $0x8] sm:$0xff] }
0x2683   :  { %v9061_v51 = vpop.eup %9060  ;;  %v8684_v10 = vpack.c.bf16 %v6964_v12, %v6963_v9 }
0x2684   :  { %v6678_v52 = vmul.f32 %v7847_v5, %v6670_v2  ;;  %v6671_v38 = vmul.f32 %v9061_v51, %v6655_v15  ;;  %v7856_v51 = vld [vmem:[#allocation2] ss:$0 sm:$0xff] }
0x2686   :  { %v6686_v45 = vadd.f32 %v7848_v20, %v6678_v52  ;;  %v6679_v28 = vmul.f32 %v7847_v5, %v6671_v38 }
0x2688   :  { %v6687_v53 = vadd.f32 %v7848_v20, %v6679_v28  ;;  %v6688_v13 = vsel %vm100_vm1, %v6686_v45, 0.0 }
0x2689   :  { %v6689_v59 = vrot.slane %v6688_v13, 4 }
0x268a   :  { %v6695_v54 = vsel %vm100_vm1, %v6687_v53, 0.0 }
0x268b   :  { %v6690_v62 = vadd.f32 %v6689_v59, %v6688_v13  ;;  %v6696_v55 = vrot.slane %v6695_v54, 4 }
0x268d   :  { %v6691_v56 = vrot.slane %v6690_v62, 2  ;;  %v6697_v60 = vadd.f32 %v6696_v55, %v6695_v54 }
0x268f   :  { %v6692_v61 = vadd.f32 %v6691_v56, %v6690_v62  ;;  %v6698_v63 = vrot.slane %v6697_v60, 2 }
0x2691   :  { %v6693_v1 = vrot.slane %v6692_v61, 1  ;;  %v6699_v3 = vadd.f32 %v6698_v63, %v6697_v60 }
0x2693   :  { %v6694_v6 = vadd.f32 %v6693_v1, %v6692_v61  ;;  %v6700_v7 = vrot.slane %v6699_v3, 1 }
0x2695   :  { %v6701_v21 = vadd.f32 %v6700_v7, %v6699_v3  ;;  %v6703_v8 = vmul.f32 0.125, %v6694_v6 }
0x2697   :  { %v6704_v49 = vmul.f32 0.125, %v6701_v21  ;;  %v6789_v15 = vmax.f32 %v6703_v8, 0.0 }
0x2699   :  { %v6790_v16 = vmax.f32 %v6704_v49, 0.0 }
0x269b   :  { %v6881_v57 = vsel %vm6880_vm6, %v6790_v16, %v6789_v15 }
0x269c   :  { %8622 = vmatmul.mubr.msk.f32.vlgmr.msra.gmra.mrb[150].mxu0 %vm100_vm1, %v6881_v57 }
0x269d   :  { %8685 = vmatpush3.bf16.msra.mxu0 %v8684_v10  ;;  %8640 = vmatprep.mubr.msk.f32.mxu0 %vm9063_vm0, %v9062_v0  ;;  %v6969_v0 = vld [vmem:[%s11002_s18 + $0x30] sm:$0xff] }
0x269e   :  { %8686 = vmatprep.subr.bf16.mxu0 %v9076_v46  ;;  %v8693_v24 = vpack.c.bf16 %v6970_v34, %v6969_v0 }
0x26a1   :  { %8688 = vmatpush3.bf16.msra.mxu0 %v8687_v33 }
0x26a2   :  { %8689 = vmatprep.subr.bf16.mxu0 %v9076_v46 }
0x26a5   :  { %8691 = vmatpush3.bf16.msra.mxu0 %v8690_v23 }
0x26a6   :  { %8692 = vmatprep.subr.bf16.mxu0 %v9076_v46  ;;  %v8705_v46 = vpack.c.bf16 %v7059_v18, %v7058_v44 }
0x26a8   :  { %8706 = vmatpush3.bf16.msra.mxu1 %v8705_v46 }
0x26a9   :  { %8694 = vmatpush3.bf16.msra.mxu0 %v8693_v24 }
0x276f   :  { %v6950_v30 = vpop.f32.mrb[150].mxu0 }
0x2770   :  { %v6951_v31 = vadd.f32 %v6950_v30, %v6874_v40  ;;  %v8623_v36 = vpop.f32.mrb[151].mxu0 }
0x2772   :  { %v6961_v11 = vadd.f32 %v7853_v19, %v6951_v31 }
0x2774   :  { %v6962_v37 = vmax.f32 %v6961_v11, 0.0 }
0x2776   :  { %8641 = vmatmul.mubr.msk.f32.vlgmr.msra.gmra.mrb[152].mxu0 %vm6804_vm5, %v6962_v37 }
0x2849   :  { %v7047_v48 = vpop.f32.mrb[152].mxu0 }
0x284a   :  { %v7048_v50 = vadd.f32 %v7854_v47, %v7047_v48  ;;  %v8642_v5 = vpop.f32.mrb[153].mxu0 }
0x284c   :  { %v7051_v2 = vmax.f32 %v7048_v50, 0.0 }
0x284e   :  { %8660 = vmatmul.mubr.msk.f32.vlgmr.msra.gmra.mrb[150].mxu1 %vm6804_vm5, %v7051_v2 }
0x2921   :  { %v7136_v20 = vpop.f32.mrb[150].mxu1 }
0x2922   :  { %v7137_v52 = vadd.f32 %v7856_v51, %v7136_v20  ;;  %v8661_v38 = vpop.f32.mrb[151].mxu1 }
0x2924   :  { %7141 = vst.msk [vmem:[%s11067_s25] sm:$0x3] %vm7140_vm7, %v7137_v52 }

</bundles_post_ra>
